<compile_context>
chip_gen: v7x
topology: tpu7x:2x2x1
jax: 0.10.0
libtpu: 0.0.40
codegen_flags: <defaults>
</compile_context>

<pallas_src>
import functools
import math

import numpy as np
import jax
import jax.numpy as jnp
from jax.experimental import pallas as pl
from jax.experimental.pallas import tpu as pltpu


# ---------------------------------------------------------------------------
# Fused Pallas kernel: act((A @ W) + shift) with K-reduction accumulator
# ---------------------------------------------------------------------------
def _fused_matmul_kernel(*refs, act):
    if act == "col_sigmoid":
        a_ref, w_ref, shift_ref, sel_ref, o_ref, acc_ref = refs
    else:
        a_ref, w_ref, shift_ref, o_ref, acc_ref = refs

    # Hoisted grid scalars: never call program_id/num_programs inside a
    # pl.when body (nested binds fail lowering).
    k_step = pl.program_id(2)
    k_last = pl.num_programs(2) - 1

    @pl.when(k_step == 0)
    def _init():
        acc_ref[...] = jnp.zeros_like(acc_ref)

    # In-kernel bf16 cast of the A tile (no wrapper-side cast pass over HBM);
    # W is pre-cast (BN scale folded).  f32 accumulation on the MXU.
    acc_ref[...] += jnp.dot(a_ref[...].astype(jnp.bfloat16), w_ref[...],
                            preferred_element_type=jnp.float32)

    @pl.when(k_step == k_last)
    def _finalize():
        y = acc_ref[...] + shift_ref[...]
        if act == "silu":
            y = y * (1.0 / (1.0 + jnp.exp(-y)))          # exact SiLU
        elif act == "col_sigmoid":
            # sigmoid only on the mask columns, selected by the precomputed
            # (1, tn) selector vector (offset columns pass through unchanged).
            sig = 1.0 / (1.0 + jnp.exp(-y))
            y = jnp.where(sel_ref[...] > 0.5, sig, y)
        o_ref[...] = y.astype(o_ref.dtype)


def _pick_tm(M, want=512):
    """Largest multiple-of-8 divisor of M that is <= `want`; falls back to the
    full M (a full-extent block dim is always legal).  At real DCN sizes M is
    large, so there are plenty of M steps for the v7x 2-TC split regardless."""
    start = min(want, M)
    start -= start % 8
    for cand in range(start, 7, -8):
        if M % cand == 0:
            return cand
    return M


def _pick_tk(K, tm, tn, a_itemsize=4, budget=6 << 20):
    """Prefer tk == K (one reduction step: one epilogue, weight tile DMA'd once
    per output column block) whenever the double-buffered A+W tiles fit the
    budget; otherwise fall back to a 128-aligned divisor of K."""
    if 2 * (tm * K * a_itemsize + K * tn * 2) <= budget:
        return K
    for cand in (512, 256, 128):
        if K % cand == 0 and K > cand:
            return cand
    return K


def fused_matmul(a, w, scale, shift, act="none", *, sigmoid_cols=None,
                 out_dtype=jnp.float32, trim=True, tm_want=512):
    """out = act((a @ w) * scale + shift).  a:(M,K)  w:(K,N)  scale/shift:(N,).

    `scale` is folded into the weight columns so the kernel epilogue is just
    `+ shift` (+ activation).  N is padded to a lane-dense multiple of the N
    tile; when trim=False the padded (M, Np) result is returned and callers
    slice only the channel ranges they need (padded columns are exact zeros).
    """
    M, K = a.shape
    K2, N = w.shape
    assert K == K2

    # Fold BN scale into weight columns (K*N work, negligible vs M*N).
    w = w.astype(jnp.float32) * scale.reshape(1, N).astype(jnp.float32)
    shift = shift.reshape(1, N).astype(jnp.float32)

    # Lane-dense output tile: 256 for the 256-wide MXU (v6e/v7x) when the
    # layer is wide enough, else 128 (also the right choice on v5e).
    tn = 256 if N >= 256 else 128
    Np = ((N + tn - 1) // tn) * tn
    if Np != N:
        w = jnp.pad(w, ((0, 0), (0, Np - N)))
        shift = jnp.pad(shift, ((0, 0), (0, Np - N)))
    w = w.astype(jnp.bfloat16)

    a_itemsize = jnp.dtype(a.dtype).itemsize
    tm = _pick_tm(M, tm_want)
    tk = _pick_tk(K, tm, tn, a_itemsize=a_itemsize)
    grid = (M // tm, Np // tn, K // tk)

    inputs = [a, w, shift]
    in_specs = [
        pl.BlockSpec((tm, tk), lambda i, j, k: (i, k)),
        pl.BlockSpec((tk, tn), lambda i, j, k: (k, j)),
        pl.BlockSpec((1, tn), lambda i, j, k: (0, j)),
    ]
    if act == "col_sigmoid":
        lo, hi = sigmoid_cols
        sel = np.zeros((1, Np), np.float32)
        sel[:, lo:hi] = 1.0
        inputs.append(jnp.asarray(sel))
        in_specs.append(pl.BlockSpec((1, tn), lambda i, j, k: (0, j)))

    # VMEM budget derived from the double-buffered tile footprint (keeps the
    # tiling portable to v7x's 64 MiB/TC while leaving pipelining headroom).
    o_itemsize = jnp.dtype(out_dtype).itemsize
    footprint = (2 * tm * tk * a_itemsize       # A (double-buffered)
                 + 2 * tk * tn * 2              # W bf16 (double-buffered)
                 + 2 * tm * tn * o_itemsize     # out (double-buffered)
                 + tm * tn * 4                  # f32 accumulator
                 + 4 * 2 * tn * 4)              # shift / selector
    vmem_limit = int(min(max(2 * footprint, 16 << 20), 32 << 20))
    vmem_limit = max(vmem_limit, footprint + (4 << 20))

    out = pl.pallas_call(
        functools.partial(_fused_matmul_kernel, act=act),
        out_shape=jax.ShapeDtypeStruct((M, Np), out_dtype),
        grid_spec=pltpu.PrefetchScalarGridSpec(
            num_scalar_prefetch=0,
            grid=grid,
            in_specs=in_specs,
            out_specs=pl.BlockSpec((tm, tn), lambda i, j, k: (i, j)),
            scratch_shapes=[pltpu.VMEM((tm, tn), jnp.float32)],
        ),
        compiler_params=pltpu.CompilerParams(
            dimension_semantics=("parallel", "parallel", "arbitrary"),
            vmem_limit_bytes=vmem_limit,
        ),
    )(*inputs)
    if trim and Np != N:
        out = out[:, :N]
    return out


# ---------------------------------------------------------------------------
# JAX glue: tap-major columns (regular 3x3 conv) and deformable sampling
# ---------------------------------------------------------------------------
def im2col_3x3(x):
    """(B,H,W,C) -> (B*H*W, 9*C) bf16 columns, tap-major (stride 1, pad 1)."""
    # TODO(synk): fold the 9 taps into the matmul reduction grid (per-tap
    # shifted windows via manual DMA) so this (M, 9*C) blob never hits HBM.
    B, H, W, C = x.shape
    xp = jnp.pad(x, ((0, 0), (1, 1), (1, 1), (0, 0)))
    cols = [xp[:, ki:ki + H, kj:kj + W, :] for ki in range(3) for kj in range(3)]
    patches = jnp.stack(cols, axis=3)                       # (B,H,W,9,C)
    return patches.reshape(B * H * W, 9 * C).astype(jnp.bfloat16)


def deform_sample(x, offset, mask, K=3, pad=1, stride=1, dilation=1):
    """Modulated deformable columns (torchvision deform_conv2d semantics).

    x:(B,H,W,C) f32.  offset:(B,H,W,2*K*K) interleaved [dh, dw] per tap.
    mask:(B,H,W,K*K).  Returns (B*H*W, K*K*C) bf16 tap-major columns.
    deformable_groups == 1.  All 9 taps are sampled with 4 batched gathers.
    """
    # TODO(synk): the data-dependent bilinear gather stays in plain JAX; a
    # Pallas manual-DMA row-gather (paged-attention style) is the remaining
    # large end-to-end win.
    B, H, W, C = x.shape
    KK = K * K
    ki = jnp.arange(KK, dtype=jnp.float32) // K
    kj = jnp.arange(KK, dtype=jnp.float32) % K
    hs = jnp.arange(H, dtype=jnp.float32)
    ws = jnp.arange(W, dtype=jnp.float32)

    off_h = offset[..., 0::2]                               # (B,H,W,KK)
    off_w = offset[..., 1::2]
    ph = hs[None, :, None, None] * stride - pad + ki * dilation + off_h
    pw = ws[None, None, :, None] * stride - pad + kj * dilation + off_w

    valid = (ph > -1.0) & (ph < H) & (pw > -1.0) & (pw < W)
    h_low = jnp.floor(ph)
    w_low = jnp.floor(pw)
    lh = ph - h_low
    lw = pw - w_low
    hh = 1.0 - lh
    hw = 1.0 - lw

    b_idx = jnp.arange(B)[:, None, None, None]

    def corner(hi, wi):
        inb = (hi >= 0.0) & (hi <= H - 1.0) & (wi >= 0.0) & (wi <= W - 1.0)
        hic = jnp.clip(hi, 0.0, H - 1.0).astype(jnp.int32)
        wic = jnp.clip(wi, 0.0, W - 1.0).astype(jnp.int32)
        v = x[b_idx, hic, wic, :]                           # (B,H,W,KK,C)
        return v * inb[..., None].astype(x.dtype)

    v1 = corner(h_low, w_low)
    v2 = corner(h_low, w_low + 1.0)
    v3 = corner(h_low + 1.0, w_low)
    v4 = corner(h_low + 1.0, w_low + 1.0)
    val = ((hh * hw)[..., None] * v1 + (hh * lw)[..., None] * v2 +
           (lh * hw)[..., None] * v3 + (lh * lw)[..., None] * v4)
    gate = jnp.where(valid, mask, 0.0)                      # modulation * OOB gate
    val = val * gate[..., None]
    return val.reshape(B * H * W, KK * C).astype(jnp.bfloat16)


# ---------------------------------------------------------------------------
# Modules
# ---------------------------------------------------------------------------
def dcn_forward(x_nhwc, p):
    """DCN: 3x3 offset/mask conv -> deform_conv2d -> BN -> SiLU (NHWC)."""
    B, H, W, C = x_nhwc.shape
    KK = 9
    cout = p["w"].shape[1]
    n_om = p["w_om"].shape[1]                               # 3*KK = 27

    # conv_offset_mask: 3x3 conv with bias; sigmoid on the mask columns is
    # fused into the matmul epilogue via the selector vector.
    cols = im2col_3x3(x_nhwc)                               # (M, 9*C) bf16
    om = fused_matmul(cols, p["w_om"], jnp.ones((n_om,), jnp.float32),
                      p["b_om"], act="col_sigmoid",
                      sigmoid_cols=(2 * KK, 3 * KK), trim=False)
    om = om[:, :n_om].reshape(B, H, W, n_om)
    o1 = om[..., :KK]
    o2 = om[..., KK:2 * KK]
    mask = om[..., 2 * KK:3 * KK]                           # already sigmoid'd
    offset = jnp.concatenate([o1, o2], axis=-1)             # torch.cat((o1,o2),1)

    # deformable sampling (JAX gather glue) + fused matmul/bias/BN/SiLU (Pallas)
    sampled = deform_sample(x_nhwc, offset, mask)           # (M, 9*C) bf16
    out = fused_matmul(sampled, p["w"], p["scale"], p["shift"], act="silu",
                       trim=False)
    return out[:, :cout].reshape(B, H, W, cout)             # slice fuses w/ reshape


def dcnv2_forward(x_nchw, params):
    """DCNV2 forward (matches the PyTorch module, eval-mode BatchNorm)."""
    B, C1, H, W = x_nchw.shape
    x = jnp.transpose(x_nchw, (0, 2, 3, 1))                  # NCHW -> NHWC
    M = B * H * W
    c = params["cv1"]["w"].shape[1] // 2                     # static under jit

    p = params["cv1"]
    ypad = fused_matmul(x.reshape(M, C1), p["w"], p["scale"], p["shift"],
                        act="silu", trim=False)
    y0 = ypad[:, :c].reshape(B, H, W, c)
    y1 = ypad[:, c:2 * c].reshape(B, H, W, c)

    ys = [y0, y1]
    cur = y1
    for bp in params["m"]:                                   # Bottleneck_DCN
        cur = dcn_forward(cur, bp["dcn1"])
        cur = dcn_forward(cur, bp["dcn2"])
        ys.append(cur)

    cat = jnp.concatenate(ys, axis=-1)                       # (B,H,W,(2+n)*c)
    p = params["cv2"]
    out = fused_matmul(cat.reshape(M, cat.shape[-1]), p["w"], p["scale"],
                       p["shift"], act="silu", trim=True)
    out = out.reshape(B, H, W, -1)
    return jnp.transpose(out, (0, 3, 1, 2))                  # NHWC -> NCHW


# ---------------------------------------------------------------------------
# Deterministic parameter initialization (shapes per the module's __init__)
# ---------------------------------------------------------------------------
def init_params(key, c1, c2, n=1, e=0.5):
    c = int(c2 * e)
    keys = iter(jax.random.split(key, 256))
    eps = 1e-5

    def bn(cout):  # eval-mode BN folded to (scale, shift)
        gamma = jax.random.uniform(next(keys), (cout,), minval=0.5, maxval=1.5)
        beta = jax.random.normal(next(keys), (cout,)) * 0.1
        mean = jax.random.normal(next(keys), (cout,)) * 0.1
        var = jax.random.uniform(next(keys), (cout,), minval=0.5, maxval=1.5)
        scale = gamma / jnp.sqrt(var + eps)
        return scale, beta - mean * scale

    def conv1x1(cin, cout):  # Conv: 1x1 conv (no bias) + BN + SiLU
        w = jax.random.normal(next(keys), (cout, cin)) * (1.0 / math.sqrt(cin))
        scale, shift = bn(cout)
        return {"w": w.T, "scale": scale, "shift": shift}

    def flat3x3(w):  # (cout, cin, 3, 3) -> tap-major (9*cin, cout)
        cout, cin = w.shape[0], w.shape[1]
        return jnp.transpose(w, (2, 3, 1, 0)).reshape(9 * cin, cout)

    def dcn(cin, cout):  # DCN: deform 3x3 conv + bias + BN + SiLU
        K = 3
        std = 1.0 / math.sqrt(cin * K * K)
        w = jax.random.uniform(next(keys), (cout, cin, K, K), minval=-std, maxval=std)
        bias = jax.random.normal(next(keys), (cout,)) * 0.05
        # NOTE: module zero-inits conv_offset_mask; small random values here so
        # the deformable (bilinear) path is actually exercised.
        w_om = jax.random.normal(next(keys), (3 * K * K, cin, K, K)) * 0.05
        b_om = jax.random.normal(next(keys), (3 * K * K,)) * 0.05
        scale, shift0 = bn(cout)
        return {
            "w": flat3x3(w),
            "scale": scale,
            "shift": shift0 + bias * scale,   # fold deform-conv bias into BN shift
            "w_om": flat3x3(w_om),
            "b_om": b_om,
        }

    return {
        "cv1": conv1x1(c1, 2 * c),
        "cv2": conv1x1((2 + n) * c, c2),
        "m": [{"dcn1": dcn(c, c), "dcn2": dcn(c, c)} for _ in range(n)],
    }


if __name__ == "__main__":
    key = jax.random.PRNGKey(0)
    kx, kp = jax.random.split(key)

    B, C1, H, W = 2, 8, 16, 16
    C2, N_BOTTLENECK, E = 8, 1, 0.5

    x = jax.random.normal(kx, (B, C1, H, W), dtype=jnp.float32)
    params = init_params(kp, C1, C2, n=N_BOTTLENECK, e=E)

    out = jax.jit(dcnv2_forward)(x, params)
    out = jax.block_until_ready(out)
    assert out.shape == (B, C2, H, W), out.shape
    assert jnp.all(jnp.isfinite(out))
    print("KERNEL_OK")
</pallas_src>

<mosaic_0001>
module attributes {stable_mosaic.version = 11 : i64} {
  func.func @_fused_matmul_kernel(%arg0: i32, %arg1: i32, %arg2: i32, %arg3: memref<512x8xf32, #tpu.memory_space<vmem>>, %arg4: memref<8x128xbf16, #tpu.memory_space<vmem>>, %arg5: memref<1x128xf32, #tpu.memory_space<vmem>>, %arg6: memref<512x128xf32, #tpu.memory_space<vmem>>, %arg7: memref<512x128xf32, #tpu.memory_space<vmem>>) attributes {dimension_semantics = [#tpu.dimension_semantics<parallel>, #tpu.dimension_semantics<parallel>, #tpu.dimension_semantics<arbitrary>], iteration_bounds = array<i64: 1, 1, 1>, scalar_prefetch = 0 : i64, scratch_operands = 1 : i64, tpu.core_type = #tpu.core_type<tc>, window_params = [{transform_indices = @transform_0, window_bounds = array<i64: 512, 8>}, {transform_indices = @transform_1, window_bounds = array<i64: 8, 128>}, {transform_indices = @transform_2, window_bounds = array<i64: 1, 128>}, {transform_indices = @transform_3, window_bounds = array<i64: 512, 128>}]} {
    %c0_i32 = arith.constant 0 : i32
    %0 = arith.cmpi eq, %arg2, %c0_i32 : i32
    %1 = arith.extui %0 : i1 to i32
    %c0_i32_0 = arith.constant 0 : i32
    %2 = arith.cmpi ne, %1, %c0_i32_0 : i32
    scf.if %2 {
      %cst_10 = arith.constant 0.000000e+00 : f32
      %13 = vector.broadcast %cst_10 : f32 to vector<512x128xf32>
      %c0_11 = arith.constant 0 : index
      %c0_12 = arith.constant 0 : index
      %14 = vector.load %arg7[%c0_11, %c0_12] : memref<512x128xf32, #tpu.memory_space<vmem>>, vector<512x128xf32>
      tpu.vector_store %arg7[%c0_11, %c0_12], %13 {strides = array<i32>} : memref<512x128xf32, #tpu.memory_space<vmem>>, vector<512x128xf32>,
    } else {
    }
    %c0 = arith.constant 0 : index
    %c0_1 = arith.constant 0 : index
    %3 = vector.load %arg7[%c0, %c0_1] : memref<512x128xf32, #tpu.memory_space<vmem>>, vector<512x128xf32>
    %c0_2 = arith.constant 0 : index
    %c0_3 = arith.constant 0 : index
    %4 = vector.load %arg3[%c0_2, %c0_3] : memref<512x8xf32, #tpu.memory_space<vmem>>, vector<512x8xf32>
    %5 = arith.truncf %4 : vector<512x8xf32> to vector<512x8xbf16>
    %c0_4 = arith.constant 0 : index
    %c0_5 = arith.constant 0 : index
    %6 = vector.load %arg4[%c0_4, %c0_5] : memref<8x128xbf16, #tpu.memory_space<vmem>>, vector<8x128xbf16>
    %cst = arith.constant dense<0.000000e+00> : vector<512x128xf32>
    %7 = tpu.matmul %5, %6, %cst {dimension_numbers = #tpu.dot_dimension_numbers<[1], [0], [0], [1], [0, 0, 1, 1], [], []>} : vector<512x8xbf16>, vector<8x128xbf16>, vector<512x128xf32> -> vector<512x128xf32>
    %8 = arith.addf %3, %7 : vector<512x128xf32>
    %c0_6 = arith.constant 0 : index
    %c0_7 = arith.constant 0 : index
    %9 = vector.load %arg7[%c0_6, %c0_7] : memref<512x128xf32, #tpu.memory_space<vmem>>, vector<512x128xf32>
    tpu.vector_store %arg7[%c0_6, %c0_7], %8 {strides = array<i32>} : memref<512x128xf32, #tpu.memory_space<vmem>>, vector<512x128xf32>,
    %c0_i32_8 = arith.constant 0 : i32
    %10 = arith.cmpi eq, %arg2, %c0_i32_8 : i32
    %11 = arith.extui %10 : i1 to i32
    %c0_i32_9 = arith.constant 0 : i32
    %12 = arith.cmpi ne, %11, %c0_i32_9 : i32
    scf.if %12 {
      %c0_10 = arith.constant 0 : index
      %c0_11 = arith.constant 0 : index
      %13 = vector.load %arg7[%c0_10, %c0_11] : memref<512x128xf32, #tpu.memory_space<vmem>>, vector<512x128xf32>
      %c0_12 = arith.constant 0 : index
      %c0_13 = arith.constant 0 : index
      %14 = vector.load %arg5[%c0_12, %c0_13] : memref<1x128xf32, #tpu.memory_space<vmem>>, vector<1x128xf32>
      %15 = vector.broadcast %14 : vector<1x128xf32> to vector<512x128xf32>
      %16 = arith.addf %13, %15 : vector<512x128xf32>
      %cst_14 = arith.constant 0.000000e+00 : f32
      %17 = vector.broadcast %cst_14 : f32 to vector<512x128xf32>
      %18 = arith.subf %17, %16 : vector<512x128xf32>
      %19 = math.exp %18 : vector<512x128xf32>
      %cst_15 = arith.constant 1.000000e+00 : f32
      %20 = vector.broadcast %cst_15 : f32 to vector<512x128xf32>
      %21 = arith.addf %20, %19 : vector<512x128xf32>
      %cst_16 = arith.constant 1.000000e+00 : f32
      %22 = vector.broadcast %cst_16 : f32 to vector<512x128xf32>
      %23 = arith.divf %22, %21 : vector<512x128xf32>
      %24 = arith.mulf %16, %23 : vector<512x128xf32>
      %c0_17 = arith.constant 0 : index
      %c0_18 = arith.constant 0 : index
      %25 = vector.load %arg6[%c0_17, %c0_18] : memref<512x128xf32, #tpu.memory_space<vmem>>, vector<512x128xf32>
      tpu.vector_store %arg6[%c0_17, %c0_18], %24 {strides = array<i32>} : memref<512x128xf32, #tpu.memory_space<vmem>>, vector<512x128xf32>,
    } else {
    }
    return
  }
  func.func @transform_0(%arg0: i32, %arg1: i32, %arg2: i32) -> (i32, i32) {
    %c0_i32 = arith.constant 0 : i32
    return %arg0, %arg2 : i32, i32
  }
  func.func @transform_1(%arg0: i32, %arg1: i32, %arg2: i32) -> (i32, i32) {
    %c0_i32 = arith.constant 0 : i32
    return %arg2, %arg1 : i32, i32
  }
  func.func @transform_2(%arg0: i32, %arg1: i32, %arg2: i32) -> (i32, i32) {
    %c0_i32 = arith.constant 0 : i32
    %c0_i32_0 = arith.constant 0 : i32
    return %c0_i32, %arg1 : i32, i32
  }
  func.func @transform_3(%arg0: i32, %arg1: i32, %arg2: i32) -> (i32, i32) {
    %c0_i32 = arith.constant 0 : i32
    return %arg0, %arg1 : i32, i32
  }
}

module attributes {stable_mosaic.version = 11 : i64} {
  func.func @_fused_matmul_kernel(%arg0: i32, %arg1: i32, %arg2: i32, %arg3: memref<512x36xbf16, #tpu.memory_space<vmem>>, %arg4: memref<36x128xbf16, #tpu.memory_space<vmem>>, %arg5: memref<1x128xf32, #tpu.memory_space<vmem>>, %arg6: memref<1x128xf32, #tpu.memory_space<vmem>>, %arg7: memref<512x128xf32, #tpu.memory_space<vmem>>, %arg8: memref<512x128xf32, #tpu.memory_space<vmem>>) attributes {dimension_semantics = [#tpu.dimension_semantics<parallel>, #tpu.dimension_semantics<parallel>, #tpu.dimension_semantics<arbitrary>], iteration_bounds = array<i64: 1, 1, 1>, scalar_prefetch = 0 : i64, scratch_operands = 1 : i64, tpu.core_type = #tpu.core_type<tc>, window_params = [{transform_indices = @transform_0, window_bounds = array<i64: 512, 36>}, {transform_indices = @transform_1, window_bounds = array<i64: 36, 128>}, {transform_indices = @transform_2, window_bounds = array<i64: 1, 128>}, {transform_indices = @transform_3, window_bounds = array<i64: 1, 128>}, {transform_indices = @transform_4, window_bounds = array<i64: 512, 128>}]} {
    %c0_i32 = arith.constant 0 : i32
    %0 = arith.cmpi eq, %arg2, %c0_i32 : i32
    %1 = arith.extui %0 : i1 to i32
    %c0_i32_0 = arith.constant 0 : i32
    %2 = arith.cmpi ne, %1, %c0_i32_0 : i32
    scf.if %2 {
      %cst_10 = arith.constant 0.000000e+00 : f32
      %12 = vector.broadcast %cst_10 : f32 to vector<512x128xf32>
      %c0_11 = arith.constant 0 : index
      %c0_12 = arith.constant 0 : index
      %13 = vector.load %arg8[%c0_11, %c0_12] : memref<512x128xf32, #tpu.memory_space<vmem>>, vector<512x128xf32>
      tpu.vector_store %arg8[%c0_11, %c0_12], %12 {strides = array<i32>} : memref<512x128xf32, #tpu.memory_space<vmem>>, vector<512x128xf32>,
    } else {
    }
    %c0 = arith.constant 0 : index
    %c0_1 = arith.constant 0 : index
    %3 = vector.load %arg8[%c0, %c0_1] : memref<512x128xf32, #tpu.memory_space<vmem>>, vector<512x128xf32>
    %c0_2 = arith.constant 0 : index
    %c0_3 = arith.constant 0 : index
    %4 = vector.load %arg3[%c0_2, %c0_3] : memref<512x36xbf16, #tpu.memory_space<vmem>>, vector<512x36xbf16>
    %c0_4 = arith.constant 0 : index
    %c0_5 = arith.constant 0 : index
    %5 = vector.load %arg4[%c0_4, %c0_5] : memref<36x128xbf16, #tpu.memory_space<vmem>>, vector<36x128xbf16>
    %cst = arith.constant dense<0.000000e+00> : vector<512x128xf32>
    %6 = tpu.matmul %4, %5, %cst {dimension_numbers = #tpu.dot_dimension_numbers<[1], [0], [0], [1], [0, 0, 1, 1], [], []>} : vector<512x36xbf16>, vector<36x128xbf16>, vector<512x128xf32> -> vector<512x128xf32>
    %7 = arith.addf %3, %6 : vector<512x128xf32>
    %c0_6 = arith.constant 0 : index
    %c0_7 = arith.constant 0 : index
    %8 = vector.load %arg8[%c0_6, %c0_7] : memref<512x128xf32, #tpu.memory_space<vmem>>, vector<512x128xf32>
    tpu.vector_store %arg8[%c0_6, %c0_7], %7 {strides = array<i32>} : memref<512x128xf32, #tpu.memory_space<vmem>>, vector<512x128xf32>,
    %c0_i32_8 = arith.constant 0 : i32
    %9 = arith.cmpi eq, %arg2, %c0_i32_8 : i32
    %10 = arith.extui %9 : i1 to i32
    %c0_i32_9 = arith.constant 0 : i32
    %11 = arith.cmpi ne, %10, %c0_i32_9 : i32
    scf.if %11 {
      %c0_10 = arith.constant 0 : index
      %c0_11 = arith.constant 0 : index
      %12 = vector.load %arg8[%c0_10, %c0_11] : memref<512x128xf32, #tpu.memory_space<vmem>>, vector<512x128xf32>
      %c0_12 = arith.constant 0 : index
      %c0_13 = arith.constant 0 : index
      %13 = vector.load %arg5[%c0_12, %c0_13] : memref<1x128xf32, #tpu.memory_space<vmem>>, vector<1x128xf32>
      %14 = vector.broadcast %13 : vector<1x128xf32> to vector<512x128xf32>
      %15 = arith.addf %12, %14 : vector<512x128xf32>
      %cst_14 = arith.constant 0.000000e+00 : f32
      %16 = vector.broadcast %cst_14 : f32 to vector<512x128xf32>
      %17 = arith.subf %16, %15 : vector<512x128xf32>
      %18 = math.exp %17 : vector<512x128xf32>
      %cst_15 = arith.constant 1.000000e+00 : f32
      %19 = vector.broadcast %cst_15 : f32 to vector<512x128xf32>
      %20 = arith.addf %19, %18 : vector<512x128xf32>
      %cst_16 = arith.constant 1.000000e+00 : f32
      %21 = vector.broadcast %cst_16 : f32 to vector<512x128xf32>
      %22 = arith.divf %21, %20 : vector<512x128xf32>
      %c0_17 = arith.constant 0 : index
      %c0_18 = arith.constant 0 : index
      %23 = vector.load %arg6[%c0_17, %c0_18] : memref<1x128xf32, #tpu.memory_space<vmem>>, vector<1x128xf32>
      %cst_19 = arith.constant 5.000000e-01 : f32
      %24 = vector.broadcast %cst_19 : f32 to vector<1x128xf32>
      %25 = arith.cmpf ogt, %23, %24 : vector<1x128xf32>
      %26 = vector.shape_cast %25 : vector<1x128xi1> to vector<1x128xi1>
      %27 = vector.broadcast %26 : vector<1x128xi1> to vector<512x128xi1>
      %28 = arith.select %27, %22, %15 : vector<512x128xi1>, vector<512x128xf32>
      %c0_20 = arith.constant 0 : index
      %c0_21 = arith.constant 0 : index
      %29 = vector.load %arg7[%c0_20, %c0_21] : memref<512x128xf32, #tpu.memory_space<vmem>>, vector<512x128xf32>
      tpu.vector_store %arg7[%c0_20, %c0_21], %28 {strides = array<i32>} : memref<512x128xf32, #tpu.memory_space<vmem>>, vector<512x128xf32>,
    } else {
    }
    return
  }
  func.func @transform_0(%arg0: i32, %arg1: i32, %arg2: i32) -> (i32, i32) {
    %c0_i32 = arith.constant 0 : i32
    return %arg0, %arg2 : i32, i32
  }
  func.func @transform_1(%arg0: i32, %arg1: i32, %arg2: i32) -> (i32, i32) {
    %c0_i32 = arith.constant 0 : i32
    return %arg2, %arg1 : i32, i32
  }
  func.func @transform_2(%arg0: i32, %arg1: i32, %arg2: i32) -> (i32, i32) {
    %c0_i32 = arith.constant 0 : i32
    %c0_i32_0 = arith.constant 0 : i32
    return %c0_i32, %arg1 : i32, i32
  }
  func.func @transform_3(%arg0: i32, %arg1: i32, %arg2: i32) -> (i32, i32) {
    %c0_i32 = arith.constant 0 : i32
    %c0_i32_0 = arith.constant 0 : i32
    return %c0_i32, %arg1 : i32, i32
  }
  func.func @transform_4(%arg0: i32, %arg1: i32, %arg2: i32) -> (i32, i32) {
    %c0_i32 = arith.constant 0 : i32
    return %arg0, %arg1 : i32, i32
  }
}

module attributes {stable_mosaic.version = 11 : i64} {
  func.func @_fused_matmul_kernel(%arg0: i32, %arg1: i32, %arg2: i32, %arg3: memref<512x36xbf16, #tpu.memory_space<vmem>>, %arg4: memref<36x128xbf16, #tpu.memory_space<vmem>>, %arg5: memref<1x128xf32, #tpu.memory_space<vmem>>, %arg6: memref<512x128xf32, #tpu.memory_space<vmem>>, %arg7: memref<512x128xf32, #tpu.memory_space<vmem>>) attributes {dimension_semantics = [#tpu.dimension_semantics<parallel>, #tpu.dimension_semantics<parallel>, #tpu.dimension_semantics<arbitrary>], iteration_bounds = array<i64: 1, 1, 1>, scalar_prefetch = 0 : i64, scratch_operands = 1 : i64, tpu.core_type = #tpu.core_type<tc>, window_params = [{transform_indices = @transform_0, window_bounds = array<i64: 512, 36>}, {transform_indices = @transform_1, window_bounds = array<i64: 36, 128>}, {transform_indices = @transform_2, window_bounds = array<i64: 1, 128>}, {transform_indices = @transform_3, window_bounds = array<i64: 512, 128>}]} {
    %c0_i32 = arith.constant 0 : i32
    %0 = arith.cmpi eq, %arg2, %c0_i32 : i32
    %1 = arith.extui %0 : i1 to i32
    %c0_i32_0 = arith.constant 0 : i32
    %2 = arith.cmpi ne, %1, %c0_i32_0 : i32
    scf.if %2 {
      %cst_10 = arith.constant 0.000000e+00 : f32
      %12 = vector.broadcast %cst_10 : f32 to vector<512x128xf32>
      %c0_11 = arith.constant 0 : index
      %c0_12 = arith.constant 0 : index
      %13 = vector.load %arg7[%c0_11, %c0_12] : memref<512x128xf32, #tpu.memory_space<vmem>>, vector<512x128xf32>
      tpu.vector_store %arg7[%c0_11, %c0_12], %12 {strides = array<i32>} : memref<512x128xf32, #tpu.memory_space<vmem>>, vector<512x128xf32>,
    } else {
    }
    %c0 = arith.constant 0 : index
    %c0_1 = arith.constant 0 : index
    %3 = vector.load %arg7[%c0, %c0_1] : memref<512x128xf32, #tpu.memory_space<vmem>>, vector<512x128xf32>
    %c0_2 = arith.constant 0 : index
    %c0_3 = arith.constant 0 : index
    %4 = vector.load %arg3[%c0_2, %c0_3] : memref<512x36xbf16, #tpu.memory_space<vmem>>, vector<512x36xbf16>
    %c0_4 = arith.constant 0 : index
    %c0_5 = arith.constant 0 : index
    %5 = vector.load %arg4[%c0_4, %c0_5] : memref<36x128xbf16, #tpu.memory_space<vmem>>, vector<36x128xbf16>
    %cst = arith.constant dense<0.000000e+00> : vector<512x128xf32>
    %6 = tpu.matmul %4, %5, %cst {dimension_numbers = #tpu.dot_dimension_numbers<[1], [0], [0], [1], [0, 0, 1, 1], [], []>} : vector<512x36xbf16>, vector<36x128xbf16>, vector<512x128xf32> -> vector<512x128xf32>
    %7 = arith.addf %3, %6 : vector<512x128xf32>
    %c0_6 = arith.constant 0 : index
    %c0_7 = arith.constant 0 : index
    %8 = vector.load %arg7[%c0_6, %c0_7] : memref<512x128xf32, #tpu.memory_space<vmem>>, vector<512x128xf32>
    tpu.vector_store %arg7[%c0_6, %c0_7], %7 {strides = array<i32>} : memref<512x128xf32, #tpu.memory_space<vmem>>, vector<512x128xf32>,
    %c0_i32_8 = arith.constant 0 : i32
    %9 = arith.cmpi eq, %arg2, %c0_i32_8 : i32
    %10 = arith.extui %9 : i1 to i32
    %c0_i32_9 = arith.constant 0 : i32
    %11 = arith.cmpi ne, %10, %c0_i32_9 : i32
    scf.if %11 {
      %c0_10 = arith.constant 0 : index
      %c0_11 = arith.constant 0 : index
      %12 = vector.load %arg7[%c0_10, %c0_11] : memref<512x128xf32, #tpu.memory_space<vmem>>, vector<512x128xf32>
      %c0_12 = arith.constant 0 : index
      %c0_13 = arith.constant 0 : index
      %13 = vector.load %arg5[%c0_12, %c0_13] : memref<1x128xf32, #tpu.memory_space<vmem>>, vector<1x128xf32>
      %14 = vector.broadcast %13 : vector<1x128xf32> to vector<512x128xf32>
      %15 = arith.addf %12, %14 : vector<512x128xf32>
      %cst_14 = arith.constant 0.000000e+00 : f32
      %16 = vector.broadcast %cst_14 : f32 to vector<512x128xf32>
      %17 = arith.subf %16, %15 : vector<512x128xf32>
      %18 = math.exp %17 : vector<512x128xf32>
      %cst_15 = arith.constant 1.000000e+00 : f32
      %19 = vector.broadcast %cst_15 : f32 to vector<512x128xf32>
      %20 = arith.addf %19, %18 : vector<512x128xf32>
      %cst_16 = arith.constant 1.000000e+00 : f32
      %21 = vector.broadcast %cst_16 : f32 to vector<512x128xf32>
      %22 = arith.divf %21, %20 : vector<512x128xf32>
      %23 = arith.mulf %15, %22 : vector<512x128xf32>
      %c0_17 = arith.constant 0 : index
      %c0_18 = arith.constant 0 : index
      %24 = vector.load %arg6[%c0_17, %c0_18] : memref<512x128xf32, #tpu.memory_space<vmem>>, vector<512x128xf32>
      tpu.vector_store %arg6[%c0_17, %c0_18], %23 {strides = array<i32>} : memref<512x128xf32, #tpu.memory_space<vmem>>, vector<512x128xf32>,
    } else {
    }
    return
  }
  func.func @transform_0(%arg0: i32, %arg1: i32, %arg2: i32) -> (i32, i32) {
    %c0_i32 = arith.constant 0 : i32
    return %arg0, %arg2 : i32, i32
  }
  func.func @transform_1(%arg0: i32, %arg1: i32, %arg2: i32) -> (i32, i32) {
    %c0_i32 = arith.constant 0 : i32
    return %arg2, %arg1 : i32, i32
  }
  func.func @transform_2(%arg0: i32, %arg1: i32, %arg2: i32) -> (i32, i32) {
    %c0_i32 = arith.constant 0 : i32
    %c0_i32_0 = arith.constant 0 : i32
    return %c0_i32, %arg1 : i32, i32
  }
  func.func @transform_3(%arg0: i32, %arg1: i32, %arg2: i32) -> (i32, i32) {
    %c0_i32 = arith.constant 0 : i32
    return %arg0, %arg1 : i32, i32
  }
}

module attributes {stable_mosaic.version = 11 : i64} {
  func.func @_fused_matmul_kernel(%arg0: i32, %arg1: i32, %arg2: i32, %arg3: memref<512x12xf32, #tpu.memory_space<vmem>>, %arg4: memref<12x128xbf16, #tpu.memory_space<vmem>>, %arg5: memref<1x128xf32, #tpu.memory_space<vmem>>, %arg6: memref<512x128xf32, #tpu.memory_space<vmem>>, %arg7: memref<512x128xf32, #tpu.memory_space<vmem>>) attributes {dimension_semantics = [#tpu.dimension_semantics<parallel>, #tpu.dimension_semantics<parallel>, #tpu.dimension_semantics<arbitrary>], iteration_bounds = array<i64: 1, 1, 1>, scalar_prefetch = 0 : i64, scratch_operands = 1 : i64, tpu.core_type = #tpu.core_type<tc>, window_params = [{transform_indices = @transform_0, window_bounds = array<i64: 512, 12>}, {transform_indices = @transform_1, window_bounds = array<i64: 12, 128>}, {transform_indices = @transform_2, window_bounds = array<i64: 1, 128>}, {transform_indices = @transform_3, window_bounds = array<i64: 512, 128>}]} {
    %c0_i32 = arith.constant 0 : i32
    %0 = arith.cmpi eq, %arg2, %c0_i32 : i32
    %1 = arith.extui %0 : i1 to i32
    %c0_i32_0 = arith.constant 0 : i32
    %2 = arith.cmpi ne, %1, %c0_i32_0 : i32
    scf.if %2 {
      %cst_10 = arith.constant 0.000000e+00 : f32
      %13 = vector.broadcast %cst_10 : f32 to vector<512x128xf32>
      %c0_11 = arith.constant 0 : index
      %c0_12 = arith.constant 0 : index
      %14 = vector.load %arg7[%c0_11, %c0_12] : memref<512x128xf32, #tpu.memory_space<vmem>>, vector<512x128xf32>
      tpu.vector_store %arg7[%c0_11, %c0_12], %13 {strides = array<i32>} : memref<512x128xf32, #tpu.memory_space<vmem>>, vector<512x128xf32>,
    } else {
    }
    %c0 = arith.constant 0 : index
    %c0_1 = arith.constant 0 : index
    %3 = vector.load %arg7[%c0, %c0_1] : memref<512x128xf32, #tpu.memory_space<vmem>>, vector<512x128xf32>
    %c0_2 = arith.constant 0 : index
    %c0_3 = arith.constant 0 : index
    %4 = vector.load %arg3[%c0_2, %c0_3] : memref<512x12xf32, #tpu.memory_space<vmem>>, vector<512x12xf32>
    %5 = arith.truncf %4 : vector<512x12xf32> to vector<512x12xbf16>
    %c0_4 = arith.constant 0 : index
    %c0_5 = arith.constant 0 : index
    %6 = vector.load %arg4[%c0_4, %c0_5] : memref<12x128xbf16, #tpu.memory_space<vmem>>, vector<12x128xbf16>
    %cst = arith.constant dense<0.000000e+00> : vector<512x128xf32>
    %7 = tpu.matmul %5, %6, %cst {dimension_numbers = #tpu.dot_dimension_numbers<[1], [0], [0], [1], [0, 0, 1, 1], [], []>} : vector<512x12xbf16>, vector<12x128xbf16>, vector<512x128xf32> -> vector<512x128xf32>
    %8 = arith.addf %3, %7 : vector<512x128xf32>
    %c0_6 = arith.constant 0 : index
    %c0_7 = arith.constant 0 : index
    %9 = vector.load %arg7[%c0_6, %c0_7] : memref<512x128xf32, #tpu.memory_space<vmem>>, vector<512x128xf32>
    tpu.vector_store %arg7[%c0_6, %c0_7], %8 {strides = array<i32>} : memref<512x128xf32, #tpu.memory_space<vmem>>, vector<512x128xf32>,
    %c0_i32_8 = arith.constant 0 : i32
    %10 = arith.cmpi eq, %arg2, %c0_i32_8 : i32
    %11 = arith.extui %10 : i1 to i32
    %c0_i32_9 = arith.constant 0 : i32
    %12 = arith.cmpi ne, %11, %c0_i32_9 : i32
    scf.if %12 {
      %c0_10 = arith.constant 0 : index
      %c0_11 = arith.constant 0 : index
      %13 = vector.load %arg7[%c0_10, %c0_11] : memref<512x128xf32, #tpu.memory_space<vmem>>, vector<512x128xf32>
      %c0_12 = arith.constant 0 : index
      %c0_13 = arith.constant 0 : index
      %14 = vector.load %arg5[%c0_12, %c0_13] : memref<1x128xf32, #tpu.memory_space<vmem>>, vector<1x128xf32>
      %15 = vector.broadcast %14 : vector<1x128xf32> to vector<512x128xf32>
      %16 = arith.addf %13, %15 : vector<512x128xf32>
      %cst_14 = arith.constant 0.000000e+00 : f32
      %17 = vector.broadcast %cst_14 : f32 to vector<512x128xf32>
      %18 = arith.subf %17, %16 : vector<512x128xf32>
      %19 = math.exp %18 : vector<512x128xf32>
      %cst_15 = arith.constant 1.000000e+00 : f32
      %20 = vector.broadcast %cst_15 : f32 to vector<512x128xf32>
      %21 = arith.addf %20, %19 : vector<512x128xf32>
      %cst_16 = arith.constant 1.000000e+00 : f32
      %22 = vector.broadcast %cst_16 : f32 to vector<512x128xf32>
      %23 = arith.divf %22, %21 : vector<512x128xf32>
      %24 = arith.mulf %16, %23 : vector<512x128xf32>
      %c0_17 = arith.constant 0 : index
      %c0_18 = arith.constant 0 : index
      %25 = vector.load %arg6[%c0_17, %c0_18] : memref<512x128xf32, #tpu.memory_space<vmem>>, vector<512x128xf32>
      tpu.vector_store %arg6[%c0_17, %c0_18], %24 {strides = array<i32>} : memref<512x128xf32, #tpu.memory_space<vmem>>, vector<512x128xf32>,
    } else {
    }
    return
  }
  func.func @transform_0(%arg0: i32, %arg1: i32, %arg2: i32) -> (i32, i32) {
    %c0_i32 = arith.constant 0 : i32
    return %arg0, %arg2 : i32, i32
  }
  func.func @transform_1(%arg0: i32, %arg1: i32, %arg2: i32) -> (i32, i32) {
    %c0_i32 = arith.constant 0 : i32
    return %arg2, %arg1 : i32, i32
  }
  func.func @transform_2(%arg0: i32, %arg1: i32, %arg2: i32) -> (i32, i32) {
    %c0_i32 = arith.constant 0 : i32
    %c0_i32_0 = arith.constant 0 : i32
    return %c0_i32, %arg1 : i32, i32
  }
  func.func @transform_3(%arg0: i32, %arg1: i32, %arg2: i32) -> (i32, i32) {
    %c0_i32 = arith.constant 0 : i32
    return %arg0, %arg1 : i32, i32
  }
}

</mosaic_0001>

<bundles_post_ra>
// kernel: dcnv2_forward.6
= control target key start
LH: loop header
LB: loop body
LE: loop exit
PB: predicated region body
PF: predicated region fallthrough
CT: control target
= control target key end

     0   :  { %vm341_vm0 = vcmask 1043456   ;;  %vm244_vm1 = vcmask 64512   ;;  %s2680_s1 = inlined_call_operand.vmem [shape: bf16[8,128], index: 1, kind: input, shape index: {}]   ;;  %s2681_s0 = inlined_call_operand.vmem [shape: f32[512,8], index: 0, kind: input, shape index: {}]   ;;  %s2682_s2 = inlined_call_operand.vmem [shape: f32[1,128], index: 2, kind: input, shape index: {}]   ;;  %s2683_s3 = inlined_call_operand.vmem [shape: f32[512,128], index: 3, kind: output, shape index: {}]  }
   0x1   :  { %v243_v0 = vld [vmem:[%s2680_s1] sm:$0xf]  ;;  %v148_v2 = vld [vmem:[%s2681_s0 + $0x8] sm:$0xff]  ;;  %v149_v7 = vld [vmem:[%s2681_s0 + $0x10] sm:$0xff] }
   0x2   :  { %v147_v1 = vld [vmem:[%s2681_s0] sm:$0xff]  ;;  %1550 = vmatprep.subr.msk.bf16.mxu0 %vm341_vm0, %v243_v0  ;;  %1551 = vmatprep.subr.msk.bf16.mxu1 %vm341_vm0, %v243_v0  ;;  %v343_v3 = vsel %vm341_vm0, %v243_v0, 0  ;;  %v180_v6 = vld [vmem:[%s2681_s0 + $0x108] sm:$0xff]  ;;  %v150_v9 = vld [vmem:[%s2681_s0 + $0x18] sm:$0xff] }
   0x3   :  { %v211_v4 = vpack.c.bf16 %v148_v2, %v147_v1  ;;  %v179_v5 = vld [vmem:[%s2681_s0 + $0x100] sm:$0xff]  ;;  %1483 = vmatpush3.bf16.msra.mxu0 %v343_v3  ;;  %1549 = vmatpush3.bf16.msra.mxu1 %v343_v3  ;;  %v181_v10 = vld [vmem:[%s2681_s0 + $0x110] sm:$0xff]  ;;  %v182_v11 = vld [vmem:[%s2681_s0 + $0x118] sm:$0xff]  ;;  %v212_v12 = vpack.c.bf16 %v150_v9, %v149_v7 }
   0x4   :  { %v227_v8 = vpack.c.bf16 %v180_v6, %v179_v5  ;;  %v228_v13 = vpack.c.bf16 %v182_v11, %v181_v10  ;;  %v151_v14 = vld [vmem:[%s2681_s0 + $0x20] sm:$0xff]  ;;  %v152_v15 = vld [vmem:[%s2681_s0 + $0x28] sm:$0xff]  ;;  %v153_v20 = vld [vmem:[%s2681_s0 + $0x30] sm:$0xff] }
   0x5   :  { %1484 = vmatprep.mubr.msk.bf16.mxu0 %vm244_vm1, %v211_v4  ;;  %v183_v16 = vld [vmem:[%s2681_s0 + $0x120] sm:$0xff]  ;;  %v213_v17 = vpack.c.bf16 %v152_v15, %v151_v14  ;;  %v184_v18 = vld [vmem:[%s2681_s0 + $0x128] sm:$0xff]  ;;  %v154_v21 = vld [vmem:[%s2681_s0 + $0x38] sm:$0xff] }
   0x6   :  { %1516 = vmatprep.mubr.msk.bf16.mxu1 %vm244_vm1, %v227_v8  ;;  %1485 = vmatmul.mubr.msk.bf16.vlgmr.msra.gmra.mrb[0].mxu0 %vm244_vm1, %v212_v12  ;;  %v229_v19 = vpack.c.bf16 %v184_v18, %v183_v16  ;;  %v185_v22 = vld [vmem:[%s2681_s0 + $0x130] sm:$0xff]  ;;  %v186_v23 = vld [vmem:[%s2681_s0 + $0x138] sm:$0xff]  ;;  %v155_v24 = vld [vmem:[%s2681_s0 + $0x40] sm:$0xff]  ;;  %v214_v28 = vpack.c.bf16 %v154_v21, %v153_v20 }
   0x7   :  { %1517 = vmatmul.mubr.msk.bf16.vlgmr.msra.gmra.mrb[0].mxu1 %vm244_vm1, %v228_v13  ;;  %1488 = vmatprep.mubr.msk.bf16.mxu0 %vm244_vm1, %v213_v17  ;;  %v156_v25 = vld [vmem:[%s2681_s0 + $0x48] sm:$0xff]  ;;  %v187_v26 = vld [vmem:[%s2681_s0 + $0x140] sm:$0xff]  ;;  %v230_v29 = vpack.c.bf16 %v186_v23, %v185_v22  ;;  %v157_v32 = vld [vmem:[%s2681_s0 + $0x50] sm:$0xff] }
   0x8   :  { %1520 = vmatprep.mubr.msk.bf16.mxu1 %vm244_vm1, %v229_v19  ;;  %v188_v27 = vld [vmem:[%s2681_s0 + $0x148] sm:$0xff]  ;;  %v215_v30 = vpack.c.bf16 %v156_v25, %v155_v24  ;;  %v158_v33 = vld [vmem:[%s2681_s0 + $0x58] sm:$0xff]  ;;  %v189_v34 = vld [vmem:[%s2681_s0 + $0x150] sm:$0xff] }
   0x9   :  { %v231_v31 = vpack.c.bf16 %v188_v27, %v187_v26  ;;  %v190_v35 = vld [vmem:[%s2681_s0 + $0x158] sm:$0xff]  ;;  %v159_v36 = vld [vmem:[%s2681_s0 + $0x60] sm:$0xff]  ;;  %v160_v37 = vld [vmem:[%s2681_s0 + $0x68] sm:$0xff]  ;;  %v216_v40 = vpack.c.bf16 %v158_v33, %v157_v32 }
   0xa   :  { %v191_v38 = vld [vmem:[%s2681_s0 + $0x160] sm:$0xff]  ;;  %v192_v39 = vld [vmem:[%s2681_s0 + $0x168] sm:$0xff]  ;;  %v232_v41 = vpack.c.bf16 %v190_v35, %v189_v34  ;;  %v217_v42 = vpack.c.bf16 %v160_v37, %v159_v36  ;;  %v161_v44 = vld [vmem:[%s2681_s0 + $0x70] sm:$0xff] }
   0xb   :  { %v233_v43 = vpack.c.bf16 %v192_v39, %v191_v38  ;;  %v162_v45 = vld [vmem:[%s2681_s0 + $0x78] sm:$0xff]  ;;  %v193_v46 = vld [vmem:[%s2681_s0 + $0x170] sm:$0xff]  ;;  %v163_v48 = vld [vmem:[%s2681_s0 + $0x80] sm:$0xff] }
   0xc   :  { %v194_v47 = vld [vmem:[%s2681_s0 + $0x178] sm:$0xff]  ;;  %v164_v49 = vld [vmem:[%s2681_s0 + $0x88] sm:$0xff]  ;;  %v195_v50 = vld [vmem:[%s2681_s0 + $0x180] sm:$0xff]  ;;  %v218_v52 = vpack.c.bf16 %v162_v45, %v161_v44 }
   0xd   :  { %v196_v51 = vld [vmem:[%s2681_s0 + $0x188] sm:$0xff]  ;;  %v234_v53 = vpack.c.bf16 %v194_v47, %v193_v46  ;;  %v219_v54 = vpack.c.bf16 %v164_v49, %v163_v48  ;;  %v165_v56 = vld [vmem:[%s2681_s0 + $0x90] sm:$0xff]  ;;  %v166_v57 = vld [vmem:[%s2681_s0 + $0x98] sm:$0xff] }
   0xe   :  { %1489 = vmatmul.mubr.msk.bf16.gmra.mrb[4].mxu0 %vm244_vm1, %v214_v28  ;;  %v235_v55 = vpack.c.bf16 %v196_v51, %v195_v50  ;;  %v197_v58 = vld [vmem:[%s2681_s0 + $0x190] sm:$0xff]  ;;  %v198_v59 = vld [vmem:[%s2681_s0 + $0x198] sm:$0xff]  ;;  %v167_v60 = vld [vmem:[%s2681_s0 + $0xa0] sm:$0xff]  ;;  %v220_v0 = vpack.c.bf16 %v166_v57, %v165_v56 }
   0xf   :  { %1521 = vmatmul.mubr.msk.bf16.gmra.mrb[4].mxu1 %vm244_vm1, %v230_v29  ;;  %1492 = vmatprep.mubr.msk.bf16.mxu0 %vm244_vm1, %v215_v30  ;;  %v168_v61 = vld [vmem:[%s2681_s0 + $0xa8] sm:$0xff]  ;;  %v199_v62 = vld [vmem:[%s2681_s0 + $0x1a0] sm:$0xff]  ;;  %v236_v1 = vpack.c.bf16 %v198_v59, %v197_v58  ;;  %v169_v4 = vld [vmem:[%s2681_s0 + $0xb0] sm:$0xff] }
  0x10   :  { %1524 = vmatprep.mubr.msk.bf16.mxu1 %vm244_vm1, %v231_v31  ;;  %v200_v63 = vld [vmem:[%s2681_s0 + $0x1a8] sm:$0xff]  ;;  %v221_v2 = vpack.c.bf16 %v168_v61, %v167_v60  ;;  %v170_v5 = vld [vmem:[%s2681_s0 + $0xb8] sm:$0xff]  ;;  %v201_v6 = vld [vmem:[%s2681_s0 + $0x1b0] sm:$0xff] }
  0x11   :  { %v237_v3 = vpack.c.bf16 %v200_v63, %v199_v62  ;;  %v202_v7 = vld [vmem:[%s2681_s0 + $0x1b8] sm:$0xff]  ;;  %v171_v8 = vld [vmem:[%s2681_s0 + $0xc0] sm:$0xff]  ;;  %v172_v9 = vld [vmem:[%s2681_s0 + $0xc8] sm:$0xff]  ;;  %v222_v12 = vpack.c.bf16 %v170_v5, %v169_v4 }
  0x12   :  { %v203_v10 = vld [vmem:[%s2681_s0 + $0x1c0] sm:$0xff]  ;;  %v204_v11 = vld [vmem:[%s2681_s0 + $0x1c8] sm:$0xff]  ;;  %v238_v13 = vpack.c.bf16 %v202_v7, %v201_v6  ;;  %v223_v14 = vpack.c.bf16 %v172_v9, %v171_v8  ;;  %v173_v16 = vld [vmem:[%s2681_s0 + $0xd0] sm:$0xff] }
  0x13   :  { %v239_v15 = vpack.c.bf16 %v204_v11, %v203_v10  ;;  %v174_v17 = vld [vmem:[%s2681_s0 + $0xd8] sm:$0xff]  ;;  %v205_v18 = vld [vmem:[%s2681_s0 + $0x1d0] sm:$0xff]  ;;  %v175_v20 = vld [vmem:[%s2681_s0 + $0xe0] sm:$0xff] }
  0x14   :  { %v206_v19 = vld [vmem:[%s2681_s0 + $0x1d8] sm:$0xff]  ;;  %v176_v21 = vld [vmem:[%s2681_s0 + $0xe8] sm:$0xff]  ;;  %v207_v22 = vld [vmem:[%s2681_s0 + $0x1e0] sm:$0xff]  ;;  %v224_v24 = vpack.c.bf16 %v174_v17, %v173_v16 }
  0x15   :  { %v208_v23 = vld [vmem:[%s2681_s0 + $0x1e8] sm:$0xff]  ;;  %v240_v25 = vpack.c.bf16 %v206_v19, %v205_v18  ;;  %v225_v26 = vpack.c.bf16 %v176_v21, %v175_v20  ;;  %v177_v28 = vld [vmem:[%s2681_s0 + $0xf0] sm:$0xff]  ;;  %v178_v29 = vld [vmem:[%s2681_s0 + $0xf8] sm:$0xff] }
  0x16   :  { %1493 = vmatmul.mubr.msk.bf16.gmra.mrb[8].mxu0 %vm244_vm1, %v216_v40  ;;  %v241_v27 = vpack.c.bf16 %v208_v23, %v207_v22  ;;  %v209_v30 = vld [vmem:[%s2681_s0 + $0x1f0] sm:$0xff]  ;;  %v210_v31 = vld [vmem:[%s2681_s0 + $0x1f8] sm:$0xff]  ;;  %v226_v32 = vpack.c.bf16 %v178_v29, %v177_v28  ;;  %v2059_v34 = vld [vmem:[%s2682_s2] ss:$0 sm:$0xff] }
  0x17   :  { %1525 = vmatmul.mubr.msk.bf16.gmra.mrb[8].mxu1 %vm244_vm1, %v232_v41  ;;  %1496 = vmatprep.mubr.msk.bf16.mxu0 %vm244_vm1, %v217_v42  ;;  %v242_v33 = vpack.c.bf16 %v210_v31, %v209_v30 }
  0x18   :  { %1528 = vmatprep.mubr.msk.bf16.mxu1 %vm244_vm1, %v233_v43 }
  0x1e   :  { %1497 = vmatmul.mubr.msk.bf16.gmra.mrb[12].mxu0 %vm244_vm1, %v218_v52 }
  0x1f   :  { %1529 = vmatmul.mubr.msk.bf16.gmra.mrb[12].mxu1 %vm244_vm1, %v234_v53  ;;  %1500 = vmatprep.mubr.msk.bf16.mxu0 %vm244_vm1, %v219_v54 }
  0x20   :  { %1532 = vmatprep.mubr.msk.bf16.mxu1 %vm244_vm1, %v235_v55 }
  0x26   :  { %1501 = vmatmul.mubr.msk.bf16.gmra.mrb[16].mxu0 %vm244_vm1, %v220_v0 }
  0x27   :  { %1533 = vmatmul.mubr.msk.bf16.gmra.mrb[16].mxu1 %vm244_vm1, %v236_v1  ;;  %1504 = vmatprep.mubr.msk.bf16.mxu0 %vm244_vm1, %v221_v2 }
  0x28   :  { %1536 = vmatprep.mubr.msk.bf16.mxu1 %vm244_vm1, %v237_v3 }
  0x2e   :  { %1505 = vmatmul.mubr.msk.bf16.gmra.mrb[20].mxu0 %vm244_vm1, %v222_v12 }
  0x2f   :  { %1537 = vmatmul.mubr.msk.bf16.gmra.mrb[20].mxu1 %vm244_vm1, %v238_v13  ;;  %1508 = vmatprep.mubr.msk.bf16.mxu0 %vm244_vm1, %v223_v14 }
  0x30   :  { %1540 = vmatprep.mubr.msk.bf16.mxu1 %vm244_vm1, %v239_v15 }
  0x36   :  { %1509 = vmatmul.mubr.msk.bf16.gmra.mrb[24].mxu0 %vm244_vm1, %v224_v24 }
  0x37   :  { %1541 = vmatmul.mubr.msk.bf16.gmra.mrb[24].mxu1 %vm244_vm1, %v240_v25  ;;  %1512 = vmatprep.mubr.msk.bf16.mxu0 %vm244_vm1, %v225_v26 }
  0x38   :  { %1544 = vmatprep.mubr.msk.bf16.mxu1 %vm244_vm1, %v241_v27 }
  0x3e   :  { %1513 = vmatmul.mubr.msk.bf16.gmra.mrb[28].mxu0 %vm244_vm1, %v226_v32 }
  0x3f   :  { %1545 = vmatmul.mubr.msk.bf16.gmra.mrb[28].mxu1 %vm244_vm1, %v242_v33 }
  0xd9   :  { %v1486_v35 = vpop.f32.mrb[0].mxu0 }
  0xda   :  { %v1518_v36 = vpop.f32.mrb[0].mxu1  ;;  %v2062_v37 = vadd.f32 %v1486_v35, %v2059_v34  ;;  %v379_v39 = vpop.f32.mrb[1].mxu0 }
  0xdb   :  { %v2065_v38 = vadd.f32 %v1518_v36, %v2059_v34  ;;  %v507_v40 = vpop.f32.mrb[1].mxu1  ;;  %v2068_v41 = vadd.f32 %v2059_v34, %v379_v39  ;;  %v1487_v43 = vpop.f32.mrb[2].mxu0 }
  0xdc   :  { %v2071_v42 = vadd.f32 %v2059_v34, %v507_v40  ;;  %v1519_v44 = vpop.f32.mrb[2].mxu1  ;;  %v902_v45 = vsub.f32 0.0, %v2062_v37  ;;  %v2076_v47 = vadd.f32 %v1487_v43, %v2059_v34  ;;  %v382_v49 = vpop.f32.mrb[3].mxu0 }
  0xdd   :  { %v934_v46 = vsub.f32 0.0, %v2065_v38  ;;  %v2079_v48 = vadd.f32 %v1519_v44, %v2059_v34  ;;  %v510_v50 = vpop.f32.mrb[3].mxu1  ;;  %v900_v51 = vsub.f32 0.0, %v2068_v41  ;;  %v2084_v53 = vadd.f32 %v2059_v34, %v382_v49 }
  0xde   :  { %v932_v52 = vsub.f32 0.0, %v2071_v42  ;;  %v2087_v54 = vadd.f32 %v2059_v34, %v510_v50  ;;  %v968_v55 = vmul.f32 1.442695, %v902_v45  ;;  %v903_v57 = vsub.f32 0.0, %v2076_v47 }
  0xdf   :  { %v1032_v56 = vmul.f32 1.442695, %v934_v46  ;;  %v935_v58 = vsub.f32 0.0, %v2079_v48  ;;  %v964_v59 = vmul.f32 1.442695, %v900_v51  ;;  %v901_v61 = vsub.f32 0.0, %v2084_v53 }
  0xe0   :  { %v1028_v60 = vmul.f32 1.442695, %v932_v52  ;;  %v933_v62 = vsub.f32 0.0, %v2087_v54  ;;  %1552 = vpow2.f32 %v968_v55  ;;  %v970_v63 = vmul.f32 1.442695, %v903_v57 }
  0xe1   :  { %1554 = vpow2.f32 %v1032_v56  ;;  %v1034_v0 = vmul.f32 1.442695, %v935_v58  ;;  %v1490_v1 = vpop.f32.mrb[4].mxu0  ;;  %v966_v3 = vmul.f32 1.442695, %v901_v61 }
  0xe2   :  { %v1522_v2 = vpop.f32.mrb[4].mxu1  ;;  %1556 = vpow2.f32 %v964_v59  ;;  %v2094_v4 = vadd.f32 %v1490_v1, %v2059_v34  ;;  %v395_v6 = vpop.f32.mrb[5].mxu0  ;;  %v1030_v8 = vmul.f32 1.442695, %v933_v62 }
  0xe3   :  { %v2097_v5 = vadd.f32 %v1522_v2, %v2059_v34  ;;  %v523_v7 = vpop.f32.mrb[5].mxu1  ;;  %1558 = vpow2.f32 %v1028_v60  ;;  %v2100_v9 = vadd.f32 %v2059_v34, %v395_v6  ;;  %v1491_v11 = vpop.f32.mrb[6].mxu0 }
  0xe4   :  { %v2103_v10 = vadd.f32 %v2059_v34, %v523_v7  ;;  %v1523_v12 = vpop.f32.mrb[6].mxu1  ;;  %1560 = vpow2.f32 %v970_v63  ;;  %v906_v13 = vsub.f32 0.0, %v2094_v4  ;;  %v2108_v15 = vadd.f32 %v1491_v11, %v2059_v34  ;;  %v398_v16 = vpop.f32.mrb[7].mxu0 }
  0xe5   :  { %v938_v14 = vsub.f32 0.0, %v2097_v5  ;;  %v526_v17 = vpop.f32.mrb[7].mxu1  ;;  %1562 = vpow2.f32 %v1034_v0  ;;  %v904_v18 = vsub.f32 0.0, %v2100_v9  ;;  %v2114_v29 = vadd.f32 %v1523_v12, %v2059_v34 }
  0xe6   :  { %v936_v19 = vsub.f32 0.0, %v2103_v10  ;;  %1564 = vpow2.f32 %v966_v3  ;;  %v976_v20 = vmul.f32 1.442695, %v906_v13  ;;  %v907_v22 = vsub.f32 0.0, %v2108_v15 }
  0xe7   :  { %v1040_v21 = vmul.f32 1.442695, %v938_v14  ;;  %1566 = vpow2.f32 %v1030_v8  ;;  %v972_v23 = vmul.f32 1.442695, %v904_v18  ;;  %v2117_v35 = vadd.f32 %v2059_v34, %v398_v16 }
  0xe8   :  { %v1036_v24 = vmul.f32 1.442695, %v936_v19  ;;  %1568 = vpow2.f32 %v976_v20  ;;  %v978_v25 = vmul.f32 1.442695, %v907_v22  ;;  %v2120_v44 = vadd.f32 %v2059_v34, %v526_v17 }
  0xe9   :  { %1570 = vpow2.f32 %v1040_v21  ;;  %v1494_v26 = vpop.f32.mrb[8].mxu0  ;;  %v939_v55 = vsub.f32 0.0, %v2114_v29  ;;  %v905_v59 = vsub.f32 0.0, %v2117_v35 }
  0xea   :  { %v1526_v27 = vpop.f32.mrb[8].mxu1  ;;  %v1553_v28 = vpop.eup %1552  ;;  %1572 = vpow2.f32 %v972_v23  ;;  %v2124_v56 = vadd.f32 %v1494_v26, %v2059_v34  ;;  %v937_v63 = vsub.f32 0.0, %v2120_v44 }
  0xeb   :  { %v411_v30 = vpop.f32.mrb[9].mxu0  ;;  %v539_v31 = vpop.f32.mrb[9].mxu1  ;;  %v1094_v33 = vadd.f32 1.0, %v1553_v28  ;;  %1574 = vpow2.f32 %v1036_v24  ;;  %v2128_v60 = vadd.f32 %v1526_v27, %v2059_v34  ;;  %v1042_v11 = vmul.f32 1.442695, %v939_v55 }
  0xec   :  { %v1555_v32 = vpop.eup %1554  ;;  %v1495_v36 = vpop.f32.mrb[10].mxu0  ;;  %1576 = vpow2.f32 %v978_v25  ;;  %v2132_v2 = vadd.f32 %v2059_v34, %v411_v30  ;;  %v910_v12 = vsub.f32 0.0, %v2124_v56  ;;  %v974_v18 = vmul.f32 1.442695, %v905_v59 }
  0xed   :  { %v1527_v39 = vpop.f32.mrb[10].mxu1  ;;  %v1557_v40 = vpop.eup %1556  ;;  %v1126_v43 = vadd.f32 1.0, %v1555_v32  ;;  %1578 = vrcp.f32 %v1094_v33  ;;  %v942_v19 = vsub.f32 0.0, %v2128_v60  ;;  %v1038_v24 = vmul.f32 1.442695, %v937_v63 }
  0xee   :  { %v414_v45 = vpop.f32.mrb[11].mxu0  ;;  %v1559_v46 = vpop.eup %1558  ;;  %v1092_v49 = vadd.f32 1.0, %v1557_v40  ;;  %v2145_v25 = vadd.f32 %v2059_v34, %v539_v31  ;;  %v908_v32 = vsub.f32 0.0, %v2132_v2  ;;  %v2153_v33 = vadd.f32 %v1495_v36, %v2059_v34 }
  0xef   :  { %v542_v50 = vpop.f32.mrb[11].mxu1  ;;  %v1561_v51 = vpop.eup %1560  ;;  %1580 = vrcp.f32 %v1126_v43  ;;  %v1124_v52 = vadd.f32 1.0, %v1559_v46  ;;  %v984_v46 = vmul.f32 1.442695, %v910_v12  ;;  %v2159_v55 = vadd.f32 %v2059_v34, %v414_v45 }
  0xf0   :  { %v1563_v57 = vpop.eup %1562  ;;  %1582 = vrcp.f32 %v1092_v49  ;;  %v1095_v58 = vadd.f32 1.0, %v1561_v51  ;;  %v2156_v49 = vadd.f32 %v1527_v39, %v2059_v34  ;;  %v940_v36 = vsub.f32 0.0, %v2145_v25 }
  0xf1   :  { %v1565_v61 = vpop.eup %1564  ;;  %1584 = vrcp.f32 %v1124_v52  ;;  %v1127_v62 = vadd.f32 1.0, %v1563_v57  ;;  %v1498_v3 = vpop.f32.mrb[12].mxu0  ;;  %v1048_v52 = vmul.f32 1.442695, %v942_v19  ;;  %v2164_v59 = vadd.f32 %v2059_v34, %v542_v50 }
  0xf2   :  { %v1567_v0 = vpop.eup %1566  ;;  %1586 = vrcp.f32 %v1095_v58  ;;  %v1093_v1 = vadd.f32 1.0, %v1565_v61  ;;  %v1530_v6 = vpop.f32.mrb[12].mxu1  ;;  %v2169_v63 = vadd.f32 %v1498_v3, %v2059_v34 }
  0xf3   :  { %v1569_v7 = vpop.eup %1568  ;;  %1588 = vrcp.f32 %v1127_v62  ;;  %v1125_v8 = vadd.f32 1.0, %v1567_v0  ;;  %v2135_v13 = vpop.f32.mrb[13].mxu0  ;;  %v911_v62 = vsub.f32 0.0, %v2153_v33 }
  0xf4   :  { %v2137_v14 = vpop.f32.mrb[13].mxu1  ;;  %v1571_v16 = vpop.eup %1570  ;;  %1590 = vrcp.f32 %v1093_v1  ;;  %v1098_v17 = vadd.f32 1.0, %v1569_v7  ;;  %v2181_v1 = vadd.f32 %v1530_v6, %v2059_v34 }
  0xf5   :  { %v2140_v20 = vpop.f32.mrb[14].mxu0  ;;  %v2142_v21 = vpop.f32.mrb[14].mxu1  ;;  %1592 = vrcp.f32 %v1125_v8  ;;  %v1130_v23 = vadd.f32 1.0, %v1571_v16  ;;  %v980_v16 = vmul.f32 1.442695, %v908_v32 }
  0xf6   :  { %v1573_v22 = vpop.eup %1572  ;;  %v2147_v26 = vpop.f32.mrb[15].mxu0  ;;  %1594 = vrcp.f32 %v1098_v17  ;;  %v986_v32 = vmul.f32 1.442695, %v911_v62 }
  0xf7   :  { %v2149_v27 = vpop.f32.mrb[15].mxu1  ;;  %v1575_v28 = vpop.eup %1574  ;;  %v1096_v30 = vadd.f32 1.0, %v1573_v22  ;;  %1596 = vrcp.f32 %v1130_v23  ;;  %v1044_v22 = vmul.f32 1.442695, %v940_v36  ;;  %v941_v23 = vsub.f32 0.0, %v2164_v59 }
  0xf8   :  { %v1577_v40 = vpop.eup %1576  ;;  %v1128_v43 = vadd.f32 1.0, %v1575_v28 }
  0xf9   :  { %v1579_v31 = vpop.eup %1578  ;;  %1598 = vrcp.f32 %v1096_v30  ;;  %v1099_v51 = vadd.f32 1.0, %v1577_v40  ;;  %v2171_v45 = vpop.f32.mrb[16].mxu0  ;;  %v914_v40 = vsub.f32 0.0, %v2169_v63 }
  0xfa   :  { %v1581_v57 = vpop.eup %1580  ;;  %v1286_v58 = vmul.f32 %v1579_v31, %v2062_v37  ;;  %1600 = vrcp.f32 %v1128_v43  ;;  %v2173_v0 = vpop.f32.mrb[16].mxu1  ;;  %v946_v31 = vsub.f32 0.0, %v2181_v1 }
  0xfb   :  { %v1583_v61 = vpop.eup %1582  ;;  %v1318_v39 = vmul.f32 %v1581_v57, %v2065_v38  ;;  %1602 = vrcp.f32 %v1099_v51  ;;  %v943_v38 = vsub.f32 0.0, %v2156_v49  ;;  %v2183_v7 = vpop.f32.mrb[17].mxu0 }
  0xfc   :  { %v1585_v37 = vpop.eup %1584  ;;  %1350 = vst [vmem:[%s2683_s3 + $0x10] sm:$0xff] %v1286_v58  ;;  %v1284_v50 = vmul.f32 %v1583_v61, %v2068_v41  ;;  %1604 = vpow2.f32 %v1042_v11  ;;  %v2185_v3 = vpop.f32.mrb[17].mxu1  ;;  %v909_v41 = vsub.f32 0.0, %v2159_v55 }
  0xfd   :  { %v1587_v8 = vpop.eup %1586  ;;  %1382 = vst [vmem:[%s2683_s3 + $0x110] sm:$0xff] %v1318_v39  ;;  %v1316_v12 = vmul.f32 %v1585_v37, %v2071_v42  ;;  %1606 = vpow2.f32 %v974_v18  ;;  %v2192_v11 = vpop.f32.mrb[18].mxu0  ;;  %v1050_v43 = vmul.f32 1.442695, %v943_v38  ;;  %v1056_v37 = vmul.f32 1.442695, %v946_v31 }
  0xfe   :  { %v2194_v17 = vpop.f32.mrb[18].mxu1  ;;  %v1589_v6 = vpop.eup %1588  ;;  %1348 = vst [vmem:[%s2683_s3] sm:$0xff] %v1284_v50  ;;  %v1287_v19 = vmul.f32 %v1587_v8, %v2076_v47  ;;  %1608 = vpow2.f32 %v1038_v24  ;;  %v2280_v31 = vadd.f32 %v2059_v34, %v2147_v26 }
  0xff   :  { %v2201_v42 = vpop.f32.mrb[19].mxu0  ;;  %v2203_v18 = vpop.f32.mrb[19].mxu1  ;;  %1380 = vst [vmem:[%s2683_s3 + $0x100] sm:$0xff] %v1316_v12  ;;  %v1319_v30 = vmul.f32 %v1589_v6, %v2079_v48  ;;  %1610 = vpow2.f32 %v984_v46  ;;  %v982_v46 = vmul.f32 1.442695, %v909_v41  ;;  %v2253_v6 = vadd.f32 %v2059_v34, %v2135_v13 }
 0x100   :  { %v1591_v28 = vpop.eup %1590  ;;  %1351 = vst [vmem:[%s2683_s3 + $0x18] sm:$0xff] %v1287_v19  ;;  %1612 = vpow2.f32 %v1048_v52  ;;  %v1046_v52 = vmul.f32 1.442695, %v941_v23 }
 0x101   :  { %v1593_v47 = vpop.eup %1592  ;;  %v1285_v24 = vmul.f32 %v1591_v28, %v2084_v53  ;;  %1383 = vst [vmem:[%s2683_s3 + $0x118] sm:$0xff] %v1319_v30  ;;  %1614 = vpow2.f32 %v980_v16  ;;  %v2227_v61 = vpop.f32.mrb[20].mxu0  ;;  %v2264_v28 = vadd.f32 %v2059_v34, %v2137_v14  ;;  %v2271_v30 = vadd.f32 %v2140_v20, %v2059_v34 }
 0x102   :  { %v1595_v51 = vpop.eup %1594  ;;  %v1317_v48 = vmul.f32 %v1593_v47, %v2087_v54  ;;  %1616 = vpow2.f32 %v1044_v22  ;;  %v992_v54 = vmul.f32 1.442695, %v914_v40  ;;  %v2229_v39 = vpop.f32.mrb[20].mxu1  ;;  %v2275_v47 = vadd.f32 %v2142_v21, %v2059_v34 }
 0x103   :  { %v1597_v57 = vpop.eup %1596  ;;  %1349 = vst [vmem:[%s2683_s3 + $0x8] sm:$0xff] %v1285_v24  ;;  %v1290_v53 = vmul.f32 %v1595_v51, %v2094_v4  ;;  %1618 = vpow2.f32 %v986_v32  ;;  %v2235_v50 = vpop.f32.mrb[21].mxu0 }
 0x104   :  { %v1599_v58 = vpop.eup %1598  ;;  %1381 = vst [vmem:[%s2683_s3 + $0x108] sm:$0xff] %v1317_v48  ;;  %v1322_v36 = vmul.f32 %v1597_v57, %v2097_v5  ;;  %1620 = vpow2.f32 %v1050_v43  ;;  %v2237_v38 = vpop.f32.mrb[21].mxu1  ;;  %v912_v43 = vsub.f32 0.0, %v2253_v6  ;;  %v944_v48 = vsub.f32 0.0, %v2264_v28 }
 0x105   :  { %v1601_v62 = vpop.eup %1600  ;;  %1354 = vst [vmem:[%s2683_s3 + $0x30] sm:$0xff] %v1290_v53  ;;  %v1288_v4 = vmul.f32 %v1599_v58, %v2100_v9  ;;  %1622 = vpow2.f32 %v982_v46  ;;  %v2243_v12 = vpop.f32.mrb[22].mxu0 }
 0x106   :  { %v1603_v5 = vpop.eup %1602  ;;  %1386 = vst [vmem:[%s2683_s3 + $0x130] sm:$0xff] %v1322_v36  ;;  %v1320_v8 = vmul.f32 %v1601_v62, %v2103_v10  ;;  %v2245_v16 = vpop.f32.mrb[22].mxu1  ;;  %1624 = vpow2.f32 %v1046_v52  ;;  %v915_v52 = vsub.f32 0.0, %v2271_v30  ;;  %v947_v62 = vsub.f32 0.0, %v2275_v47 }
 0x107   :  { %v1605_v41 = vpop.eup %1604  ;;  %1352 = vst [vmem:[%s2683_s3 + $0x20] sm:$0xff] %v1288_v4  ;;  %v1291_v9 = vmul.f32 %v1603_v5, %v2108_v15  ;;  %v2255_v19 = vpop.f32.mrb[23].mxu0  ;;  %1626 = vpow2.f32 %v992_v54 }
 0x108   :  { %v2257_v10 = vpop.f32.mrb[23].mxu1  ;;  %v1607_v22 = vpop.eup %1606  ;;  %1384 = vst [vmem:[%s2683_s3 + $0x120] sm:$0xff] %v1320_v8  ;;  %v1131_v23 = vadd.f32 1.0, %v1605_v41  ;;  %1628 = vpow2.f32 %v1056_v37  ;;  %v988_v41 = vmul.f32 1.442695, %v912_v43  ;;  %v2308_v43 = vadd.f32 %v2171_v45, %v2059_v34 }
 0x109   :  { %v1609_v15 = vpop.eup %1608  ;;  %1355 = vst [vmem:[%s2683_s3 + $0x38] sm:$0xff] %v1291_v9  ;;  %v1097_v13 = vadd.f32 1.0, %v1607_v22  ;;  %v2283_v46 = vpop.f32.mrb[24].mxu0  ;;  %v913_v9 = vsub.f32 0.0, %v2280_v31 }
 0x10a   :  { %v1611_v32 = vpop.eup %1610  ;;  %1630 = vrcp.f32 %v1131_v23  ;;  %v1129_v40 = vadd.f32 1.0, %v1609_v15  ;;  %v2285_v57 = vpop.f32.mrb[24].mxu1 }
 0x10b   :  { %v1613_v14 = vpop.eup %1612  ;;  %1632 = vrcp.f32 %v1097_v13  ;;  %v1102_v24 = vadd.f32 1.0, %v1611_v32  ;;  %v2288_v58 = vpop.f32.mrb[25].mxu0  ;;  %v1052_v32 = vmul.f32 1.442695, %v944_v48 }
 0x10c   :  { %v1615_v51 = vpop.eup %1614  ;;  %1634 = vrcp.f32 %v1129_v40  ;;  %v1134_v20 = vadd.f32 1.0, %v1613_v14  ;;  %v2290_v36 = vpop.f32.mrb[25].mxu1  ;;  %v2304_v40 = vadd.f32 %v2059_v34, %v2149_v27 }
 0x10d   :  { %v1617_v21 = vpop.eup %1616  ;;  %1636 = vrcp.f32 %v1102_v24  ;;  %v1100_v53 = vadd.f32 1.0, %v1615_v51  ;;  %v2293_v4 = vpop.f32.mrb[26].mxu0  ;;  %v994_v51 = vmul.f32 1.442695, %v915_v52 }
 0x10e   :  { %v1619_v26 = vpop.eup %1618  ;;  %1638 = vrcp.f32 %v1134_v20  ;;  %v1132_v54 = vadd.f32 1.0, %v1617_v21  ;;  %v2295_v37 = vpop.f32.mrb[26].mxu1 }
 0x10f   :  { %v1621_v5 = vpop.eup %1620  ;;  %1640 = vrcp.f32 %v1100_v53  ;;  %v1103_v8 = vadd.f32 1.0, %v1619_v26  ;;  %v2298_v22 = vpop.f32.mrb[27].mxu0  ;;  %v1058_v53 = vmul.f32 1.442695, %v947_v62  ;;  %v2312_v26 = vadd.f32 %v2173_v0, %v2059_v34 }
 0x110   :  { %v2300_v23 = vpop.f32.mrb[27].mxu1  ;;  %v1623_v15 = vpop.eup %1622  ;;  %1642 = vrcp.f32 %v1132_v54  ;;  %v1135_v13 = vadd.f32 1.0, %v1621_v5  ;;  %v990_v54 = vmul.f32 1.442695, %v913_v9  ;;  %v2316_v5 = vadd.f32 %v2059_v34, %v2183_v7 }
 0x111   :  { %v1625_v14 = vpop.eup %1624  ;;  %1644 = vrcp.f32 %v1103_v8  ;;  %v1101_v24 = vadd.f32 1.0, %v1623_v15  ;;  %v945_v8 = vsub.f32 0.0, %v2304_v40  ;;  %v2321_v62 = vadd.f32 %v2059_v34, %v2185_v3  ;;  %v2323_v15 = vpop.f32.mrb[28].mxu0 }
 0x112   :  { %v1627_v20 = vpop.eup %1626  ;;  %1646 = vrcp.f32 %v1135_v13  ;;  %v1133_v21 = vadd.f32 1.0, %v1625_v14  ;;  %v2325_v0 = vpop.f32.mrb[28].mxu1  ;;  %v918_v7 = vsub.f32 0.0, %v2308_v43  ;;  %v2331_v14 = vadd.f32 %v2192_v11, %v2059_v34 }
 0x113   :  { %v1629_v48 = vpop.eup %1628  ;;  %1648 = vrcp.f32 %v1101_v24  ;;  %v1106_v27 = vadd.f32 1.0, %v1627_v20  ;;  %v2333_v24 = vpop.f32.mrb[29].mxu0 }
 0x114   :  { %v1631_v52 = vpop.eup %1630  ;;  %1650 = vrcp.f32 %v1133_v21  ;;  %v1138_v45 = vadd.f32 1.0, %v1629_v48  ;;  %v2335_v20 = vpop.f32.mrb[29].mxu1  ;;  %v950_v48 = vsub.f32 0.0, %v2312_v26 }
 0x115   :  { %v1633_v13 = vpop.eup %1632  ;;  %v1323_v9 = vmul.f32 %v1631_v52, %v2114_v29  ;;  %1652 = vrcp.f32 %v1106_v27  ;;  %2684 = vst [vmem:[#allocation3_spill] sm:$0xff] %v2335_v20  ;;  %v2341_v29 = vadd.f32 %v2194_v17, %v2059_v34  ;;  %v2343_v27 = vpop.f32.mrb[30].mxu0 }
 0x116   :  { %v1635_v3 = vpop.eup %1634  ;;  %v1289_v21 = vmul.f32 %v1633_v13, %v2117_v35  ;;  %1654 = vrcp.f32 %v1138_v45  ;;  %2685 = vst [vmem:[#allocation4_spill] sm:$0xff] %v2343_v27  ;;  %v2345_v52 = vpop.f32.mrb[30].mxu1  ;;  %v916_v35 = vsub.f32 0.0, %v2316_v5  ;;  %v2354_v45 = vadd.f32 %v2059_v34, %v2201_v42 }
 0x117   :  { %2686 = vst [vmem:[#allocation5_spill] sm:$0xff] %v2345_v52  ;;  %v1637_v11 = vpop.eup %1636  ;;  %1387 = vst [vmem:[%s2683_s3 + $0x138] sm:$0xff] %v1323_v9  ;;  %v1321_v20 = vmul.f32 %v1635_v3, %v2120_v44  ;;  %1656 = vpow2.f32 %v988_v41  ;;  %v2356_v17 = vpop.f32.mrb[31].mxu0  ;;  %v1054_v44 = vmul.f32 1.442695, %v945_v8  ;;  %v948_v41 = vsub.f32 0.0, %v2321_v62 }
 0x118   :  { %2687 = vst [vmem:[#allocation6_spill] sm:$0xff] %v2356_v17  ;;  %v2358_v13 = vpop.f32.mrb[31].mxu1  ;;  %v1639_v27 = vpop.eup %1638  ;;  %1353 = vst [vmem:[%s2683_s3 + $0x28] sm:$0xff] %v1289_v21  ;;  %v1294_v9 = vmul.f32 %v1637_v11, %v2124_v56  ;;  %1658 = vpow2.f32 %v1052_v32  ;;  %v919_v17 = vsub.f32 0.0, %v2331_v14  ;;  %v1064_v32 = vmul.f32 1.442695, %v950_v48 }
 0x119   :  { %2688 = vst [vmem:[#allocation7_spill] sm:$0xff] %v2358_v13  ;;  %v1641_v3 = vpop.eup %1640  ;;  %1385 = vst [vmem:[%s2683_s3 + $0x128] sm:$0xff] %v1321_v20  ;;  %v1326_v42 = vmul.f32 %v1639_v27, %v2128_v60  ;;  %1660 = vpow2.f32 %v994_v51  ;;  %v1000_v13 = vmul.f32 1.442695, %v918_v7  ;;  %v951_v8 = vsub.f32 0.0, %v2341_v29 }
 0x11a   :  { %v1643_v52 = vpop.eup %1642  ;;  %1358 = vst [vmem:[%s2683_s3 + $0x50] sm:$0xff] %v1294_v9  ;;  %v1292_v56 = vmul.f32 %v1641_v3, %v2132_v2  ;;  %1662 = vpow2.f32 %v1058_v53  ;;  %v996_v51 = vmul.f32 1.442695, %v916_v35  ;;  %v917_v7 = vsub.f32 0.0, %v2354_v45 }
 0x11b   :  { %v1645_v21 = vpop.eup %1644  ;;  %1390 = vst [vmem:[%s2683_s3 + $0x150] sm:$0xff] %v1326_v42  ;;  %v1324_v60 = vmul.f32 %v1643_v52, %v2145_v25  ;;  %1664 = vpow2.f32 %v990_v54  ;;  %v1060_v53 = vmul.f32 1.442695, %v948_v41  ;;  %v1002_v54 = vmul.f32 1.442695, %v919_v17 }
 0x11c   :  { %v1647_v20 = vpop.eup %1646  ;;  %1356 = vst [vmem:[%s2683_s3 + $0x40] sm:$0xff] %v1292_v56  ;;  %v1295_v2 = vmul.f32 %v1645_v21, %v2153_v33  ;;  %1666 = vpow2.f32 %v1054_v44  ;;  %v1066_v33 = vmul.f32 1.442695, %v951_v8 }
 0x11d   :  { %v1649_v48 = vpop.eup %1648  ;;  %1388 = vst [vmem:[%s2683_s3 + $0x140] sm:$0xff] %v1324_v60  ;;  %v1327_v25 = vmul.f32 %v1647_v20, %v2156_v49  ;;  %1668 = vpow2.f32 %v1000_v13  ;;  %v998_v49 = vmul.f32 1.442695, %v917_v7  ;;  %v2429_v60 = vadd.f32 %v2059_v34, %v2237_v38 }
 0x11e   :  { %v1651_v27 = vpop.eup %1650  ;;  %1359 = vst [vmem:[%s2683_s3 + $0x58] sm:$0xff] %v1295_v2  ;;  %v1293_v52 = vmul.f32 %v1649_v48, %v2159_v55  ;;  %1670 = vpow2.f32 %v1064_v32  ;;  %v2424_v32 = vadd.f32 %v2059_v34, %v2235_v50 }
 0x11f   :  { %v1653_v11 = vpop.eup %1652  ;;  %1391 = vst [vmem:[%s2683_s3 + $0x158] sm:$0xff] %v1327_v25  ;;  %v1325_v35 = vmul.f32 %v1651_v27, %v2164_v59  ;;  %1672 = vpow2.f32 %v996_v51  ;;  %v2406_v59 = vadd.f32 %v2059_v34, %v2203_v18  ;;  %v2420_v18 = vadd.f32 %v2229_v39, %v2059_v34 }
 0x120   :  { %v1655_v13 = vpop.eup %1654  ;;  %1357 = vst [vmem:[%s2683_s3 + $0x48] sm:$0xff] %v1293_v52  ;;  %v1298_v17 = vmul.f32 %v1653_v11, %v2169_v63  ;;  %1674 = vpow2.f32 %v1060_v53  ;;  %v2413_v63 = vadd.f32 %v2227_v61, %v2059_v34  ;;  %v920_v25 = vsub.f32 0.0, %v2424_v32 }
 0x121   :  { %v1657_v55 = vpop.eup %1656  ;;  %1389 = vst [vmem:[%s2683_s3 + $0x148] sm:$0xff] %v1325_v35  ;;  %v1330_v9 = vmul.f32 %v1655_v13, %v2181_v1  ;;  %1676 = vpow2.f32 %v1002_v54  ;;  %v949_v21 = vsub.f32 0.0, %v2406_v59  ;;  %v954_v50 = vsub.f32 0.0, %v2420_v18 }
 0x122   :  { %v1659_v44 = vpop.eup %1658  ;;  %1362 = vst [vmem:[%s2683_s3 + $0x70] sm:$0xff] %v1298_v17  ;;  %v1104_v41 = vadd.f32 1.0, %v1657_v55  ;;  %1678 = vpow2.f32 %v1066_v33  ;;  %v922_v7 = vsub.f32 0.0, %v2413_v63  ;;  %v952_v52 = vsub.f32 0.0, %v2429_v60 }
 0x123   :  { %v1661_v3 = vpop.eup %1660  ;;  %1394 = vst [vmem:[%s2683_s3 + $0x170] sm:$0xff] %v1330_v9  ;;  %v1136_v1 = vadd.f32 1.0, %v1659_v44  ;;  %1680 = vpow2.f32 %v998_v49  ;;  %v1062_v38 = vmul.f32 1.442695, %v949_v21  ;;  %v2437_v49 = vadd.f32 %v2243_v12, %v2059_v34 }
 0x124   :  { %v1663_v42 = vpop.eup %1662  ;;  %1682 = vrcp.f32 %v1104_v41  ;;  %v1107_v56 = vadd.f32 1.0, %v1661_v3  ;;  %v1008_v35 = vmul.f32 1.442695, %v922_v7  ;;  %v1072_v55 = vmul.f32 1.442695, %v954_v50 }
 0x125   :  { %v1665_v61 = vpop.eup %1664  ;;  %1684 = vrcp.f32 %v1136_v1  ;;  %v1139_v8 = vadd.f32 1.0, %v1663_v42  ;;  %v2441_v9 = vadd.f32 %v2245_v16, %v2059_v34  ;;  %v1004_v3 = vmul.f32 1.442695, %v920_v25 }
 0x126   :  { %v1667_v51 = vpop.eup %1666  ;;  %1686 = vrcp.f32 %v1107_v56  ;;  %v1105_v39 = vadd.f32 1.0, %v1665_v61  ;;  %v2445_v1 = vadd.f32 %v2059_v34, %v2255_v19  ;;  %v1068_v56 = vmul.f32 1.442695, %v952_v52 }
 0x127   :  { %v1669_v20 = vpop.eup %1668  ;;  %1688 = vrcp.f32 %v1139_v8  ;;  %v1137_v2 = vadd.f32 1.0, %v1667_v51  ;;  %v2449_v61 = vadd.f32 %v2059_v34, %v2257_v10  ;;  %v923_v21 = vsub.f32 0.0, %v2437_v49 }
 0x128   :  { %v1671_v53 = vpop.eup %1670  ;;  %1690 = vrcp.f32 %v1105_v39  ;;  %v1110_v48 = vadd.f32 1.0, %v1669_v20  ;;  %v2454_v51 = vadd.f32 %v2283_v46, %v2059_v34  ;;  %v955_v7 = vsub.f32 0.0, %v2441_v9 }
 0x129   :  { %v1673_v54 = vpop.eup %1672  ;;  %1692 = vrcp.f32 %v1137_v2  ;;  %v1142_v27 = vadd.f32 1.0, %v1671_v53  ;;  %v2460_v20 = vadd.f32 %v2285_v57, %v2059_v34  ;;  %v921_v50 = vsub.f32 0.0, %v2445_v1 }
 0x12a   :  { %v1675_v33 = vpop.eup %1674  ;;  %1694 = vrcp.f32 %v1110_v48  ;;  %v1108_v11 = vadd.f32 1.0, %v1673_v54  ;;  %v2466_v46 = vadd.f32 %v2059_v34, %v2288_v58  ;;  %v953_v57 = vsub.f32 0.0, %v2449_v61 }
 0x12b   :  { %v1677_v13 = vpop.eup %1676  ;;  %1696 = vrcp.f32 %v1142_v27  ;;  %v1140_v17 = vadd.f32 1.0, %v1675_v33  ;;  %v1010_v25 = vmul.f32 1.442695, %v923_v21  ;;  %v926_v54 = vsub.f32 0.0, %v2454_v51 }
 0x12c   :  { %v1679_v44 = vpop.eup %1678  ;;  %1698 = vrcp.f32 %v1108_v11  ;;  %v1111_v41 = vadd.f32 1.0, %v1677_v13  ;;  %v1006_v33 = vmul.f32 1.442695, %v921_v50  ;;  %v924_v11 = vsub.f32 0.0, %v2466_v46 }
 0x12d   :  { %v1681_v42 = vpop.eup %1680  ;;  %1700 = vrcp.f32 %v1140_v17  ;;  %v1143_v12 = vadd.f32 1.0, %v1679_v44  ;;  %v1070_v13 = vmul.f32 1.442695, %v953_v57  ;;  %v1016_v44 = vmul.f32 1.442695, %v926_v54 }
 0x12e   :  { %v1683_v8 = vpop.eup %1682  ;;  %1702 = vrcp.f32 %v1111_v41  ;;  %v1109_v16 = vadd.f32 1.0, %v1681_v42 }
 0x12f   :  { %v1685_v39 = vpop.eup %1684  ;;  %v1296_v19 = vmul.f32 %v1683_v8, %v2253_v6  ;;  %1704 = vrcp.f32 %v1143_v12 }
 0x130   :  { %v1687_v10 = vpop.eup %1686  ;;  %v1328_v2 = vmul.f32 %v1685_v39, %v2264_v28  ;;  %1706 = vrcp.f32 %v1109_v16  ;;  %v2475_v28 = vadd.f32 %v2059_v34, %v2290_v36  ;;  %v1074_v36 = vmul.f32 1.442695, %v955_v7 }
 0x131   :  { %v1689_v53 = vpop.eup %1688  ;;  %1360 = vst [vmem:[%s2683_s3 + $0x60] sm:$0xff] %v1296_v19  ;;  %v1299_v6 = vmul.f32 %v1687_v10, %v2271_v30  ;;  %1708 = vpow2.f32 %v1062_v38  ;;  %v958_v38 = vsub.f32 0.0, %v2460_v20 }
 0x132   :  { %v1691_v48 = vpop.eup %1690  ;;  %1392 = vst [vmem:[%s2683_s3 + $0x160] sm:$0xff] %v1328_v2  ;;  %v1331_v58 = vmul.f32 %v1689_v53, %v2275_v47  ;;  %1710 = vpow2.f32 %v1008_v35  ;;  %v956_v17 = vsub.f32 0.0, %v2475_v28 }
 0x133   :  { %v1693_v27 = vpop.eup %1692  ;;  %1363 = vst [vmem:[%s2683_s3 + $0x78] sm:$0xff] %v1299_v6  ;;  %v1297_v30 = vmul.f32 %v1691_v48, %v2280_v31  ;;  %1712 = vpow2.f32 %v1072_v55 }
 0x134   :  { %v1695_v52 = vpop.eup %1694  ;;  %1395 = vst [vmem:[%s2683_s3 + $0x178] sm:$0xff] %v1331_v58  ;;  %v1329_v47 = vmul.f32 %v1693_v27, %v2304_v40  ;;  %1714 = vpow2.f32 %v1004_v3  ;;  %v1080_v3 = vmul.f32 1.442695, %v958_v38 }
 0x135   :  { %v1697_v35 = vpop.eup %1696  ;;  %1361 = vst [vmem:[%s2683_s3 + $0x68] sm:$0xff] %v1297_v30  ;;  %v1302_v31 = vmul.f32 %v1695_v52, %v2308_v43  ;;  %1716 = vpow2.f32 %v1068_v56 }
 0x136   :  { %v1699_v55 = vpop.eup %1698  ;;  %1393 = vst [vmem:[%s2683_s3 + $0x168] sm:$0xff] %v1329_v47  ;;  %v1334_v40 = vmul.f32 %v1697_v35, %v2312_v26  ;;  %1718 = vpow2.f32 %v1010_v25  ;;  %v1012_v26 = vmul.f32 1.442695, %v924_v11 }
 0x137   :  { %v1701_v41 = vpop.eup %1700  ;;  %1366 = vst [vmem:[%s2683_s3 + $0x90] sm:$0xff] %v1302_v31  ;;  %v1300_v43 = vmul.f32 %v1699_v55, %v2316_v5  ;;  %1720 = vpow2.f32 %v1074_v36  ;;  %v1076_v5 = vmul.f32 1.442695, %v956_v17 }
 0x138   :  { %v1703_v42 = vpop.eup %1702  ;;  %1398 = vst [vmem:[%s2683_s3 + $0x190] sm:$0xff] %v1334_v40  ;;  %v1332_v12 = vmul.f32 %v1701_v41, %v2321_v62  ;;  %1722 = vpow2.f32 %v1006_v33 }
 0x139   :  { %v1705_v56 = vpop.eup %1704  ;;  %1364 = vst [vmem:[%s2683_s3 + $0x80] sm:$0xff] %v1300_v43  ;;  %v1303_v8 = vmul.f32 %v1703_v42, %v2331_v14  ;;  %1724 = vpow2.f32 %v1070_v13  ;;  %v2523_v14 = vadd.f32 %v2293_v4, %v2059_v34  ;;  %v1808_v4 = vld [vmem:[%s2682_s2] ss:$0 sm:$0xff] }
 0x13a   :  { %v1707_v16 = vpop.eup %1706  ;;  %1396 = vst [vmem:[%s2683_s3 + $0x180] sm:$0xff] %v1332_v12  ;;  %v1335_v21 = vmul.f32 %v1705_v56, %v2341_v29  ;;  %1726 = vpow2.f32 %v1016_v44  ;;  %v2530_v29 = vadd.f32 %v2295_v37, %v2059_v34  ;;  %v2539_v2 = vadd.f32 %v1808_v4, %v2298_v22  ;;  %v2690_v56 = vld [vmem:[#allocation4_spill] sm:$0xff] }
 0x13b   :  { %v1709_v62 = vpop.eup %1708  ;;  %1367 = vst [vmem:[%s2683_s3 + $0x98] sm:$0xff] %v1303_v8  ;;  %v1301_v39 = vmul.f32 %v1707_v16, %v2354_v45  ;;  %1728 = vpow2.f32 %v1080_v3  ;;  %v2542_v34 = vadd.f32 %v1808_v4, %v2300_v23  ;;  %v927_v57 = vsub.f32 0.0, %v2523_v14 }
 0x13c   :  { %v1711_v19 = vpop.eup %1710  ;;  %1399 = vst [vmem:[%s2683_s3 + $0x198] sm:$0xff] %v1335_v21  ;;  %v1141_v7 = vadd.f32 1.0, %v1709_v62  ;;  %1730 = vpow2.f32 %v1012_v26  ;;  %v959_v25 = vsub.f32 0.0, %v2530_v29  ;;  %v925_v27 = vsub.f32 0.0, %v2539_v2  ;;  %v2691_v21 = vld [vmem:[#allocation5_spill] sm:$0xff] }
 0x13d   :  { %v1713_v10 = vpop.eup %1712  ;;  %1365 = vst [vmem:[%s2683_s3 + $0x88] sm:$0xff] %v1301_v39  ;;  %v1114_v45 = vadd.f32 1.0, %v1711_v19  ;;  %1732 = vpow2.f32 %v1076_v5  ;;  %v957_v23 = vsub.f32 0.0, %v2542_v34  ;;  %v1018_v47 = vmul.f32 1.442695, %v927_v57 }
 0x13e   :  { %v1715_v50 = vpop.eup %1714  ;;  %1734 = vrcp.f32 %v1141_v7  ;;  %v1146_v53 = vadd.f32 1.0, %v1713_v10  ;;  %v2549_v33 = vadd.f32 %v1808_v4, %v2323_v15  ;;  %v1082_v31 = vmul.f32 1.442695, %v959_v25  ;;  %v2689_v15 = vld [vmem:[#allocation3_spill] sm:$0xff]  ;;  %v2692_v10 = vld [vmem:[#allocation6_spill] sm:$0xff] }
 0x13f   :  { %v1717_v37 = vpop.eup %1716  ;;  %1736 = vrcp.f32 %v1114_v45  ;;  %v1112_v6 = vadd.f32 1.0, %v1715_v50  ;;  %v2552_v13 = vadd.f32 %v1808_v4, %v2325_v0  ;;  %v1014_v40 = vmul.f32 1.442695, %v925_v27 }
 0x140   :  { %v1719_v48 = vpop.eup %1718  ;;  %1738 = vrcp.f32 %v1146_v53  ;;  %v1144_v58 = vadd.f32 1.0, %v1717_v37  ;;  %v2555_v44 = vadd.f32 %v1808_v4, %v2333_v24  ;;  %v1078_v3 = vmul.f32 1.442695, %v957_v23 }
 0x141   :  { %v1721_v54 = vpop.eup %1720  ;;  %1740 = vrcp.f32 %v1112_v6  ;;  %v1115_v22 = vadd.f32 1.0, %v1719_v48  ;;  %v2558_v42 = vadd.f32 %v1808_v4, %v2689_v15  ;;  %v930_v0 = vsub.f32 0.0, %v2549_v33  ;;  %v2693_v6 = vld [vmem:[#allocation7_spill] sm:$0xff] }
 0x142   :  { %v1723_v30 = vpop.eup %1722  ;;  %1742 = vrcp.f32 %v1144_v58  ;;  %v1147_v36 = vadd.f32 1.0, %v1721_v54  ;;  %v2562_v8 = vadd.f32 %v1808_v4, %v2690_v56  ;;  %v962_v24 = vsub.f32 0.0, %v2552_v13 }
 0x143   :  { %v1725_v38 = vpop.eup %1724  ;;  %1744 = vrcp.f32 %v1115_v22  ;;  %v1113_v52 = vadd.f32 1.0, %v1723_v30  ;;  %v2566_v62 = vadd.f32 %v1808_v4, %v2691_v21  ;;  %v928_v7 = vsub.f32 0.0, %v2555_v44 }
 0x144   :  { %v1727_v11 = vpop.eup %1726  ;;  %1746 = vrcp.f32 %v1147_v36  ;;  %v1145_v35 = vadd.f32 1.0, %v1725_v38  ;;  %v2571_v45 = vadd.f32 %v1808_v4, %v2692_v10  ;;  %v960_v37 = vsub.f32 0.0, %v2558_v42 }
 0x145   :  { %v1729_v17 = vpop.eup %1728  ;;  %1748 = vrcp.f32 %v1113_v52  ;;  %v1118_v55 = vadd.f32 1.0, %v1727_v11  ;;  %v2576_v57 = vadd.f32 %v1808_v4, %v2693_v6  ;;  %v1024_v58 = vmul.f32 1.442695, %v930_v0 }
 0x146   :  { %v1731_v41 = vpop.eup %1730  ;;  %1750 = vrcp.f32 %v1145_v35  ;;  %v1150_v43 = vadd.f32 1.0, %v1729_v17  ;;  %v931_v25 = vsub.f32 0.0, %v2562_v8  ;;  %v1088_v4 = vmul.f32 1.442695, %v962_v24 }
 0x147   :  { %v1733_v12 = vpop.eup %1732  ;;  %1752 = vrcp.f32 %v1118_v55  ;;  %v1116_v26 = vadd.f32 1.0, %v1731_v41  ;;  %v963_v22 = vsub.f32 0.0, %v2566_v62  ;;  %v1020_v30 = vmul.f32 1.442695, %v928_v7 }
 0x148   :  { %v1735_v5 = vpop.eup %1734  ;;  %1754 = vrcp.f32 %v1150_v43  ;;  %v1148_v16 = vadd.f32 1.0, %v1733_v12  ;;  %v929_v36 = vsub.f32 0.0, %v2571_v45  ;;  %v1084_v38 = vmul.f32 1.442695, %v960_v37 }
 0x149   :  { %v1737_v39 = vpop.eup %1736  ;;  %v1333_v19 = vmul.f32 %v1735_v5, %v2406_v59  ;;  %1756 = vrcp.f32 %v1116_v26  ;;  %v961_v52 = vsub.f32 0.0, %v2576_v57  ;;  %v1026_v11 = vmul.f32 1.442695, %v931_v25 }
 0x14a   :  { %v1739_v50 = vpop.eup %1738  ;;  %v1306_v53 = vmul.f32 %v1737_v39, %v2413_v63  ;;  %1758 = vrcp.f32 %v1148_v16 }
 0x14b   :  { %v1741_v48 = vpop.eup %1740  ;;  %1397 = vst [vmem:[%s2683_s3 + $0x188] sm:$0xff] %v1333_v19  ;;  %v1338_v59 = vmul.f32 %v1739_v50, %v2420_v18  ;;  %1760 = vpow2.f32 %v1018_v47 }
 0x14c   :  { %v1743_v54 = vpop.eup %1742  ;;  %1370 = vst [vmem:[%s2683_s3 + $0xb0] sm:$0xff] %v1306_v53  ;;  %v1304_v63 = vmul.f32 %v1741_v48, %v2424_v32  ;;  %1762 = vpow2.f32 %v1082_v31  ;;  %v1090_v31 = vmul.f32 1.442695, %v963_v22 }
 0x14d   :  { %v1745_v27 = vpop.eup %1744  ;;  %1402 = vst [vmem:[%s2683_s3 + $0x1b0] sm:$0xff] %v1338_v59  ;;  %v1336_v18 = vmul.f32 %v1743_v54, %v2429_v60  ;;  %1764 = vpow2.f32 %v1014_v40 }
 0x14e   :  { %v1747_v23 = vpop.eup %1746  ;;  %1368 = vst [vmem:[%s2683_s3 + $0xa0] sm:$0xff] %v1304_v63  ;;  %v1307_v32 = vmul.f32 %v1745_v27, %v2437_v49  ;;  %1766 = vpow2.f32 %v1078_v3 }
 0x14f   :  { %v1749_v47 = vpop.eup %1748  ;;  %1400 = vst [vmem:[%s2683_s3 + $0x1a0] sm:$0xff] %v1336_v18  ;;  %v1339_v60 = vmul.f32 %v1747_v23, %v2441_v9  ;;  %1768 = vpow2.f32 %v1024_v58  ;;  %v1022_v9 = vmul.f32 1.442695, %v929_v36 }
 0x150   :  { %v1751_v35 = vpop.eup %1750  ;;  %1371 = vst [vmem:[%s2683_s3 + $0xb8] sm:$0xff] %v1307_v32  ;;  %v1305_v49 = vmul.f32 %v1749_v47, %v2445_v1  ;;  %1770 = vpow2.f32 %v1088_v4  ;;  %v1086_v1 = vmul.f32 1.442695, %v961_v52 }
 0x151   :  { %v1753_v17 = vpop.eup %1752  ;;  %1403 = vst [vmem:[%s2683_s3 + $0x1b8] sm:$0xff] %v1339_v60  ;;  %v1337_v55 = vmul.f32 %v1751_v35, %v2449_v61  ;;  %1772 = vpow2.f32 %v1020_v30 }
 0x152   :  { %v1755_v40 = vpop.eup %1754  ;;  %1369 = vst [vmem:[%s2683_s3 + $0xa8] sm:$0xff] %v1305_v49  ;;  %v1310_v41 = vmul.f32 %v1753_v17, %v2454_v51  ;;  %1774 = vpow2.f32 %v1084_v38 }
 0x153   :  { %v1757_v43 = vpop.eup %1756  ;;  %1401 = vst [vmem:[%s2683_s3 + $0x1a8] sm:$0xff] %v1337_v55  ;;  %v1342_v3 = vmul.f32 %v1755_v40, %v2460_v20  ;;  %1776 = vpow2.f32 %v1026_v11 }
 0x154   :  { %v1759_v61 = vpop.eup %1758  ;;  %1374 = vst [vmem:[%s2683_s3 + $0xd0] sm:$0xff] %v1310_v41  ;;  %v1308_v15 = vmul.f32 %v1757_v43, %v2466_v46  ;;  %1778 = vpow2.f32 %v1090_v31 }
 0x155   :  { %v1761_v12 = vpop.eup %1760  ;;  %1406 = vst [vmem:[%s2683_s3 + $0x1d0] sm:$0xff] %v1342_v3  ;;  %v1340_v51 = vmul.f32 %v1759_v61, %v2475_v28  ;;  %1780 = vpow2.f32 %v1022_v9 }
 0x156   :  { %v1763_v26 = vpop.eup %1762  ;;  %1372 = vst [vmem:[%s2683_s3 + $0xc0] sm:$0xff] %v1308_v15  ;;  %v1119_v20 = vadd.f32 1.0, %v1761_v12  ;;  %1782 = vpow2.f32 %v1086_v1 }
 0x157   :  { %v1765_v0 = vpop.eup %1764  ;;  %1404 = vst [vmem:[%s2683_s3 + $0x1c0] sm:$0xff] %v1340_v51  ;;  %v1151_v46 = vadd.f32 1.0, %v1763_v26 }
 0x158   :  { %v1767_v56 = vpop.eup %1766  ;;  %1784 = vrcp.f32 %v1119_v20  ;;  %v1117_v5 = vadd.f32 1.0, %v1765_v0 }
 0x159   :  { %v1769_v16 = vpop.eup %1768  ;;  %1786 = vrcp.f32 %v1151_v46  ;;  %v1149_v28 = vadd.f32 1.0, %v1767_v56 }
 0x15a   :  { %v1771_v24 = vpop.eup %1770  ;;  %1788 = vrcp.f32 %v1117_v5  ;;  %v1122_v21 = vadd.f32 1.0, %v1769_v16 }
 0x15b   :  { %v1773_v39 = vpop.eup %1772  ;;  %1790 = vrcp.f32 %v1149_v28  ;;  %v1154_v19 = vadd.f32 1.0, %v1771_v24 }
 0x15c   :  { %v1775_v7 = vpop.eup %1774  ;;  %1792 = vrcp.f32 %v1122_v21  ;;  %v1120_v10 = vadd.f32 1.0, %v1773_v39 }
 0x15d   :  { %v1777_v50 = vpop.eup %1776  ;;  %1794 = vrcp.f32 %v1154_v19  ;;  %v1152_v53 = vadd.f32 1.0, %v1775_v7 }
 0x15e   :  { %v1779_v37 = vpop.eup %1778  ;;  %1796 = vrcp.f32 %v1120_v10  ;;  %v1123_v6 = vadd.f32 1.0, %v1777_v50 }
 0x15f   :  { %v1781_v48 = vpop.eup %1780  ;;  %1798 = vrcp.f32 %v1152_v53  ;;  %v1155_v59 = vadd.f32 1.0, %v1779_v37 }
 0x160   :  { %v1783_v58 = vpop.eup %1782  ;;  %1800 = vrcp.f32 %v1123_v6  ;;  %v1121_v25 = vadd.f32 1.0, %v1781_v48 }
 0x161   :  { %1802 = vrcp.f32 %v1155_v59  ;;  %v1153_v54 = vadd.f32 1.0, %v1783_v58 }
 0x162   :  { %v1785_v63 = vpop.eup %1784  ;;  %1804 = vrcp.f32 %v1121_v25 }
 0x163   :  { %v1787_v4 = vpop.eup %1786  ;;  %v1311_v22 = vmul.f32 %v1785_v63, %v2523_v14  ;;  %1806 = vrcp.f32 %v1153_v54 }
 0x164   :  { %v1789_v27 = vpop.eup %1788  ;;  %v1343_v18 = vmul.f32 %v1787_v4, %v2530_v29 }
 0x165   :  { %v1791_v30 = vpop.eup %1790  ;;  %1375 = vst [vmem:[%s2683_s3 + $0xd8] sm:$0xff] %v1311_v22  ;;  %v1309_v36 = vmul.f32 %v1789_v27, %v2539_v2 }
 0x166   :  { %v1793_v23 = vpop.eup %1792  ;;  %1407 = vst [vmem:[%s2683_s3 + $0x1d8] sm:$0xff] %v1343_v18  ;;  %v1341_v32 = vmul.f32 %v1791_v30, %v2542_v34 }
 0x167   :  { %v1795_v38 = vpop.eup %1794  ;;  %1373 = vst [vmem:[%s2683_s3 + $0xc8] sm:$0xff] %v1309_v36  ;;  %v1314_v14 = vmul.f32 %v1793_v23, %v2549_v33 }
 0x168   :  { %v1797_v29 = vpop.eup %1796  ;;  %1405 = vst [vmem:[%s2683_s3 + $0x1c8] sm:$0xff] %v1341_v32  ;;  %v1346_v2 = vmul.f32 %v1795_v38, %v2552_v13 }
 0x169   :  { %v1799_v52 = vpop.eup %1798  ;;  %1378 = vst [vmem:[%s2683_s3 + $0xf0] sm:$0xff] %v1314_v14  ;;  %v1312_v34 = vmul.f32 %v1797_v29, %v2555_v44 }
 0x16a   :  { %v1801_v47 = vpop.eup %1800  ;;  %1410 = vst [vmem:[%s2683_s3 + $0x1f0] sm:$0xff] %v1346_v2  ;;  %v1344_v33 = vmul.f32 %v1799_v52, %v2558_v42 }
 0x16b   :  { %v1803_v60 = vpop.eup %1802  ;;  %1376 = vst [vmem:[%s2683_s3 + $0xe0] sm:$0xff] %v1312_v34  ;;  %v1315_v13 = vmul.f32 %v1801_v47, %v2562_v8 }
 0x16c   :  { %v1805_v11 = vpop.eup %1804  ;;  %1408 = vst [vmem:[%s2683_s3 + $0x1e0] sm:$0xff] %v1344_v33  ;;  %v1347_v44 = vmul.f32 %v1803_v60, %v2566_v62 }
 0x16d   :  { %v1807_v35 = vpop.eup %1806  ;;  %1379 = vst [vmem:[%s2683_s3 + $0xf8] sm:$0xff] %v1315_v13  ;;  %v1313_v42 = vmul.f32 %v1805_v11, %v2571_v45 }
 0x16e   :  { %1411 = vst [vmem:[%s2683_s3 + $0x1f8] sm:$0xff] %v1347_v44  ;;  %v1345_v8 = vmul.f32 %v1807_v35, %v2576_v57 }
 0x16f   :  { %1377 = vst [vmem:[%s2683_s3 + $0xe8] sm:$0xff] %v1313_v42 }
 0x170   :  { %1409 = vst [vmem:[%s2683_s3 + $0x1e8] sm:$0xff] %v1345_v8 }

// kernel: dcnv2_forward.7
= control target key start
LH: loop header
LB: loop body
LE: loop exit
PB: predicated region body
PF: predicated region fallthrough
CT: control target
= control target key end

     0   :  { %vm394_vm0 = vcmask 293888   ;;  %vm491_vm1 = vcmask 1041408   ;;  %s2990_s1 = inlined_call_operand.vmem [shape: bf16[36,128], index: 1, kind: input, shape index: {}]   ;;  %s2991_s0 = inlined_call_operand.vmem [shape: bf16[512,36], index: 0, kind: input, shape index: {}]   ;;  %s2992_s2 = inlined_call_operand.vmem [shape: f32[1,128], index: 2, kind: input, shape index: {}]   ;;  %s2993_s3 = inlined_call_operand.vmem [shape: f32[1,128], index: 3, kind: input, shape index: {}]   ;;  %s2994_s4 = inlined_call_operand.vmem [shape: f32[512,128], index: 4, kind: output, shape index: {}]  }
   0x1   :  { %v1756_v0 = vld [vmem:[%s2990_s1] sm:$0xff]   ;;  %v1757_v1 = vld [vmem:[%s2990_s1 + $0x8] sm:$0xff]   ;;  %v1758_v2 = vld [vmem:[%s2990_s1 + $0x10] ss:$0 sps:$4 sm:$0x33]  }
   0x2   :  { %1677 = vmatprep.subr.bf16.mxu0 %v1756_v0  ;;  %1747 = vmatprep.subr.bf16.mxu1 %v1756_v0  ;;  %v1759_v3 = vld [vmem:[%s2991_s0] sm:$0xff]   ;;  %v493_v5 = vsel %vm491_vm1, %v1758_v2, 0  ;;  %v1761_v6 = vld [vmem:[%s2991_s0 + $0x8] sm:$0xff]   ;;  %v1763_v8 = vld [vmem:[%s2991_s0 + $0x10] sm:$0xff]  }
   0x3   :  { %1678 = vmatpush3.bf16.msra.mxu0 %v1756_v0  ;;  %1750 = vmatpush3.bf16.msra.mxu1 %v1756_v0  ;;  %v1760_v4 = vld [vmem:[%s2991_s0 + $0x80] sm:$0xff]   ;;  %v1762_v7 = vld [vmem:[%s2991_s0 + $0x88] sm:$0xff]   ;;  %v1764_v9 = vld [vmem:[%s2991_s0 + $0x90] sm:$0xff]  }
   0x4   :  { %1679 = vmatprep.subr.bf16.mxu0 %v1757_v1  ;;  %1748 = vmatprep.subr.bf16.mxu1 %v1757_v1  ;;  %v1765_v10 = vld [vmem:[%s2991_s0 + $0x18] sm:$0xff]   ;;  %v1767_v12 = vld [vmem:[%s2991_s0 + $0x20] sm:$0xff]   ;;  %v1769_v14 = vld [vmem:[%s2991_s0 + $0x28] sm:$0xff]  }
   0x5   :  { %1683 = vmatprep.mubr.msk.bf16.mxu0 %vm394_vm0, %v1759_v3  ;;  %1715 = vmatprep.mubr.msk.bf16.mxu1 %vm394_vm0, %v1760_v4  ;;  %v1766_v11 = vld [vmem:[%s2991_s0 + $0x98] sm:$0xff]   ;;  %v1768_v13 = vld [vmem:[%s2991_s0 + $0xa0] sm:$0xff]   ;;  %v1770_v15 = vld [vmem:[%s2991_s0 + $0xa8] sm:$0xff]  }
   0x6   :  { %v1771_v16 = vld [vmem:[%s2991_s0 + $0x30] sm:$0xff]   ;;  %v1773_v18 = vld [vmem:[%s2991_s0 + $0x38] sm:$0xff]   ;;  %v1775_v20 = vld [vmem:[%s2991_s0 + $0x40] sm:$0xff]  }
   0x7   :  { %1680 = vmatpush3.bf16.msra.mxu0 %v1757_v1  ;;  %1751 = vmatpush3.bf16.msra.mxu1 %v1757_v1  ;;  %v1772_v17 = vld [vmem:[%s2991_s0 + $0xb0] sm:$0xff]   ;;  %v1774_v19 = vld [vmem:[%s2991_s0 + $0xb8] sm:$0xff]   ;;  %v1776_v21 = vld [vmem:[%s2991_s0 + $0xc0] sm:$0xff]  }
   0x8   :  { %1753 = vmatprep.subr.msk.bf16.mxu0 %vm491_vm1, %v1758_v2  ;;  %1754 = vmatprep.subr.msk.bf16.mxu1 %vm491_vm1, %v1758_v2  ;;  %v1777_v22 = vld [vmem:[%s2991_s0 + $0x48] sm:$0xff]   ;;  %v1779_v24 = vld [vmem:[%s2991_s0 + $0x50] sm:$0xff]   ;;  %v1781_v26 = vld [vmem:[%s2991_s0 + $0x58] sm:$0xff]   ;;  %v1437_v2 = vlaneseq }
   0x9   :  { %v1778_v23 = vld [vmem:[%s2991_s0 + $0xc8] sm:$0xff]   ;;  %v1780_v25 = vld [vmem:[%s2991_s0 + $0xd0] sm:$0xff]   ;;  %v1782_v27 = vld [vmem:[%s2991_s0 + $0xd8] sm:$0xff]  }
   0xa   :  { %v1783_v28 = vld [vmem:[%s2991_s0 + $0x60] sm:$0xff]   ;;  %v1785_v30 = vld [vmem:[%s2991_s0 + $0x68] sm:$0xff]   ;;  %v1787_v32 = vld [vmem:[%s2991_s0 + $0x70] sm:$0xff]  }
   0xb   :  { %1682 = vmatpush3.bf16.msra.mxu0 %v493_v5  ;;  %1752 = vmatpush3.bf16.msra.mxu1 %v493_v5  ;;  %v1784_v29 = vld [vmem:[%s2991_s0 + $0xe0] sm:$0xff]   ;;  %v1786_v31 = vld [vmem:[%s2991_s0 + $0xe8] sm:$0xff]   ;;  %v1788_v33 = vld [vmem:[%s2991_s0 + $0xf0] sm:$0xff]  }
   0xc   :  { %v1789_v34 = vld [vmem:[%s2991_s0 + $0x78] sm:$0xff]   ;;  %v2214_v36 = vld [vmem:[%s2992_s2] ss:$0 sm:$0xff] }
   0xd   :  { %v1790_v35 = vld [vmem:[%s2991_s0 + $0xf8] sm:$0xff]  }
   0xe   :  { %1684 = vmatmul.mubr.msk.bf16.vlgmr.msra.gmra.mrb[0].mxu0 %vm394_vm0, %v1761_v6  ;;  %1716 = vmatmul.mubr.msk.bf16.vlgmr.msra.gmra.mrb[0].mxu1 %vm394_vm0, %v1762_v7 }
   0xf   :  { %1687 = vmatprep.mubr.msk.bf16.mxu0 %vm394_vm0, %v1763_v8  ;;  %1719 = vmatprep.mubr.msk.bf16.mxu1 %vm394_vm0, %v1764_v9 }
  0x16   :  { %1688 = vmatmul.mubr.msk.bf16.gmra.mrb[4].mxu0 %vm394_vm0, %v1765_v10  ;;  %1720 = vmatmul.mubr.msk.bf16.gmra.mrb[4].mxu1 %vm394_vm0, %v1766_v11 }
  0x17   :  { %1691 = vmatprep.mubr.msk.bf16.mxu0 %vm394_vm0, %v1767_v12  ;;  %1723 = vmatprep.mubr.msk.bf16.mxu1 %vm394_vm0, %v1768_v13 }
  0x1e   :  { %1692 = vmatmul.mubr.msk.bf16.gmra.mrb[8].mxu0 %vm394_vm0, %v1769_v14  ;;  %1724 = vmatmul.mubr.msk.bf16.gmra.mrb[8].mxu1 %vm394_vm0, %v1770_v15 }
  0x1f   :  { %1695 = vmatprep.mubr.msk.bf16.mxu0 %vm394_vm0, %v1771_v16  ;;  %1727 = vmatprep.mubr.msk.bf16.mxu1 %vm394_vm0, %v1772_v17  ;;  %v1434_v16 = vld [vmem:[%s2993_s3] sm:$0x1] }
  0x20   :  { %vm1435_vm2 = vcmp.gt.f32.partialorder %v1434_v16, 0.5 }
  0x26   :  { %1696 = vmatmul.mubr.msk.bf16.gmra.mrb[12].mxu0 %vm394_vm0, %v1773_v18  ;;  %1728 = vmatmul.mubr.msk.bf16.gmra.mrb[12].mxu1 %vm394_vm0, %v1774_v19 }
  0x27   :  { %1699 = vmatprep.mubr.msk.bf16.mxu0 %vm394_vm0, %v1775_v20  ;;  %1731 = vmatprep.mubr.msk.bf16.mxu1 %vm394_vm0, %v1776_v21 }
  0x2e   :  { %1700 = vmatmul.mubr.msk.bf16.gmra.mrb[16].mxu0 %vm394_vm0, %v1777_v22  ;;  %1732 = vmatmul.mubr.msk.bf16.gmra.mrb[16].mxu1 %vm394_vm0, %v1778_v23  ;;  %v1438_v22 = vshrl.u32 %v1437_v2, 7 }
  0x2f   :  { %1703 = vmatprep.mubr.msk.bf16.mxu0 %vm394_vm0, %v1779_v24  ;;  %1735 = vmatprep.mubr.msk.bf16.mxu1 %vm394_vm0, %v1780_v25 }
  0x36   :  { %1704 = vmatmul.mubr.msk.bf16.gmra.mrb[20].mxu0 %vm394_vm0, %v1781_v26  ;;  %1736 = vmatmul.mubr.msk.bf16.gmra.mrb[20].mxu1 %vm394_vm0, %v1782_v27 }
  0x37   :  { %1707 = vmatprep.mubr.msk.bf16.mxu0 %vm394_vm0, %v1783_v28  ;;  %1739 = vmatprep.mubr.msk.bf16.mxu1 %vm394_vm0, %v1784_v29 }
  0x3e   :  { %1708 = vmatmul.mubr.msk.bf16.gmra.mrb[24].mxu0 %vm394_vm0, %v1785_v30  ;;  %1740 = vmatmul.mubr.msk.bf16.gmra.mrb[24].mxu1 %vm394_vm0, %v1786_v31  ;;  %v1439_v31 = vsub.s32 0, %v1438_v22 }
  0x3f   :  { %1711 = vmatprep.mubr.msk.bf16.mxu0 %vm394_vm0, %v1787_v32  ;;  %1743 = vmatprep.mubr.msk.bf16.mxu1 %vm394_vm0, %v1788_v33 }
  0x46   :  { %1712 = vmatmul.mubr.msk.bf16.gmra.mrb[28].mxu0 %vm394_vm0, %v1789_v34  ;;  %1744 = vmatmul.mubr.msk.bf16.gmra.mrb[28].mxu1 %vm394_vm0, %v1790_v35  ;;  %v2048_v35 = vmov 0  }
  0xe1   :  { %v1685_v37 = vpop.f32.mrb[0].mxu0  ;;  %v1717_v38 = vpop.f32.mrb[0].mxu1 }
  0xe2   :  { %v2217_v39 = vadd.f32 %v1685_v37, %v2214_v36  ;;  %v2220_v40 = vadd.f32 %v1717_v38, %v2214_v36  ;;  %v529_v41 = vpop.f32.mrb[1].mxu0  ;;  %v657_v42 = vpop.f32.mrb[1].mxu1  ;;  %v1436_v37 = vsel %vm1435_vm2, 1, %v2048_v35 }
  0xe3   :  { %v2223_v43 = vadd.f32 %v2214_v36, %v529_v41  ;;  %v2226_v44 = vadd.f32 %v2214_v36, %v657_v42  ;;  %v1686_v45 = vpop.f32.mrb[2].mxu0  ;;  %v1718_v46 = vpop.f32.mrb[2].mxu1 }
  0xe4   :  { %v1052_v47 = vsub.f32 0.0, %v2217_v39  ;;  %v1084_v48 = vsub.f32 0.0, %v2220_v40  ;;  %v2231_v49 = vadd.f32 %v1686_v45, %v2214_v36  ;;  %v2234_v50 = vadd.f32 %v1718_v46, %v2214_v36  ;;  %v532_v51 = vpop.f32.mrb[3].mxu0  ;;  %v660_v52 = vpop.f32.mrb[3].mxu1 }
  0xe5   :  { %v1050_v53 = vsub.f32 0.0, %v2223_v43  ;;  %v1082_v54 = vsub.f32 0.0, %v2226_v44  ;;  %v2239_v55 = vadd.f32 %v2214_v36, %v532_v51  ;;  %v2242_v56 = vadd.f32 %v2214_v36, %v660_v52 }
  0xe6   :  { %v1118_v57 = vmul.f32 1.442695, %v1052_v47  ;;  %v1182_v58 = vmul.f32 1.442695, %v1084_v48  ;;  %v1053_v59 = vsub.f32 0.0, %v2231_v49  ;;  %v1085_v60 = vsub.f32 0.0, %v2234_v50 }
  0xe7   :  { %v1114_v61 = vmul.f32 1.442695, %v1050_v53  ;;  %v1178_v62 = vmul.f32 1.442695, %v1082_v54  ;;  %v1051_v63 = vsub.f32 0.0, %v2239_v55  ;;  %v1083_v0 = vsub.f32 0.0, %v2242_v56 }
  0xe8   :  { %1791 = vpow2.f32 %v1118_v57  ;;  %v1120_v1 = vmul.f32 1.442695, %v1053_v59  ;;  %v1184_v3 = vmul.f32 1.442695, %v1085_v60  ;;  %v2284_v59 = vrot.slane %v1436_v37, %v1439_v31 }
  0xe9   :  { %1793 = vpow2.f32 %v1182_v58  ;;  %v1689_v4 = vpop.f32.mrb[4].mxu0  ;;  %v1721_v5 = vpop.f32.mrb[4].mxu1  ;;  %v1116_v6 = vmul.f32 1.442695, %v1051_v63  ;;  %v1180_v11 = vmul.f32 1.442695, %v1083_v0 }
  0xea   :  { %1795 = vpow2.f32 %v1114_v61  ;;  %v2249_v7 = vadd.f32 %v1689_v4, %v2214_v36  ;;  %v2252_v8 = vadd.f32 %v1721_v5, %v2214_v36  ;;  %v545_v9 = vpop.f32.mrb[5].mxu0  ;;  %v673_v10 = vpop.f32.mrb[5].mxu1  ;;  %vm1441_vm3 = vcmp.eq.s32.totalorder %v2284_v59, 1 }
  0xeb   :  { %1797 = vpow2.f32 %v1178_v62  ;;  %v2255_v12 = vadd.f32 %v2214_v36, %v545_v9  ;;  %v2258_v13 = vadd.f32 %v2214_v36, %v673_v10  ;;  %v1690_v14 = vpop.f32.mrb[6].mxu0  ;;  %v1722_v15 = vpop.f32.mrb[6].mxu1 }
  0xec   :  { %1799 = vpow2.f32 %v1120_v1  ;;  %v1056_v17 = vsub.f32 0.0, %v2249_v7  ;;  %v1088_v18 = vsub.f32 0.0, %v2252_v8  ;;  %v2266_v19 = vadd.f32 %v1690_v14, %v2214_v36  ;;  %v548_v20 = vpop.f32.mrb[7].mxu0  ;;  %v676_v21 = vpop.f32.mrb[7].mxu1 }
  0xed   :  { %1801 = vpow2.f32 %v1184_v3  ;;  %v1054_v23 = vsub.f32 0.0, %v2255_v12  ;;  %v1086_v24 = vsub.f32 0.0, %v2258_v13  ;;  %v2272_v38 = vadd.f32 %v1722_v15, %v2214_v36 }
  0xee   :  { %1803 = vpow2.f32 %v1116_v6  ;;  %v1126_v25 = vmul.f32 1.442695, %v1056_v17  ;;  %v1190_v26 = vmul.f32 1.442695, %v1088_v18  ;;  %v1057_v27 = vsub.f32 0.0, %v2266_v19 }
  0xef   :  { %1805 = vpow2.f32 %v1180_v11  ;;  %v1122_v28 = vmul.f32 1.442695, %v1054_v23  ;;  %v1186_v29 = vmul.f32 1.442695, %v1086_v24  ;;  %v2275_v47 = vadd.f32 %v2214_v36, %v548_v20 }
  0xf0   :  { %1807 = vpow2.f32 %v1126_v25  ;;  %v1128_v30 = vmul.f32 1.442695, %v1057_v27  ;;  %v2280_v54 = vadd.f32 %v2214_v36, %v676_v21  ;;  %v1089_v0 = vsub.f32 0.0, %v2272_v38 }
  0xf1   :  { %1809 = vpow2.f32 %v1190_v26  ;;  %v1693_v32 = vpop.f32.mrb[8].mxu0  ;;  %v1725_v33 = vpop.f32.mrb[8].mxu1  ;;  %v1055_v4 = vsub.f32 0.0, %v2275_v47 }
  0xf2   :  { %v1792_v34 = vpop.eup %1791  ;;  %1811 = vpow2.f32 %v1122_v28  ;;  %v561_v41 = vpop.f32.mrb[9].mxu0  ;;  %v2290_v1 = vadd.f32 %v1693_v32, %v2214_v36  ;;  %v2294_v5 = vadd.f32 %v1725_v33, %v2214_v36  ;;  %v1087_v10 = vsub.f32 0.0, %v2280_v54 }
  0xf3   :  { %v689_v42 = vpop.f32.mrb[9].mxu1  ;;  %v1794_v45 = vpop.eup %1793  ;;  %v1244_v46 = vadd.f32 1.0, %v1792_v34  ;;  %1813 = vpow2.f32 %v1186_v29  ;;  %v2299_v15 = vadd.f32 %v2214_v36, %v561_v41  ;;  %v1192_v21 = vmul.f32 1.442695, %v1089_v0 }
  0xf4   :  { %v1694_v48 = vpop.f32.mrb[10].mxu0  ;;  %v2277_v51 = vpop.f32.mrb[10].mxu1  ;;  %v1276_v53 = vadd.f32 1.0, %v1794_v45  ;;  %1815 = vpow2.f32 %v1128_v30  ;;  %v1060_v22 = vsub.f32 0.0, %v2290_v1  ;;  %v1124_v27 = vmul.f32 1.442695, %v1055_v4 }
  0xf5   :  { %v1796_v52 = vpop.eup %1795  ;;  %v2282_v57 = vpop.f32.mrb[11].mxu0  ;;  %1817 = vrcp.f32 %v1244_v46  ;;  %v1092_v28 = vsub.f32 0.0, %v2294_v5  ;;  %v1188_v33 = vmul.f32 1.442695, %v1087_v10  ;;  %v2312_v34 = vadd.f32 %v2214_v36, %v689_v42 }
  0xf6   :  { %v1798_v58 = vpop.eup %1797  ;;  %v1242_v60 = vadd.f32 1.0, %v1796_v52  ;;  %v2286_v61 = vpop.f32.mrb[11].mxu1  ;;  %1819 = vrcp.f32 %v1276_v53  ;;  %v1058_v46 = vsub.f32 0.0, %v2299_v15  ;;  %v2320_v52 = vadd.f32 %v1694_v48, %v2214_v36 }
  0xf7   :  { %v1800_v62 = vpop.eup %1799  ;;  %v1274_v63 = vadd.f32 1.0, %v1798_v58  ;;  %v2324_v42 = vadd.f32 %v2277_v51, %v2214_v36  ;;  %v1198_v0 = vmul.f32 1.442695, %v1092_v28  ;;  %v1090_v4 = vsub.f32 0.0, %v2312_v34 }
  0xf8   :  { %v1802_v2 = vpop.eup %1801  ;;  %1821 = vrcp.f32 %v1242_v60  ;;  %v1245_v3 = vadd.f32 1.0, %v1800_v62  ;;  %v1134_v60 = vmul.f32 1.442695, %v1060_v22  ;;  %v2336_v51 = vadd.f32 %v2214_v36, %v2286_v61 }
  0xf9   :  { %v1804_v6 = vpop.eup %1803  ;;  %1823 = vrcp.f32 %v1274_v63  ;;  %v1277_v9 = vadd.f32 1.0, %v1802_v2  ;;  %v1697_v16 = vpop.f32.mrb[12].mxu0  ;;  %v2328_v2 = vadd.f32 %v2214_v36, %v2282_v57 }
  0xfa   :  { %v1806_v11 = vpop.eup %1805  ;;  %1825 = vrcp.f32 %v1245_v3  ;;  %v1243_v14 = vadd.f32 1.0, %v1804_v6  ;;  %v1729_v17 = vpop.f32.mrb[12].mxu1 }
  0xfb   :  { %v1808_v18 = vpop.eup %1807  ;;  %1827 = vrcp.f32 %v1277_v9  ;;  %v1275_v20 = vadd.f32 1.0, %v1806_v11  ;;  %v2302_v23 = vpop.f32.mrb[13].mxu0  ;;  %v1061_v9 = vsub.f32 0.0, %v2320_v52 }
  0xfc   :  { %v2304_v24 = vpop.f32.mrb[13].mxu1  ;;  %v1810_v25 = vpop.eup %1809  ;;  %1829 = vrcp.f32 %v1243_v14  ;;  %v1248_v26 = vadd.f32 1.0, %v1808_v18  ;;  %v2360_v18 = vadd.f32 %v1729_v17, %v2214_v36 }
  0xfd   :  { %v2307_v29 = vpop.f32.mrb[14].mxu0  ;;  %v2309_v30 = vpop.f32.mrb[14].mxu1  ;;  %1831 = vrcp.f32 %v1275_v20  ;;  %v1280_v32 = vadd.f32 1.0, %v1810_v25 }
  0xfe   :  { %v1812_v31 = vpop.eup %1811  ;;  %v2314_v35 = vpop.f32.mrb[15].mxu0  ;;  %1833 = vrcp.f32 %v1248_v26 }
  0xff   :  { %v2316_v37 = vpop.f32.mrb[15].mxu1  ;;  %v1814_v41 = vpop.eup %1813  ;;  %v1246_v45 = vadd.f32 1.0, %v1812_v31  ;;  %1835 = vrcp.f32 %v1280_v32  ;;  %v1194_v32 = vmul.f32 1.442695, %v1090_v4 }
 0x100   :  { %v1816_v53 = vpop.eup %1815  ;;  %v1278_v58 = vadd.f32 1.0, %v1814_v41 }
 0x101   :  { %v1818_v62 = vpop.eup %1817  ;;  %1837 = vrcp.f32 %v1246_v45  ;;  %v1249_v63 = vadd.f32 1.0, %v1816_v53  ;;  %v2348_v10 = vpop.f32.mrb[16].mxu0  ;;  %v1136_v53 = vmul.f32 1.442695, %v1061_v9 }
 0x102   :  { %v1820_v3 = vpop.eup %1819  ;;  %v1444_v48 = vsel %vm1441_vm3, %v1818_v62, %v2217_v39  ;;  %1839 = vrcp.f32 %v1278_v58  ;;  %v2346_v39 = vadd.f32 %v1697_v16, %v2214_v36  ;;  %v2350_v11 = vpop.f32.mrb[16].mxu1 }
 0x103   :  { %v1822_v6 = vpop.eup %1821  ;;  %1508 = vst [vmem:[%s2994_s4 + $0x10] sm:$0xff] %v1444_v48  ;;  %v1476_v57 = vsel %vm1441_vm3, %v1820_v3, %v2220_v40  ;;  %1841 = vrcp.f32 %v1249_v63  ;;  %v1093_v40 = vsub.f32 0.0, %v2324_v42  ;;  %v2362_v16 = vpop.f32.mrb[17].mxu0  ;;  %v1096_v63 = vsub.f32 0.0, %v2360_v18 }
 0x104   :  { %v1824_v61 = vpop.eup %1823  ;;  %1540 = vst [vmem:[%s2994_s4 + $0x110] sm:$0xff] %v1476_v57  ;;  %v1442_v14 = vsel %vm1441_vm3, %v1822_v6, %v2223_v43  ;;  %1843 = vpow2.f32 %v1192_v21  ;;  %v2364_v20 = vpop.f32.mrb[17].mxu1  ;;  %v1130_v43 = vmul.f32 1.442695, %v1058_v46  ;;  %v1059_v21 = vsub.f32 0.0, %v2328_v2 }
 0x105   :  { %v1826_v22 = vpop.eup %1825  ;;  %1506 = vst [vmem:[%s2994_s4] sm:$0xff] %v1442_v14  ;;  %v1474_v25 = vsel %vm1441_vm3, %v1824_v61, %v2226_v44  ;;  %1845 = vpow2.f32 %v1124_v27  ;;  %v2373_v26 = vpop.f32.mrb[18].mxu0  ;;  %v1091_v44 = vsub.f32 0.0, %v2336_v51  ;;  %v1200_v62 = vmul.f32 1.442695, %v1093_v40 }
 0x106   :  { %v2375_v17 = vpop.f32.mrb[18].mxu1  ;;  %v1828_v28 = vpop.eup %1827  ;;  %1538 = vst [vmem:[%s2994_s4 + $0x100] sm:$0xff] %v1474_v25  ;;  %v1445_v31 = vsel %vm1441_vm3, %v1826_v22, %v2231_v49  ;;  %1847 = vpow2.f32 %v1188_v33  ;;  %v1064_v49 = vsub.f32 0.0, %v2346_v39  ;;  %v1206_v14 = vmul.f32 1.442695, %v1096_v63 }
 0x107   :  { %v2384_v27 = vpop.f32.mrb[19].mxu0  ;;  %v2386_v41 = vpop.f32.mrb[19].mxu1  ;;  %1509 = vst [vmem:[%s2994_s4 + $0x18] sm:$0xff] %v1445_v31  ;;  %v1477_v46 = vsel %vm1441_vm3, %v1828_v28, %v2234_v50  ;;  %1849 = vpow2.f32 %v1134_v60  ;;  %v1132_v60 = vmul.f32 1.442695, %v1059_v21  ;;  %v2452_v31 = vadd.f32 %v2214_v36, %v2302_v23 }
 0x108   :  { %v1830_v45 = vpop.eup %1829  ;;  %1541 = vst [vmem:[%s2994_s4 + $0x118] sm:$0xff] %v1477_v46  ;;  %1851 = vpow2.f32 %v1198_v0  ;;  %v1196_v0 = vmul.f32 1.442695, %v1091_v44  ;;  %v1142_v6 = vmul.f32 1.442695, %v1064_v49  ;;  %v2463_v46 = vadd.f32 %v2214_v36, %v2304_v24 }
 0x109   :  { %v1832_v33 = vpop.eup %1831  ;;  %v1443_v58 = vsel %vm1441_vm3, %v1830_v45, %v2239_v55  ;;  %1853 = vpow2.f32 %v1130_v43  ;;  %v2420_v57 = vpop.f32.mrb[20].mxu0  ;;  %v2467_v23 = vadd.f32 %v2307_v29, %v2214_v36  ;;  %v1062_v24 = vsub.f32 0.0, %v2452_v31 }
 0x10a   :  { %v1834_v3 = vpop.eup %1833  ;;  %1507 = vst [vmem:[%s2994_s4 + $0x8] sm:$0xff] %v1443_v58  ;;  %v1475_v50 = vsel %vm1441_vm3, %v1832_v33, %v2242_v56  ;;  %1855 = vpow2.f32 %v1194_v32  ;;  %v2422_v9 = vpop.f32.mrb[20].mxu1  ;;  %v2471_v58 = vadd.f32 %v2309_v30, %v2214_v36 }
 0x10b   :  { %v1836_v48 = vpop.eup %1835  ;;  %1539 = vst [vmem:[%s2994_s4 + $0x108] sm:$0xff] %v1475_v50  ;;  %v1448_v55 = vsel %vm1441_vm3, %v1834_v3, %v2249_v7  ;;  %1857 = vpow2.f32 %v1136_v53  ;;  %v2430_v40 = vpop.f32.mrb[21].mxu0  ;;  %v2476_v3 = vadd.f32 %v2214_v36, %v2314_v35 }
 0x10c   :  { %v1838_v4 = vpop.eup %1837  ;;  %1512 = vst [vmem:[%s2994_s4 + $0x30] sm:$0xff] %v1448_v55  ;;  %v1480_v56 = vsel %vm1441_vm3, %v1836_v48, %v2252_v8  ;;  %1859 = vpow2.f32 %v1200_v62  ;;  %v2432_v8 = vpop.f32.mrb[21].mxu1 }
 0x10d   :  { %v1840_v61 = vpop.eup %1839  ;;  %1544 = vst [vmem:[%s2994_s4 + $0x130] sm:$0xff] %v1480_v56  ;;  %v1446_v7 = vsel %vm1441_vm3, %v1838_v4, %v2255_v12  ;;  %1861 = vpow2.f32 %v1132_v60  ;;  %v2440_v43 = vpop.f32.mrb[22].mxu0  ;;  %v1094_v60 = vsub.f32 0.0, %v2463_v46  ;;  %v1065_v4 = vsub.f32 0.0, %v2467_v23 }
 0x10e   :  { %v1842_v22 = vpop.eup %1841  ;;  %1510 = vst [vmem:[%s2994_s4 + $0x20] sm:$0xff] %v1446_v7  ;;  %v1478_v25 = vsel %vm1441_vm3, %v1840_v61, %v2258_v13  ;;  %v2442_v21 = vpop.f32.mrb[22].mxu1  ;;  %1863 = vpow2.f32 %v1196_v0  ;;  %v1097_v7 = vsub.f32 0.0, %v2471_v58 }
 0x10f   :  { %v1844_v12 = vpop.eup %1843  ;;  %1542 = vst [vmem:[%s2994_s4 + $0x120] sm:$0xff] %v1478_v25  ;;  %v1449_v28 = vsel %vm1441_vm3, %v1842_v22, %v2266_v19  ;;  %v2454_v13 = vpop.f32.mrb[23].mxu0  ;;  %1865 = vpow2.f32 %v1142_v6 }
 0x110   :  { %v2456_v32 = vpop.f32.mrb[23].mxu1  ;;  %v1846_v44 = vpop.eup %1845  ;;  %1513 = vst [vmem:[%s2994_s4 + $0x38] sm:$0xff] %v1449_v28  ;;  %v1281_v45 = vadd.f32 1.0, %v1844_v12  ;;  %1867 = vpow2.f32 %v1206_v14  ;;  %v1138_v28 = vmul.f32 1.442695, %v1062_v24  ;;  %v2504_v24 = vadd.f32 %v2348_v10, %v2214_v36 }
 0x111   :  { %v1848_v19 = vpop.eup %1847  ;;  %v1247_v53 = vadd.f32 1.0, %v1846_v44  ;;  %v2479_v48 = vpop.f32.mrb[24].mxu0  ;;  %v1063_v44 = vsub.f32 0.0, %v2476_v3 }
 0x112   :  { %v1850_v49 = vpop.eup %1849  ;;  %1869 = vrcp.f32 %v1281_v45  ;;  %v1279_v33 = vadd.f32 1.0, %v1848_v19  ;;  %v2481_v55 = vpop.f32.mrb[24].mxu1 }
 0x113   :  { %v1852_v62 = vpop.eup %1851  ;;  %1871 = vrcp.f32 %v1247_v53  ;;  %v1252_v63 = vadd.f32 1.0, %v1850_v49  ;;  %v2484_v56 = vpop.f32.mrb[25].mxu0 }
 0x114   :  { %v1854_v50 = vpop.eup %1853  ;;  %1873 = vrcp.f32 %v1279_v33  ;;  %v1284_v29 = vadd.f32 1.0, %v1852_v62  ;;  %v2486_v6 = vpop.f32.mrb[25].mxu1  ;;  %v1202_v33 = vmul.f32 1.442695, %v1094_v60  ;;  %v2500_v62 = vadd.f32 %v2214_v36, %v2316_v37 }
 0x115   :  { %v1856_v30 = vpop.eup %1855  ;;  %1875 = vrcp.f32 %v1252_v63  ;;  %v1250_v0 = vadd.f32 1.0, %v1854_v50  ;;  %v2489_v14 = vpop.f32.mrb[26].mxu0 }
 0x116   :  { %v1858_v35 = vpop.eup %1857  ;;  %1877 = vrcp.f32 %v1284_v29  ;;  %v1282_v61 = vadd.f32 1.0, %v1856_v30  ;;  %v2491_v22 = vpop.f32.mrb[26].mxu1  ;;  %v1144_v29 = vmul.f32 1.442695, %v1065_v4 }
 0x117   :  { %v1860_v25 = vpop.eup %1859  ;;  %1879 = vrcp.f32 %v1250_v0  ;;  %v1253_v12 = vadd.f32 1.0, %v1858_v35  ;;  %v2494_v45 = vpop.f32.mrb[27].mxu0  ;;  %v1208_v35 = vmul.f32 1.442695, %v1097_v7  ;;  %v2517_v7 = vadd.f32 %v2214_v36, %v2364_v20 }
 0x118   :  { %v2496_v19 = vpop.f32.mrb[27].mxu1  ;;  %v1862_v53 = vpop.eup %1861  ;;  %1881 = vrcp.f32 %v1282_v61  ;;  %v1285_v49 = vadd.f32 1.0, %v1860_v25  ;;  %v2508_v61 = vadd.f32 %v2350_v11, %v2214_v36  ;;  %v1140_v25 = vmul.f32 1.442695, %v1063_v44 }
 0x119   :  { %v1864_v63 = vpop.eup %1863  ;;  %1883 = vrcp.f32 %v1253_v12  ;;  %v1251_v50 = vadd.f32 1.0, %v1862_v53  ;;  %v2512_v12 = vadd.f32 %v2214_v36, %v2362_v16  ;;  %v1095_v53 = vsub.f32 0.0, %v2500_v62  ;;  %v2521_v11 = vpop.f32.mrb[28].mxu1 }
 0x11a   :  { %v1866_v30 = vpop.eup %1865  ;;  %1885 = vrcp.f32 %v1285_v49  ;;  %v1283_v0 = vadd.f32 1.0, %v1864_v63  ;;  %v2519_v49 = vpop.f32.mrb[28].mxu0  ;;  %v1068_v16 = vsub.f32 0.0, %v2504_v24 }
 0x11b   :  { %v1868_v60 = vpop.eup %1867  ;;  %1887 = vrcp.f32 %v1251_v50  ;;  %v1256_v37 = vadd.f32 1.0, %v1866_v30  ;;  %v2529_v50 = vadd.f32 %v2373_v26, %v2214_v36  ;;  %v2531_v30 = vpop.f32.mrb[29].mxu0  ;;  %v2544_v26 = vadd.f32 %v2375_v17, %v2214_v36 }
 0x11c   :  { %v1870_v4 = vpop.eup %1869  ;;  %1889 = vrcp.f32 %v1283_v0  ;;  %v1288_v10 = vadd.f32 1.0, %v1868_v60  ;;  %v2533_v20 = vpop.f32.mrb[29].mxu1  ;;  %v1100_v60 = vsub.f32 0.0, %v2508_v61  ;;  %v2559_v17 = vadd.f32 %v2214_v36, %v2384_v27 }
 0x11d   :  { %v1872_v63 = vpop.eup %1871  ;;  %v1481_v44 = vsel %vm1441_vm3, %v1870_v4, %v2272_v38  ;;  %1891 = vrcp.f32 %v1256_v37  ;;  %2995 = vst [vmem:[#allocation3_spill] sm:$0xff] %v2533_v20  ;;  %v2546_v37 = vpop.f32.mrb[30].mxu0 }
 0x11e   :  { %v1874_v0 = vpop.eup %1873  ;;  %1545 = vst [vmem:[%s2994_s4 + $0x138] sm:$0xff] %v1481_v44  ;;  %v1447_v38 = vsel %vm1441_vm3, %v1872_v63, %v2275_v47  ;;  %1893 = vrcp.f32 %v1288_v10  ;;  %v2548_v4 = vpop.f32.mrb[30].mxu1  ;;  %v1066_v10 = vsub.f32 0.0, %v2512_v12 }
 0x11f   :  { %2996 = vst [vmem:[#allocation4_spill] sm:$0xff] %v2548_v4  ;;  %v1876_v20 = vpop.eup %1875  ;;  %1511 = vst [vmem:[%s2994_s4 + $0x28] sm:$0xff] %v1447_v38  ;;  %v1479_v47 = vsel %vm1441_vm3, %v1874_v0, %v2280_v54  ;;  %1895 = vpow2.f32 %v1138_v28  ;;  %v2561_v63 = vpop.f32.mrb[31].mxu0  ;;  %v1204_v28 = vmul.f32 1.442695, %v1095_v53  ;;  %v1098_v0 = vsub.f32 0.0, %v2517_v7 }
 0x120   :  { %2997 = vst [vmem:[#allocation5_spill] sm:$0xff] %v2561_v63  ;;  %v2563_v44 = vpop.f32.mrb[31].mxu1  ;;  %v1878_v4 = vpop.eup %1877  ;;  %1543 = vst [vmem:[%s2994_s4 + $0x128] sm:$0xff] %v1479_v47  ;;  %v1452_v54 = vsel %vm1441_vm3, %v1876_v20, %v2290_v1  ;;  %1897 = vpow2.f32 %v1202_v33  ;;  %v1069_v47 = vsub.f32 0.0, %v2529_v50  ;;  %v1214_v33 = vmul.f32 1.442695, %v1100_v60 }
 0x121   :  { %2998 = vst [vmem:[#allocation6_spill] sm:$0xff] %v2563_v44  ;;  %v1880_v38 = vpop.eup %1879  ;;  %1516 = vst [vmem:[%s2994_s4 + $0x50] sm:$0xff] %v1452_v54  ;;  %v1484_v27 = vsel %vm1441_vm3, %v1878_v4, %v2294_v5  ;;  %1899 = vpow2.f32 %v1144_v29  ;;  %v1150_v44 = vmul.f32 1.442695, %v1068_v16  ;;  %v1101_v53 = vsub.f32 0.0, %v2544_v26 }
 0x122   :  { %v1882_v63 = vpop.eup %1881  ;;  %1548 = vst [vmem:[%s2994_s4 + $0x150] sm:$0xff] %v1484_v27  ;;  %v1450_v1 = vsel %vm1441_vm3, %v1880_v38, %v2299_v15  ;;  %1901 = vpow2.f32 %v1208_v35  ;;  %v1146_v29 = vmul.f32 1.442695, %v1066_v10  ;;  %v1067_v16 = vsub.f32 0.0, %v2559_v17 }
 0x123   :  { %v1884_v20 = vpop.eup %1883  ;;  %1514 = vst [vmem:[%s2994_s4 + $0x40] sm:$0xff] %v1450_v1  ;;  %v1482_v5 = vsel %vm1441_vm3, %v1882_v63, %v2312_v34  ;;  %1903 = vpow2.f32 %v1140_v25  ;;  %v1210_v35 = vmul.f32 1.442695, %v1098_v0  ;;  %v1152_v25 = vmul.f32 1.442695, %v1069_v47 }
 0x124   :  { %v1886_v4 = vpop.eup %1885  ;;  %1546 = vst [vmem:[%s2994_s4 + $0x140] sm:$0xff] %v1482_v5  ;;  %v1453_v15 = vsel %vm1441_vm3, %v1884_v20, %v2320_v52  ;;  %1905 = vpow2.f32 %v1204_v28  ;;  %v1216_v63 = vmul.f32 1.442695, %v1101_v53  ;;  %v2631_v38 = vadd.f32 %v2214_v36, %v2386_v41 }
 0x125   :  { %v1888_v60 = vpop.eup %1887  ;;  %1517 = vst [vmem:[%s2994_s4 + $0x58] sm:$0xff] %v1453_v15  ;;  %v1485_v34 = vsel %vm1441_vm3, %v1886_v4, %v2324_v42  ;;  %1907 = vpow2.f32 %v1150_v44  ;;  %v1148_v44 = vmul.f32 1.442695, %v1067_v16  ;;  %v2638_v47 = vadd.f32 %v2420_v57, %v2214_v36 }
 0x126   :  { %v1890_v10 = vpop.eup %1889  ;;  %1549 = vst [vmem:[%s2994_s4 + $0x158] sm:$0xff] %v1485_v34  ;;  %v1451_v52 = vsel %vm1441_vm3, %v1888_v60, %v2328_v2  ;;  %1909 = vpow2.f32 %v1214_v33  ;;  %v2646_v20 = vadd.f32 %v2214_v36, %v2430_v40  ;;  %v1099_v57 = vsub.f32 0.0, %v2631_v38 }
 0x127   :  { %v1892_v54 = vpop.eup %1891  ;;  %1515 = vst [vmem:[%s2994_s4 + $0x48] sm:$0xff] %v1451_v52  ;;  %v1483_v42 = vsel %vm1441_vm3, %v1890_v10, %v2336_v51  ;;  %1911 = vpow2.f32 %v1146_v29  ;;  %v2651_v16 = vadd.f32 %v2214_v36, %v2432_v8  ;;  %v1072_v15 = vsub.f32 0.0, %v2638_v47 }
 0x128   :  { %v1894_v28 = vpop.eup %1893  ;;  %1547 = vst [vmem:[%s2994_s4 + $0x148] sm:$0xff] %v1483_v42  ;;  %v1456_v2 = vsel %vm1441_vm3, %v1892_v54, %v2346_v39  ;;  %1913 = vpow2.f32 %v1210_v35  ;;  %v1070_v10 = vsub.f32 0.0, %v2646_v20  ;;  %v1212_v8 = vmul.f32 1.442695, %v1099_v57 }
 0x129   :  { %v1896_v0 = vpop.eup %1895  ;;  %1520 = vst [vmem:[%s2994_s4 + $0x70] sm:$0xff] %v1456_v2  ;;  %v1488_v51 = vsel %vm1441_vm3, %v1894_v28, %v2360_v18  ;;  %1915 = vpow2.f32 %v1152_v25  ;;  %v2642_v18 = vadd.f32 %v2422_v9, %v2214_v36  ;;  %v1102_v54 = vsub.f32 0.0, %v2651_v16 }
 0x12a   :  { %v1898_v27 = vpop.eup %1897  ;;  %1552 = vst [vmem:[%s2994_s4 + $0x170] sm:$0xff] %v1488_v51  ;;  %v1254_v39 = vadd.f32 1.0, %v1896_v0  ;;  %1917 = vpow2.f32 %v1216_v63  ;;  %v1158_v28 = vmul.f32 1.442695, %v1072_v15  ;;  %v2659_v2 = vadd.f32 %v2440_v43, %v2214_v36 }
 0x12b   :  { %v1900_v1 = vpop.eup %1899  ;;  %v1286_v33 = vadd.f32 1.0, %v1898_v27  ;;  %1919 = vpow2.f32 %v1148_v44  ;;  %v1104_v40 = vsub.f32 0.0, %v2642_v18  ;;  %v2671_v57 = vadd.f32 %v2214_v36, %v2456_v32 }
 0x12c   :  { %v1902_v41 = vpop.eup %1901  ;;  %1921 = vrcp.f32 %v1254_v39  ;;  %v1257_v53 = vadd.f32 1.0, %v1900_v1  ;;  %v2663_v39 = vadd.f32 %v2442_v21, %v2214_v36  ;;  %v2676_v15 = vadd.f32 %v2479_v48, %v2214_v36 }
 0x12d   :  { %v1904_v5 = vpop.eup %1903  ;;  %1923 = vrcp.f32 %v1286_v33  ;;  %v1289_v29 = vadd.f32 1.0, %v1902_v41  ;;  %v1222_v27 = vmul.f32 1.442695, %v1104_v40  ;;  %v1154_v41 = vmul.f32 1.442695, %v1070_v10 }
 0x12e   :  { %v1906_v4 = vpop.eup %1905  ;;  %1925 = vrcp.f32 %v1257_v53  ;;  %v1255_v9 = vadd.f32 1.0, %v1904_v5  ;;  %v2667_v53 = vadd.f32 %v2214_v36, %v2454_v13  ;;  %v2684_v32 = vadd.f32 %v2481_v55, %v2214_v36 }
 0x12f   :  { %v1908_v35 = vpop.eup %1907  ;;  %1927 = vrcp.f32 %v1289_v29  ;;  %v1287_v60 = vadd.f32 1.0, %v1906_v4  ;;  %v1218_v29 = vmul.f32 1.442695, %v1102_v54  ;;  %v1103_v10 = vsub.f32 0.0, %v2671_v57 }
 0x130   :  { %v1910_v34 = vpop.eup %1909  ;;  %1929 = vrcp.f32 %v1255_v9  ;;  %v1260_v25 = vadd.f32 1.0, %v1908_v35  ;;  %v1073_v9 = vsub.f32 0.0, %v2659_v2  ;;  %v1108_v54 = vsub.f32 0.0, %v2684_v32 }
 0x131   :  { %v1912_v52 = vpop.eup %1911  ;;  %1931 = vrcp.f32 %v1287_v60  ;;  %v1292_v63 = vadd.f32 1.0, %v1910_v34  ;;  %v1105_v60 = vsub.f32 0.0, %v2663_v39  ;;  %v1071_v34 = vsub.f32 0.0, %v2667_v53 }
 0x132   :  { %v1914_v42 = vpop.eup %1913  ;;  %1933 = vrcp.f32 %v1260_v25  ;;  %v1258_v44 = vadd.f32 1.0, %v1912_v52 }
 0x133   :  { %v1916_v0 = vpop.eup %1915  ;;  %1935 = vrcp.f32 %v1292_v63  ;;  %v1290_v51 = vadd.f32 1.0, %v1914_v42  ;;  %v1160_v63 = vmul.f32 1.442695, %v1073_v9 }
 0x134   :  { %v1918_v1 = vpop.eup %1917  ;;  %1937 = vrcp.f32 %v1258_v44  ;;  %v1261_v33 = vadd.f32 1.0, %v1916_v0  ;;  %v1156_v44 = vmul.f32 1.442695, %v1071_v34 }
 0x135   :  { %v1920_v5 = vpop.eup %1919  ;;  %1939 = vrcp.f32 %v1290_v51  ;;  %v1293_v43 = vadd.f32 1.0, %v1918_v1  ;;  %v1220_v51 = vmul.f32 1.442695, %v1103_v10 }
 0x136   :  { %v1922_v4 = vpop.eup %1921  ;;  %1941 = vrcp.f32 %v1261_v33  ;;  %v1259_v21 = vadd.f32 1.0, %v1920_v5  ;;  %v1230_v5 = vmul.f32 1.442695, %v1108_v54 }
 0x137   :  { %v1924_v35 = vpop.eup %1923  ;;  %v1454_v13 = vsel %vm1441_vm3, %v1922_v4, %v2452_v31  ;;  %1943 = vrcp.f32 %v1293_v43  ;;  %v2695_v31 = vadd.f32 %v2214_v36, %v2484_v56 }
 0x138   :  { %v1926_v40 = vpop.eup %1925  ;;  %1518 = vst [vmem:[%s2994_s4 + $0x60] sm:$0xff] %v1454_v13  ;;  %v1486_v48 = vsel %vm1441_vm3, %v1924_v35, %v2463_v46  ;;  %1945 = vrcp.f32 %v1259_v21  ;;  %v2706_v46 = vadd.f32 %v2214_v36, %v2486_v6  ;;  %v1224_v6 = vmul.f32 1.442695, %v1105_v60  ;;  %v2775_v13 = vld [vmem:[%s2992_s2] ss:$0 sm:$0xff] }
 0x139   :  { %v1928_v25 = vpop.eup %1927  ;;  %1550 = vst [vmem:[%s2994_s4 + $0x160] sm:$0xff] %v1486_v48  ;;  %v1457_v55 = vsel %vm1441_vm3, %v1926_v40, %v2467_v23  ;;  %1947 = vpow2.f32 %v1212_v8  ;;  %v1076_v23 = vsub.f32 0.0, %v2676_v15  ;;  %v2779_v60 = vadd.f32 %v2775_v13, %v2489_v14 }
 0x13a   :  { %v1930_v52 = vpop.eup %1929  ;;  %1521 = vst [vmem:[%s2994_s4 + $0x78] sm:$0xff] %v1457_v55  ;;  %v1489_v56 = vsel %vm1441_vm3, %v1928_v25, %v2471_v58  ;;  %1949 = vpow2.f32 %v1158_v28  ;;  %v1074_v28 = vsub.f32 0.0, %v2695_v31  ;;  %v2790_v25 = vadd.f32 %v2775_v13, %v2494_v45 }
 0x13b   :  { %v1932_v8 = vpop.eup %1931  ;;  %1553 = vst [vmem:[%s2994_s4 + $0x178] sm:$0xff] %v1489_v56  ;;  %v1455_v36 = vsel %vm1441_vm3, %v1930_v52, %v2476_v3  ;;  %1951 = vpow2.f32 %v1222_v27  ;;  %v1106_v27 = vsub.f32 0.0, %v2706_v46  ;;  %v1166_v33 = vmul.f32 1.442695, %v1076_v23 }
 0x13c   :  { %v1934_v42 = vpop.eup %1933  ;;  %1519 = vst [vmem:[%s2994_s4 + $0x68] sm:$0xff] %v1455_v36  ;;  %v1487_v58 = vsel %vm1441_vm3, %v1932_v8, %v2500_v62  ;;  %1953 = vpow2.f32 %v1154_v41  ;;  %v2794_v10 = vadd.f32 %v2775_v13, %v2496_v19 }
 0x13d   :  { %v1936_v0 = vpop.eup %1935  ;;  %1551 = vst [vmem:[%s2994_s4 + $0x168] sm:$0xff] %v1487_v58  ;;  %v1460_v3 = vsel %vm1441_vm3, %v1934_v42, %v2504_v24  ;;  %1955 = vpow2.f32 %v1218_v29  ;;  %v1162_v29 = vmul.f32 1.442695, %v1074_v28  ;;  %v1226_v21 = vmul.f32 1.442695, %v1106_v27 }
 0x13e   :  { %v1938_v1 = vpop.eup %1937  ;;  %1524 = vst [vmem:[%s2994_s4 + $0x90] sm:$0xff] %v1460_v3  ;;  %v1492_v62 = vsel %vm1441_vm3, %v1936_v0, %v2508_v61  ;;  %1957 = vpow2.f32 %v1160_v63  ;;  %v1107_v19 = vsub.f32 0.0, %v2794_v10  ;;  %v2802_v0 = vadd.f32 %v2775_v13, %v2519_v49 }
 0x13f   :  { %v1940_v41 = vpop.eup %1939  ;;  %1556 = vst [vmem:[%s2994_s4 + $0x190] sm:$0xff] %v1492_v62  ;;  %v1458_v24 = vsel %vm1441_vm3, %v1938_v1, %v2512_v12  ;;  %1959 = vpow2.f32 %v1224_v6  ;;  %v1075_v6 = vsub.f32 0.0, %v2790_v25  ;;  %v2806_v1 = vadd.f32 %v2775_v13, %v2521_v11 }
 0x140   :  { %v1942_v43 = vpop.eup %1941  ;;  %1522 = vst [vmem:[%s2994_s4 + $0x80] sm:$0xff] %v1458_v24  ;;  %v1490_v61 = vsel %vm1441_vm3, %v1940_v41, %v2517_v7  ;;  %1961 = vpow2.f32 %v1156_v44  ;;  %v2810_v24 = vadd.f32 %v2775_v13, %v2531_v30 }
 0x141   :  { %v1944_v4 = vpop.eup %1943  ;;  %1554 = vst [vmem:[%s2994_s4 + $0x180] sm:$0xff] %v1490_v61  ;;  %v1461_v12 = vsel %vm1441_vm3, %v1942_v43, %v2529_v50  ;;  %1963 = vpow2.f32 %v1220_v51  ;;  %v1164_v41 = vmul.f32 1.442695, %v1075_v6  ;;  %v1228_v43 = vmul.f32 1.442695, %v1107_v19  ;;  %v2999_v61 = vld [vmem:[#allocation3_spill] sm:$0xff] }
 0x142   :  { %v1946_v9 = vpop.eup %1945  ;;  %1525 = vst [vmem:[%s2994_s4 + $0x98] sm:$0xff] %v1461_v12  ;;  %v1493_v7 = vsel %vm1441_vm3, %v1944_v4, %v2544_v26  ;;  %1965 = vpow2.f32 %v1166_v33  ;;  %v1080_v12 = vsub.f32 0.0, %v2802_v0 }
 0x143   :  { %v1948_v35 = vpop.eup %1947  ;;  %1557 = vst [vmem:[%s2994_s4 + $0x198] sm:$0xff] %v1493_v7  ;;  %v1459_v50 = vsel %vm1441_vm3, %v1946_v9, %v2559_v17  ;;  %1967 = vpow2.f32 %v1230_v5  ;;  %v2786_v17 = vadd.f32 %v2775_v13, %v2491_v22  ;;  %v1077_v22 = vsub.f32 0.0, %v2779_v60 }
 0x144   :  { %v1950_v26 = vpop.eup %1949  ;;  %1523 = vst [vmem:[%s2994_s4 + $0x88] sm:$0xff] %v1459_v50  ;;  %v1291_v40 = vadd.f32 1.0, %v1948_v35  ;;  %1969 = vpow2.f32 %v1162_v29  ;;  %v2814_v29 = vadd.f32 %v2775_v13, %v2999_v61  ;;  %v1112_v7 = vsub.f32 0.0, %v2806_v1  ;;  %v3000_v35 = vld [vmem:[#allocation4_spill] sm:$0xff] }
 0x145   :  { %v1952_v48 = vpop.eup %1951  ;;  %v1264_v34 = vadd.f32 1.0, %v1950_v26  ;;  %1971 = vpow2.f32 %v1226_v21  ;;  %v1109_v8 = vsub.f32 0.0, %v2786_v17  ;;  %v1168_v28 = vmul.f32 1.442695, %v1077_v22 }
 0x146   :  { %v1954_v14 = vpop.eup %1953  ;;  %1973 = vrcp.f32 %v1291_v40  ;;  %v1296_v55 = vadd.f32 1.0, %v1952_v48  ;;  %v2819_v21 = vadd.f32 %v2775_v13, %v2546_v37  ;;  %v2824_v50 = vadd.f32 %v2775_v13, %v3000_v35 }
 0x147   :  { %v1956_v52 = vpop.eup %1955  ;;  %1975 = vrcp.f32 %v1264_v34  ;;  %v1262_v56 = vadd.f32 1.0, %v1954_v14  ;;  %v1232_v27 = vmul.f32 1.442695, %v1109_v8  ;;  %v1078_v48 = vsub.f32 0.0, %v2810_v24  ;;  %v3001_v34 = vld [vmem:[#allocation5_spill] sm:$0xff] }
 0x148   :  { %v1958_v63 = vpop.eup %1957  ;;  %1977 = vrcp.f32 %v1296_v55  ;;  %v1294_v23 = vadd.f32 1.0, %v1956_v52  ;;  %v2832_v37 = vadd.f32 %v2775_v13, %v3001_v34  ;;  %v1110_v52 = vsub.f32 0.0, %v2814_v29 }
 0x149   :  { %v1960_v36 = vpop.eup %1959  ;;  %1979 = vrcp.f32 %v1262_v56  ;;  %v1265_v45 = vadd.f32 1.0, %v1958_v63 }
 0x14a   :  { %v1962_v54 = vpop.eup %1961  ;;  %1981 = vrcp.f32 %v1294_v23  ;;  %v1297_v42 = vadd.f32 1.0, %v1960_v36  ;;  %v1174_v23 = vmul.f32 1.442695, %v1080_v12  ;;  %v1238_v36 = vmul.f32 1.442695, %v1112_v7 }
 0x14b   :  { %v1964_v58 = vpop.eup %1963  ;;  %1983 = vrcp.f32 %v1265_v45  ;;  %v1263_v44 = vadd.f32 1.0, %v1962_v54  ;;  %v1113_v45 = vsub.f32 0.0, %v2824_v50  ;;  %v1170_v54 = vmul.f32 1.442695, %v1078_v48 }
 0x14c   :  { %v1966_v3 = vpop.eup %1965  ;;  %1985 = vrcp.f32 %v1297_v42  ;;  %v1295_v51 = vadd.f32 1.0, %v1964_v58  ;;  %v1079_v42 = vsub.f32 0.0, %v2832_v37  ;;  %v1234_v58 = vmul.f32 1.442695, %v1110_v52 }
 0x14d   :  { %v1968_v62 = vpop.eup %1967  ;;  %1987 = vrcp.f32 %v1263_v44  ;;  %v1268_v33 = vadd.f32 1.0, %v1966_v3 }
 0x14e   :  { %v1970_v5 = vpop.eup %1969  ;;  %1989 = vrcp.f32 %v1295_v51  ;;  %v1300_v49 = vadd.f32 1.0, %v1968_v62 }
 0x14f   :  { %v1972_v4 = vpop.eup %1971  ;;  %1991 = vrcp.f32 %v1268_v33  ;;  %v1266_v11 = vadd.f32 1.0, %v1970_v5  ;;  %v1172_v33 = vmul.f32 1.442695, %v1079_v42 }
 0x150   :  { %v1974_v9 = vpop.eup %1973  ;;  %1993 = vrcp.f32 %v1300_v49  ;;  %v1298_v30 = vadd.f32 1.0, %v1972_v4 }
 0x151   :  { %v1976_v26 = vpop.eup %1975  ;;  %v1491_v40 = vsel %vm1441_vm3, %v1974_v9, %v2631_v38  ;;  %1995 = vrcp.f32 %v1266_v11  ;;  %v3002_v38 = vld [vmem:[#allocation6_spill] sm:$0xff] }
 0x152   :  { %v1978_v14 = vpop.eup %1977  ;;  %1555 = vst [vmem:[%s2994_s4 + $0x188] sm:$0xff] %v1491_v40  ;;  %v1464_v55 = vsel %vm1441_vm3, %v1976_v26, %v2638_v47  ;;  %1997 = vrcp.f32 %v1298_v30  ;;  %v2843_v56 = vadd.f32 %v2775_v13, %v3002_v38  ;;  %v1081_v47 = vsub.f32 0.0, %v2819_v21 }
 0x153   :  { %v1980_v22 = vpop.eup %1979  ;;  %1528 = vst [vmem:[%s2994_s4 + $0xb0] sm:$0xff] %v1464_v55  ;;  %v1496_v63 = vsel %vm1441_vm3, %v1978_v14, %v2642_v18  ;;  %1999 = vpow2.f32 %v1168_v28 }
 0x154   :  { %v1982_v8 = vpop.eup %1981  ;;  %1560 = vst [vmem:[%s2994_s4 + $0x1b0] sm:$0xff] %v1496_v63  ;;  %v1462_v13 = vsel %vm1441_vm3, %v1980_v22, %v2646_v20  ;;  %2001 = vpow2.f32 %v1232_v27  ;;  %v1111_v44 = vsub.f32 0.0, %v2843_v56  ;;  %v1176_v3 = vmul.f32 1.442695, %v1081_v47 }
 0x155   :  { %v1984_v6 = vpop.eup %1983  ;;  %1526 = vst [vmem:[%s2994_s4 + $0xa0] sm:$0xff] %v1462_v13  ;;  %v1494_v18 = vsel %vm1441_vm3, %v1982_v8, %v2651_v16  ;;  %2003 = vpow2.f32 %v1164_v41  ;;  %v1240_v27 = vmul.f32 1.442695, %v1113_v45 }
 0x156   :  { %v1986_v19 = vpop.eup %1985  ;;  %1558 = vst [vmem:[%s2994_s4 + $0x1a0] sm:$0xff] %v1494_v18  ;;  %v1465_v20 = vsel %vm1441_vm3, %v1984_v6, %v2659_v2  ;;  %2005 = vpow2.f32 %v1228_v43  ;;  %v1236_v5 = vmul.f32 1.442695, %v1111_v44 }
 0x157   :  { %v1988_v28 = vpop.eup %1987  ;;  %1529 = vst [vmem:[%s2994_s4 + $0xb8] sm:$0xff] %v1465_v20  ;;  %v1497_v16 = vsel %vm1441_vm3, %v1986_v19, %v2663_v39  ;;  %2007 = vpow2.f32 %v1174_v23 }
 0x158   :  { %v1990_v51 = vpop.eup %1989  ;;  %1561 = vst [vmem:[%s2994_s4 + $0x1b8] sm:$0xff] %v1497_v16  ;;  %v1463_v2 = vsel %vm1441_vm3, %v1988_v28, %v2667_v53  ;;  %2009 = vpow2.f32 %v1238_v36 }
 0x159   :  { %v1992_v62 = vpop.eup %1991  ;;  %1527 = vst [vmem:[%s2994_s4 + $0xa8] sm:$0xff] %v1463_v2  ;;  %v1495_v39 = vsel %vm1441_vm3, %v1990_v51, %v2671_v57  ;;  %2011 = vpow2.f32 %v1170_v54 }
 0x15a   :  { %v1994_v41 = vpop.eup %1993  ;;  %1559 = vst [vmem:[%s2994_s4 + $0x1a8] sm:$0xff] %v1495_v39  ;;  %v1468_v53 = vsel %vm1441_vm3, %v1992_v62, %v2676_v15  ;;  %2013 = vpow2.f32 %v1234_v58 }
 0x15b   :  { %v1996_v49 = vpop.eup %1995  ;;  %1532 = vst [vmem:[%s2994_s4 + $0xd0] sm:$0xff] %v1468_v53  ;;  %v1500_v57 = vsel %vm1441_vm3, %v1994_v41, %v2684_v32  ;;  %2015 = vpow2.f32 %v1176_v3 }
 0x15c   :  { %v1998_v43 = vpop.eup %1997  ;;  %1564 = vst [vmem:[%s2994_s4 + $0x1d0] sm:$0xff] %v1500_v57  ;;  %v1466_v15 = vsel %vm1441_vm3, %v1996_v49, %v2695_v31  ;;  %2017 = vpow2.f32 %v1240_v27 }
 0x15d   :  { %v2000_v61 = vpop.eup %1999  ;;  %1530 = vst [vmem:[%s2994_s4 + $0xc0] sm:$0xff] %v1466_v15  ;;  %v1498_v32 = vsel %vm1441_vm3, %v1998_v43, %v2706_v46  ;;  %2019 = vpow2.f32 %v1172_v33 }
 0x15e   :  { %v2002_v4 = vpop.eup %2001  ;;  %1562 = vst [vmem:[%s2994_s4 + $0x1c0] sm:$0xff] %v1498_v32  ;;  %v1269_v11 = vadd.f32 1.0, %v2000_v61  ;;  %2021 = vpow2.f32 %v1236_v5 }
 0x15f   :  { %v2004_v12 = vpop.eup %2003  ;;  %v1301_v31 = vadd.f32 1.0, %v2002_v4 }
 0x160   :  { %v2006_v9 = vpop.eup %2005  ;;  %2023 = vrcp.f32 %v1269_v11  ;;  %v1267_v30 = vadd.f32 1.0, %v2004_v12 }
 0x161   :  { %v2008_v7 = vpop.eup %2007  ;;  %2025 = vrcp.f32 %v1301_v31  ;;  %v1299_v35 = vadd.f32 1.0, %v2006_v9 }
 0x162   :  { %v2010_v26 = vpop.eup %2009  ;;  %2027 = vrcp.f32 %v1267_v30  ;;  %v1272_v40 = vadd.f32 1.0, %v2008_v7 }
 0x163   :  { %v2012_v46 = vpop.eup %2011  ;;  %2029 = vrcp.f32 %v1299_v35  ;;  %v1304_v48 = vadd.f32 1.0, %v2010_v26 }
 0x164   :  { %v2014_v34 = vpop.eup %2013  ;;  %2031 = vrcp.f32 %v1272_v40  ;;  %v1270_v14 = vadd.f32 1.0, %v2012_v46 }
 0x165   :  { %v2016_v55 = vpop.eup %2015  ;;  %2033 = vrcp.f32 %v1304_v48  ;;  %v1302_v52 = vadd.f32 1.0, %v2014_v34 }
 0x166   :  { %v2018_v38 = vpop.eup %2017  ;;  %2035 = vrcp.f32 %v1270_v14  ;;  %v1273_v22 = vadd.f32 1.0, %v2016_v55 }
 0x167   :  { %v2020_v63 = vpop.eup %2019  ;;  %2037 = vrcp.f32 %v1302_v52  ;;  %v1305_v23 = vadd.f32 1.0, %v2018_v38 }
 0x168   :  { %v2022_v47 = vpop.eup %2021  ;;  %2039 = vrcp.f32 %v1273_v22  ;;  %v1271_v8 = vadd.f32 1.0, %v2020_v63 }
 0x169   :  { %2041 = vrcp.f32 %v1305_v23  ;;  %v1303_v13 = vadd.f32 1.0, %v2022_v47 }
 0x16a   :  { %v2024_v36 = vpop.eup %2023  ;;  %2043 = vrcp.f32 %v1271_v8 }
 0x16b   :  { %v2026_v45 = vpop.eup %2025  ;;  %v1469_v6 = vsel %vm1441_vm3, %v2024_v36, %v2779_v60  ;;  %2045 = vrcp.f32 %v1303_v13 }
 0x16c   :  { %v2028_v18 = vpop.eup %2027  ;;  %1533 = vst [vmem:[%s2994_s4 + $0xd8] sm:$0xff] %v1469_v6  ;;  %v1501_v54 = vsel %vm1441_vm3, %v2026_v45, %v2786_v17 }
 0x16d   :  { %v2030_v42 = vpop.eup %2029  ;;  %1565 = vst [vmem:[%s2994_s4 + $0x1d8] sm:$0xff] %v1501_v54  ;;  %v1467_v19 = vsel %vm1441_vm3, %v2028_v18, %v2790_v25 }
 0x16e   :  { %v2032_v60 = vpop.eup %2031  ;;  %1531 = vst [vmem:[%s2994_s4 + $0xc8] sm:$0xff] %v1467_v19  ;;  %v1499_v20 = vsel %vm1441_vm3, %v2030_v42, %v2794_v10 }
 0x16f   :  { %v2034_v58 = vpop.eup %2033  ;;  %1563 = vst [vmem:[%s2994_s4 + $0x1c8] sm:$0xff] %v1499_v20  ;;  %v1472_v17 = vsel %vm1441_vm3, %v2032_v60, %v2802_v0 }
 0x170   :  { %v2036_v44 = vpop.eup %2035  ;;  %1536 = vst [vmem:[%s2994_s4 + $0xf0] sm:$0xff] %v1472_v17  ;;  %v1504_v25 = vsel %vm1441_vm3, %v2034_v58, %v2806_v1 }
 0x171   :  { %v2038_v28 = vpop.eup %2037  ;;  %1568 = vst [vmem:[%s2994_s4 + $0x1f0] sm:$0xff] %v1504_v25  ;;  %v1470_v10 = vsel %vm1441_vm3, %v2036_v44, %v2810_v24 }
 0x172   :  { %v2040_v16 = vpop.eup %2039  ;;  %1534 = vst [vmem:[%s2994_s4 + $0xe0] sm:$0xff] %v1470_v10  ;;  %v1502_v0 = vsel %vm1441_vm3, %v2038_v28, %v2814_v29 }
 0x173   :  { %v2042_v3 = vpop.eup %2041  ;;  %1566 = vst [vmem:[%s2994_s4 + $0x1e0] sm:$0xff] %v1502_v0  ;;  %v1473_v1 = vsel %vm1441_vm3, %v2040_v16, %v2819_v21 }
 0x174   :  { %v2044_v51 = vpop.eup %2043  ;;  %1537 = vst [vmem:[%s2994_s4 + $0xf8] sm:$0xff] %v1473_v1  ;;  %v1505_v24 = vsel %vm1441_vm3, %v2042_v3, %v2824_v50 }
 0x175   :  { %v2046_v2 = vpop.eup %2045  ;;  %1569 = vst [vmem:[%s2994_s4 + $0x1f8] sm:$0xff] %v1505_v24  ;;  %v1471_v29 = vsel %vm1441_vm3, %v2044_v51, %v2832_v37 }
 0x176   :  { %1535 = vst [vmem:[%s2994_s4 + $0xe8] sm:$0xff] %v1471_v29  ;;  %v1503_v21 = vsel %vm1441_vm3, %v2046_v2, %v2843_v56 }
 0x177   :  { %1567 = vst [vmem:[%s2994_s4 + $0x1e8] sm:$0xff] %v1503_v21 }

// kernel: dcnv2_forward.8
= control target key start
LH: loop header
LB: loop body
LE: loop exit
PB: predicated region body
PF: predicated region fallthrough
CT: control target
= control target key end

     0   :  { %vm391_vm0 = vcmask 293888   ;;  %vm488_vm1 = vcmask 1041408   ;;  %s2817_s1 = inlined_call_operand.vmem [shape: bf16[36,128], index: 1, kind: input, shape index: {}]   ;;  %s2818_s0 = inlined_call_operand.vmem [shape: bf16[512,36], index: 0, kind: input, shape index: {}]   ;;  %s2819_s2 = inlined_call_operand.vmem [shape: f32[1,128], index: 2, kind: input, shape index: {}]   ;;  %s2820_s3 = inlined_call_operand.vmem [shape: f32[512,128], index: 3, kind: output, shape index: {}]  }
   0x1   :  { %v1744_v0 = vld [vmem:[%s2817_s1] sm:$0xff]   ;;  %v1745_v1 = vld [vmem:[%s2817_s1 + $0x8] sm:$0xff]   ;;  %v1746_v2 = vld [vmem:[%s2817_s1 + $0x10] ss:$0 sps:$4 sm:$0x33]  }
   0x2   :  { %1666 = vmatprep.subr.bf16.mxu0 %v1744_v0  ;;  %1736 = vmatprep.subr.bf16.mxu1 %v1744_v0  ;;  %v1747_v3 = vld [vmem:[%s2818_s0] sm:$0xff]   ;;  %v490_v5 = vsel %vm488_vm1, %v1746_v2, 0  ;;  %v1749_v6 = vld [vmem:[%s2818_s0 + $0x8] sm:$0xff]   ;;  %v1751_v8 = vld [vmem:[%s2818_s0 + $0x10] sm:$0xff]  }
   0x3   :  { %1667 = vmatpush3.bf16.msra.mxu0 %v1744_v0  ;;  %1739 = vmatpush3.bf16.msra.mxu1 %v1744_v0  ;;  %v1748_v4 = vld [vmem:[%s2818_s0 + $0x80] sm:$0xff]   ;;  %v1750_v7 = vld [vmem:[%s2818_s0 + $0x88] sm:$0xff]   ;;  %v1752_v9 = vld [vmem:[%s2818_s0 + $0x90] sm:$0xff]  }
   0x4   :  { %1668 = vmatprep.subr.bf16.mxu0 %v1745_v1  ;;  %1737 = vmatprep.subr.bf16.mxu1 %v1745_v1  ;;  %v1753_v10 = vld [vmem:[%s2818_s0 + $0x18] sm:$0xff]   ;;  %v1755_v12 = vld [vmem:[%s2818_s0 + $0x20] sm:$0xff]   ;;  %v1757_v14 = vld [vmem:[%s2818_s0 + $0x28] sm:$0xff]  }
   0x5   :  { %1672 = vmatprep.mubr.msk.bf16.mxu0 %vm391_vm0, %v1747_v3  ;;  %1704 = vmatprep.mubr.msk.bf16.mxu1 %vm391_vm0, %v1748_v4  ;;  %v1754_v11 = vld [vmem:[%s2818_s0 + $0x98] sm:$0xff]   ;;  %v1756_v13 = vld [vmem:[%s2818_s0 + $0xa0] sm:$0xff]   ;;  %v1758_v15 = vld [vmem:[%s2818_s0 + $0xa8] sm:$0xff]  }
   0x6   :  { %v1759_v16 = vld [vmem:[%s2818_s0 + $0x30] sm:$0xff]   ;;  %v1761_v18 = vld [vmem:[%s2818_s0 + $0x38] sm:$0xff]   ;;  %v1763_v20 = vld [vmem:[%s2818_s0 + $0x40] sm:$0xff]  }
   0x7   :  { %1669 = vmatpush3.bf16.msra.mxu0 %v1745_v1  ;;  %1740 = vmatpush3.bf16.msra.mxu1 %v1745_v1  ;;  %v1760_v17 = vld [vmem:[%s2818_s0 + $0xb0] sm:$0xff]   ;;  %v1762_v19 = vld [vmem:[%s2818_s0 + $0xb8] sm:$0xff]   ;;  %v1764_v21 = vld [vmem:[%s2818_s0 + $0xc0] sm:$0xff]  }
   0x8   :  { %1742 = vmatprep.subr.msk.bf16.mxu0 %vm488_vm1, %v1746_v2  ;;  %1743 = vmatprep.subr.msk.bf16.mxu1 %vm488_vm1, %v1746_v2  ;;  %v1765_v22 = vld [vmem:[%s2818_s0 + $0x48] sm:$0xff]   ;;  %v1767_v24 = vld [vmem:[%s2818_s0 + $0x50] sm:$0xff]   ;;  %v1769_v26 = vld [vmem:[%s2818_s0 + $0x58] sm:$0xff]  }
   0x9   :  { %v1766_v23 = vld [vmem:[%s2818_s0 + $0xc8] sm:$0xff]   ;;  %v1768_v25 = vld [vmem:[%s2818_s0 + $0xd0] sm:$0xff]   ;;  %v1770_v27 = vld [vmem:[%s2818_s0 + $0xd8] sm:$0xff]  }
   0xa   :  { %v1771_v28 = vld [vmem:[%s2818_s0 + $0x60] sm:$0xff]   ;;  %v1773_v30 = vld [vmem:[%s2818_s0 + $0x68] sm:$0xff]   ;;  %v1775_v32 = vld [vmem:[%s2818_s0 + $0x70] sm:$0xff]  }
   0xb   :  { %1671 = vmatpush3.bf16.msra.mxu0 %v490_v5  ;;  %1741 = vmatpush3.bf16.msra.mxu1 %v490_v5  ;;  %v1772_v29 = vld [vmem:[%s2818_s0 + $0xe0] sm:$0xff]   ;;  %v1774_v31 = vld [vmem:[%s2818_s0 + $0xe8] sm:$0xff]   ;;  %v1776_v33 = vld [vmem:[%s2818_s0 + $0xf0] sm:$0xff]  }
   0xc   :  { %v1777_v34 = vld [vmem:[%s2818_s0 + $0x78] sm:$0xff]   ;;  %v2196_v36 = vld [vmem:[%s2819_s2] ss:$0 sm:$0xff] }
   0xd   :  { %v1778_v35 = vld [vmem:[%s2818_s0 + $0xf8] sm:$0xff]  }
   0xe   :  { %1673 = vmatmul.mubr.msk.bf16.vlgmr.msra.gmra.mrb[0].mxu0 %vm391_vm0, %v1749_v6  ;;  %1705 = vmatmul.mubr.msk.bf16.vlgmr.msra.gmra.mrb[0].mxu1 %vm391_vm0, %v1750_v7 }
   0xf   :  { %1676 = vmatprep.mubr.msk.bf16.mxu0 %vm391_vm0, %v1751_v8  ;;  %1708 = vmatprep.mubr.msk.bf16.mxu1 %vm391_vm0, %v1752_v9 }
  0x16   :  { %1677 = vmatmul.mubr.msk.bf16.gmra.mrb[4].mxu0 %vm391_vm0, %v1753_v10  ;;  %1709 = vmatmul.mubr.msk.bf16.gmra.mrb[4].mxu1 %vm391_vm0, %v1754_v11 }
  0x17   :  { %1680 = vmatprep.mubr.msk.bf16.mxu0 %vm391_vm0, %v1755_v12  ;;  %1712 = vmatprep.mubr.msk.bf16.mxu1 %vm391_vm0, %v1756_v13 }
  0x1e   :  { %1681 = vmatmul.mubr.msk.bf16.gmra.mrb[8].mxu0 %vm391_vm0, %v1757_v14  ;;  %1713 = vmatmul.mubr.msk.bf16.gmra.mrb[8].mxu1 %vm391_vm0, %v1758_v15 }
  0x1f   :  { %1684 = vmatprep.mubr.msk.bf16.mxu0 %vm391_vm0, %v1759_v16  ;;  %1716 = vmatprep.mubr.msk.bf16.mxu1 %vm391_vm0, %v1760_v17 }
  0x26   :  { %1685 = vmatmul.mubr.msk.bf16.gmra.mrb[12].mxu0 %vm391_vm0, %v1761_v18  ;;  %1717 = vmatmul.mubr.msk.bf16.gmra.mrb[12].mxu1 %vm391_vm0, %v1762_v19 }
  0x27   :  { %1688 = vmatprep.mubr.msk.bf16.mxu0 %vm391_vm0, %v1763_v20  ;;  %1720 = vmatprep.mubr.msk.bf16.mxu1 %vm391_vm0, %v1764_v21 }
  0x2e   :  { %1689 = vmatmul.mubr.msk.bf16.gmra.mrb[16].mxu0 %vm391_vm0, %v1765_v22  ;;  %1721 = vmatmul.mubr.msk.bf16.gmra.mrb[16].mxu1 %vm391_vm0, %v1766_v23 }
  0x2f   :  { %1692 = vmatprep.mubr.msk.bf16.mxu0 %vm391_vm0, %v1767_v24  ;;  %1724 = vmatprep.mubr.msk.bf16.mxu1 %vm391_vm0, %v1768_v25 }
  0x36   :  { %1693 = vmatmul.mubr.msk.bf16.gmra.mrb[20].mxu0 %vm391_vm0, %v1769_v26  ;;  %1725 = vmatmul.mubr.msk.bf16.gmra.mrb[20].mxu1 %vm391_vm0, %v1770_v27 }
  0x37   :  { %1696 = vmatprep.mubr.msk.bf16.mxu0 %vm391_vm0, %v1771_v28  ;;  %1728 = vmatprep.mubr.msk.bf16.mxu1 %vm391_vm0, %v1772_v29 }
  0x3e   :  { %1697 = vmatmul.mubr.msk.bf16.gmra.mrb[24].mxu0 %vm391_vm0, %v1773_v30  ;;  %1729 = vmatmul.mubr.msk.bf16.gmra.mrb[24].mxu1 %vm391_vm0, %v1774_v31 }
  0x3f   :  { %1700 = vmatprep.mubr.msk.bf16.mxu0 %vm391_vm0, %v1775_v32  ;;  %1732 = vmatprep.mubr.msk.bf16.mxu1 %vm391_vm0, %v1776_v33 }
  0x46   :  { %1701 = vmatmul.mubr.msk.bf16.gmra.mrb[28].mxu0 %vm391_vm0, %v1777_v34  ;;  %1733 = vmatmul.mubr.msk.bf16.gmra.mrb[28].mxu1 %vm391_vm0, %v1778_v35 }
  0xe1   :  { %v1674_v37 = vpop.f32.mrb[0].mxu0  ;;  %v1706_v38 = vpop.f32.mrb[0].mxu1 }
  0xe2   :  { %v2199_v39 = vadd.f32 %v1674_v37, %v2196_v36  ;;  %v2202_v40 = vadd.f32 %v1706_v38, %v2196_v36  ;;  %v526_v41 = vpop.f32.mrb[1].mxu0  ;;  %v654_v42 = vpop.f32.mrb[1].mxu1 }
  0xe3   :  { %v2205_v43 = vadd.f32 %v2196_v36, %v526_v41  ;;  %v2208_v44 = vadd.f32 %v2196_v36, %v654_v42  ;;  %v1675_v45 = vpop.f32.mrb[2].mxu0  ;;  %v1707_v46 = vpop.f32.mrb[2].mxu1 }
  0xe4   :  { %v1049_v47 = vsub.f32 0.0, %v2199_v39  ;;  %v1081_v48 = vsub.f32 0.0, %v2202_v40  ;;  %v2213_v49 = vadd.f32 %v1675_v45, %v2196_v36  ;;  %v2216_v50 = vadd.f32 %v1707_v46, %v2196_v36  ;;  %v529_v51 = vpop.f32.mrb[3].mxu0  ;;  %v657_v52 = vpop.f32.mrb[3].mxu1 }
  0xe5   :  { %v1047_v53 = vsub.f32 0.0, %v2205_v43  ;;  %v1079_v54 = vsub.f32 0.0, %v2208_v44  ;;  %v2221_v55 = vadd.f32 %v2196_v36, %v529_v51  ;;  %v2224_v56 = vadd.f32 %v2196_v36, %v657_v52 }
  0xe6   :  { %v1115_v57 = vmul.f32 1.442695, %v1049_v47  ;;  %v1179_v58 = vmul.f32 1.442695, %v1081_v48  ;;  %v1050_v59 = vsub.f32 0.0, %v2213_v49  ;;  %v1082_v60 = vsub.f32 0.0, %v2216_v50 }
  0xe7   :  { %v1111_v61 = vmul.f32 1.442695, %v1047_v53  ;;  %v1175_v62 = vmul.f32 1.442695, %v1079_v54  ;;  %v1048_v63 = vsub.f32 0.0, %v2221_v55  ;;  %v1080_v0 = vsub.f32 0.0, %v2224_v56 }
  0xe8   :  { %1779 = vpow2.f32 %v1115_v57  ;;  %v1117_v1 = vmul.f32 1.442695, %v1050_v59  ;;  %v1181_v2 = vmul.f32 1.442695, %v1082_v60 }
  0xe9   :  { %1781 = vpow2.f32 %v1179_v58  ;;  %v1678_v3 = vpop.f32.mrb[4].mxu0  ;;  %v1710_v4 = vpop.f32.mrb[4].mxu1  ;;  %v1113_v5 = vmul.f32 1.442695, %v1048_v63  ;;  %v1177_v10 = vmul.f32 1.442695, %v1080_v0 }
  0xea   :  { %1783 = vpow2.f32 %v1111_v61  ;;  %v2231_v6 = vadd.f32 %v1678_v3, %v2196_v36  ;;  %v2234_v7 = vadd.f32 %v1710_v4, %v2196_v36  ;;  %v542_v8 = vpop.f32.mrb[5].mxu0  ;;  %v670_v9 = vpop.f32.mrb[5].mxu1 }
  0xeb   :  { %1785 = vpow2.f32 %v1175_v62  ;;  %v2237_v11 = vadd.f32 %v2196_v36, %v542_v8  ;;  %v2240_v12 = vadd.f32 %v2196_v36, %v670_v9  ;;  %v1679_v13 = vpop.f32.mrb[6].mxu0  ;;  %v1711_v14 = vpop.f32.mrb[6].mxu1 }
  0xec   :  { %1787 = vpow2.f32 %v1117_v1  ;;  %v1053_v15 = vsub.f32 0.0, %v2231_v6  ;;  %v1085_v16 = vsub.f32 0.0, %v2234_v7  ;;  %v2245_v17 = vadd.f32 %v1679_v13, %v2196_v36  ;;  %v545_v18 = vpop.f32.mrb[7].mxu0  ;;  %v673_v19 = vpop.f32.mrb[7].mxu1 }
  0xed   :  { %1789 = vpow2.f32 %v1181_v2  ;;  %v1051_v20 = vsub.f32 0.0, %v2237_v11  ;;  %v1083_v21 = vsub.f32 0.0, %v2240_v12  ;;  %v2251_v31 = vadd.f32 %v1711_v14, %v2196_v36 }
  0xee   :  { %1791 = vpow2.f32 %v1113_v5  ;;  %v1123_v22 = vmul.f32 1.442695, %v1053_v15  ;;  %v1187_v23 = vmul.f32 1.442695, %v1085_v16  ;;  %v1054_v24 = vsub.f32 0.0, %v2245_v17 }
  0xef   :  { %1793 = vpow2.f32 %v1177_v10  ;;  %v1119_v25 = vmul.f32 1.442695, %v1051_v20  ;;  %v1183_v26 = vmul.f32 1.442695, %v1083_v21  ;;  %v2254_v37 = vadd.f32 %v2196_v36, %v545_v18 }
  0xf0   :  { %1795 = vpow2.f32 %v1123_v22  ;;  %v1125_v27 = vmul.f32 1.442695, %v1054_v24  ;;  %v2257_v46 = vadd.f32 %v2196_v36, %v673_v19  ;;  %v1086_v57 = vsub.f32 0.0, %v2251_v31 }
  0xf1   :  { %1797 = vpow2.f32 %v1187_v23  ;;  %v1682_v28 = vpop.f32.mrb[8].mxu0  ;;  %v1714_v29 = vpop.f32.mrb[8].mxu1  ;;  %v1052_v61 = vsub.f32 0.0, %v2254_v37 }
  0xf2   :  { %v1780_v30 = vpop.eup %1779  ;;  %1799 = vpow2.f32 %v1119_v25  ;;  %v558_v32 = vpop.f32.mrb[9].mxu0  ;;  %v2261_v58 = vadd.f32 %v1682_v28, %v2196_v36  ;;  %v2265_v62 = vadd.f32 %v1714_v29, %v2196_v36  ;;  %v1084_v1 = vsub.f32 0.0, %v2257_v46 }
  0xf3   :  { %v686_v33 = vpop.f32.mrb[9].mxu1  ;;  %v1782_v34 = vpop.eup %1781  ;;  %v1241_v35 = vadd.f32 1.0, %v1780_v30  ;;  %1801 = vpow2.f32 %v1183_v26  ;;  %v2269_v4 = vadd.f32 %v2196_v36, %v558_v32  ;;  %v1189_v13 = vmul.f32 1.442695, %v1086_v57 }
  0xf4   :  { %v1683_v38 = vpop.f32.mrb[10].mxu0  ;;  %v1715_v41 = vpop.f32.mrb[10].mxu1  ;;  %v1273_v45 = vadd.f32 1.0, %v1782_v34  ;;  %1803 = vpow2.f32 %v1125_v27  ;;  %v1057_v14 = vsub.f32 0.0, %v2261_v58  ;;  %v1121_v20 = vmul.f32 1.442695, %v1052_v61 }
  0xf5   :  { %v1784_v42 = vpop.eup %1783  ;;  %v561_v47 = vpop.f32.mrb[11].mxu0  ;;  %1805 = vrcp.f32 %v1241_v35  ;;  %v1089_v21 = vsub.f32 0.0, %v2265_v62  ;;  %v1185_v26 = vmul.f32 1.442695, %v1084_v1  ;;  %v2282_v27 = vadd.f32 %v2196_v36, %v686_v33 }
  0xf6   :  { %v1786_v48 = vpop.eup %1785  ;;  %v1239_v51 = vadd.f32 1.0, %v1784_v42  ;;  %v689_v52 = vpop.f32.mrb[11].mxu1  ;;  %1807 = vrcp.f32 %v1273_v45  ;;  %v1055_v34 = vsub.f32 0.0, %v2269_v4  ;;  %v2290_v35 = vadd.f32 %v1683_v38, %v2196_v36 }
  0xf7   :  { %v1788_v53 = vpop.eup %1787  ;;  %v1271_v54 = vadd.f32 1.0, %v1786_v48  ;;  %v1131_v48 = vmul.f32 1.442695, %v1057_v14  ;;  %v2296_v57 = vadd.f32 %v2196_v36, %v561_v47  ;;  %v1087_v38 = vsub.f32 0.0, %v2282_v27 }
  0xf8   :  { %v1790_v59 = vpop.eup %1789  ;;  %1809 = vrcp.f32 %v1239_v51  ;;  %v1242_v60 = vadd.f32 1.0, %v1788_v53  ;;  %v2293_v51 = vadd.f32 %v1715_v41, %v2196_v36  ;;  %v2301_v61 = vadd.f32 %v2196_v36, %v689_v52 }
  0xf9   :  { %v1792_v63 = vpop.eup %1791  ;;  %1811 = vrcp.f32 %v1271_v54  ;;  %v1274_v0 = vadd.f32 1.0, %v1790_v59  ;;  %v1686_v5 = vpop.f32.mrb[12].mxu0  ;;  %v1195_v54 = vmul.f32 1.442695, %v1089_v21 }
  0xfa   :  { %v1794_v2 = vpop.eup %1793  ;;  %1813 = vrcp.f32 %v1242_v60  ;;  %v1240_v3 = vadd.f32 1.0, %v1792_v63  ;;  %v1718_v8 = vpop.f32.mrb[12].mxu1  ;;  %v2306_v1 = vadd.f32 %v1686_v5, %v2196_v36 }
  0xfb   :  { %v1796_v9 = vpop.eup %1795  ;;  %1815 = vrcp.f32 %v1274_v0  ;;  %v1272_v10 = vadd.f32 1.0, %v1794_v2  ;;  %v2272_v15 = vpop.f32.mrb[13].mxu0  ;;  %v1058_v0 = vsub.f32 0.0, %v2290_v35 }
  0xfc   :  { %v2274_v16 = vpop.f32.mrb[13].mxu1  ;;  %v1798_v18 = vpop.eup %1797  ;;  %1817 = vrcp.f32 %v1240_v3  ;;  %v1245_v19 = vadd.f32 1.0, %v1796_v9  ;;  %v2318_v3 = vadd.f32 %v1718_v8, %v2196_v36 }
  0xfd   :  { %v2277_v22 = vpop.f32.mrb[14].mxu0  ;;  %v2279_v23 = vpop.f32.mrb[14].mxu1  ;;  %1819 = vrcp.f32 %v1272_v10  ;;  %v1277_v25 = vadd.f32 1.0, %v1798_v18  ;;  %v1127_v18 = vmul.f32 1.442695, %v1055_v34 }
  0xfe   :  { %v1800_v24 = vpop.eup %1799  ;;  %v2284_v28 = vpop.f32.mrb[15].mxu0  ;;  %1821 = vrcp.f32 %v1245_v19  ;;  %v1133_v34 = vmul.f32 1.442695, %v1058_v0 }
  0xff   :  { %v2286_v29 = vpop.f32.mrb[15].mxu1  ;;  %v1802_v30 = vpop.eup %1801  ;;  %v1243_v32 = vadd.f32 1.0, %v1800_v24  ;;  %1823 = vrcp.f32 %v1277_v25  ;;  %v1191_v24 = vmul.f32 1.442695, %v1087_v38  ;;  %v1088_v25 = vsub.f32 0.0, %v2301_v61 }
 0x100   :  { %v1804_v42 = vpop.eup %1803  ;;  %v1275_v45 = vadd.f32 1.0, %v1802_v30 }
 0x101   :  { %v1806_v33 = vpop.eup %1805  ;;  %1825 = vrcp.f32 %v1243_v32  ;;  %v1246_v53 = vadd.f32 1.0, %v1804_v42  ;;  %v2308_v47 = vpop.f32.mrb[16].mxu0  ;;  %v1061_v42 = vsub.f32 0.0, %v2306_v1 }
 0x102   :  { %v1808_v59 = vpop.eup %1807  ;;  %v1433_v60 = vmul.f32 %v1806_v33, %v2199_v39  ;;  %1827 = vrcp.f32 %v1275_v45  ;;  %v2310_v2 = vpop.f32.mrb[16].mxu1  ;;  %v1093_v33 = vsub.f32 0.0, %v2318_v3 }
 0x103   :  { %v1810_v63 = vpop.eup %1809  ;;  %v1465_v41 = vmul.f32 %v1808_v59, %v2202_v40  ;;  %1829 = vrcp.f32 %v1246_v53  ;;  %v1090_v40 = vsub.f32 0.0, %v2293_v51  ;;  %v2320_v9 = vpop.f32.mrb[17].mxu0 }
 0x104   :  { %v1812_v39 = vpop.eup %1811  ;;  %1497 = vst [vmem:[%s2820_s3 + $0x10] sm:$0xff] %v1433_v60  ;;  %v1431_v52 = vmul.f32 %v1810_v63, %v2205_v43  ;;  %1831 = vpow2.f32 %v1189_v13  ;;  %v2322_v5 = vpop.f32.mrb[17].mxu1  ;;  %v1056_v43 = vsub.f32 0.0, %v2296_v57 }
 0x105   :  { %v1814_v10 = vpop.eup %1813  ;;  %1529 = vst [vmem:[%s2820_s3 + $0x110] sm:$0xff] %v1465_v41  ;;  %v1463_v14 = vmul.f32 %v1812_v39, %v2208_v44  ;;  %1833 = vpow2.f32 %v1121_v20  ;;  %v2329_v13 = vpop.f32.mrb[18].mxu0  ;;  %v1197_v45 = vmul.f32 1.442695, %v1090_v40  ;;  %v1203_v39 = vmul.f32 1.442695, %v1093_v33 }
 0x106   :  { %v2331_v19 = vpop.f32.mrb[18].mxu1  ;;  %v1816_v8 = vpop.eup %1815  ;;  %1495 = vst [vmem:[%s2820_s3] sm:$0xff] %v1431_v52  ;;  %v1434_v21 = vmul.f32 %v1814_v10, %v2213_v49  ;;  %1835 = vpow2.f32 %v1185_v26  ;;  %v2417_v33 = vadd.f32 %v2196_v36, %v2284_v28 }
 0x107   :  { %v2338_v44 = vpop.f32.mrb[19].mxu0  ;;  %v2340_v20 = vpop.f32.mrb[19].mxu1  ;;  %1527 = vst [vmem:[%s2820_s3 + $0x100] sm:$0xff] %v1463_v14  ;;  %v1466_v32 = vmul.f32 %v1816_v8, %v2216_v50  ;;  %1837 = vpow2.f32 %v1131_v48  ;;  %v1129_v48 = vmul.f32 1.442695, %v1056_v43  ;;  %v2390_v8 = vadd.f32 %v2196_v36, %v2272_v15 }
 0x108   :  { %v1818_v30 = vpop.eup %1817  ;;  %1498 = vst [vmem:[%s2820_s3 + $0x18] sm:$0xff] %v1434_v21  ;;  %1839 = vpow2.f32 %v1195_v54  ;;  %v1193_v54 = vmul.f32 1.442695, %v1088_v25 }
 0x109   :  { %v1820_v49 = vpop.eup %1819  ;;  %v1432_v26 = vmul.f32 %v1818_v30, %v2221_v55  ;;  %1530 = vst [vmem:[%s2820_s3 + $0x118] sm:$0xff] %v1466_v32  ;;  %1841 = vpow2.f32 %v1127_v18  ;;  %v2364_v63 = vpop.f32.mrb[20].mxu0  ;;  %v2401_v30 = vadd.f32 %v2196_v36, %v2274_v16  ;;  %v2408_v32 = vadd.f32 %v2277_v22, %v2196_v36 }
 0x10a   :  { %v1822_v53 = vpop.eup %1821  ;;  %v1464_v50 = vmul.f32 %v1820_v49, %v2224_v56  ;;  %1843 = vpow2.f32 %v1191_v24  ;;  %v1139_v56 = vmul.f32 1.442695, %v1061_v42  ;;  %v2366_v41 = vpop.f32.mrb[20].mxu1  ;;  %v2412_v49 = vadd.f32 %v2279_v23, %v2196_v36 }
 0x10b   :  { %v1824_v59 = vpop.eup %1823  ;;  %1496 = vst [vmem:[%s2820_s3 + $0x8] sm:$0xff] %v1432_v26  ;;  %v1437_v55 = vmul.f32 %v1822_v53, %v2231_v6  ;;  %1845 = vpow2.f32 %v1133_v34  ;;  %v2372_v52 = vpop.f32.mrb[21].mxu0 }
 0x10c   :  { %v1826_v60 = vpop.eup %1825  ;;  %1528 = vst [vmem:[%s2820_s3 + $0x108] sm:$0xff] %v1464_v50  ;;  %v1469_v38 = vmul.f32 %v1824_v59, %v2234_v7  ;;  %1847 = vpow2.f32 %v1197_v45  ;;  %v2374_v40 = vpop.f32.mrb[21].mxu1  ;;  %v1059_v45 = vsub.f32 0.0, %v2390_v8  ;;  %v1091_v50 = vsub.f32 0.0, %v2401_v30 }
 0x10d   :  { %v1828_v0 = vpop.eup %1827  ;;  %1501 = vst [vmem:[%s2820_s3 + $0x30] sm:$0xff] %v1437_v55  ;;  %v1435_v6 = vmul.f32 %v1826_v60, %v2237_v11  ;;  %1849 = vpow2.f32 %v1129_v48  ;;  %v2380_v14 = vpop.f32.mrb[22].mxu0 }
 0x10e   :  { %v1830_v7 = vpop.eup %1829  ;;  %1533 = vst [vmem:[%s2820_s3 + $0x130] sm:$0xff] %v1469_v38  ;;  %v1467_v10 = vmul.f32 %v1828_v0, %v2240_v12  ;;  %v2382_v18 = vpop.f32.mrb[22].mxu1  ;;  %1851 = vpow2.f32 %v1193_v54  ;;  %v1062_v54 = vsub.f32 0.0, %v2408_v32  ;;  %v1094_v0 = vsub.f32 0.0, %v2412_v49 }
 0x10f   :  { %v1832_v43 = vpop.eup %1831  ;;  %1499 = vst [vmem:[%s2820_s3 + $0x20] sm:$0xff] %v1435_v6  ;;  %v1438_v11 = vmul.f32 %v1830_v7, %v2245_v17  ;;  %v2392_v21 = vpop.f32.mrb[23].mxu0  ;;  %1853 = vpow2.f32 %v1139_v56 }
 0x110   :  { %v2394_v12 = vpop.f32.mrb[23].mxu1  ;;  %v1834_v24 = vpop.eup %1833  ;;  %1531 = vst [vmem:[%s2820_s3 + $0x120] sm:$0xff] %v1467_v10  ;;  %v1278_v25 = vadd.f32 1.0, %v1832_v43  ;;  %1855 = vpow2.f32 %v1203_v39  ;;  %v1135_v43 = vmul.f32 1.442695, %v1059_v45  ;;  %v2445_v45 = vadd.f32 %v2308_v47, %v2196_v36 }
 0x111   :  { %v1836_v17 = vpop.eup %1835  ;;  %1502 = vst [vmem:[%s2820_s3 + $0x38] sm:$0xff] %v1438_v11  ;;  %v1244_v15 = vadd.f32 1.0, %v1834_v24  ;;  %v2420_v48 = vpop.f32.mrb[24].mxu0  ;;  %v1060_v11 = vsub.f32 0.0, %v2417_v33 }
 0x112   :  { %v1838_v34 = vpop.eup %1837  ;;  %1857 = vrcp.f32 %v1278_v25  ;;  %v1276_v42 = vadd.f32 1.0, %v1836_v17  ;;  %v2422_v59 = vpop.f32.mrb[24].mxu1 }
 0x113   :  { %v1840_v16 = vpop.eup %1839  ;;  %1859 = vrcp.f32 %v1244_v15  ;;  %v1249_v26 = vadd.f32 1.0, %v1838_v34  ;;  %v2425_v60 = vpop.f32.mrb[25].mxu0  ;;  %v1199_v34 = vmul.f32 1.442695, %v1091_v50 }
 0x114   :  { %v1842_v53 = vpop.eup %1841  ;;  %1861 = vrcp.f32 %v1276_v42  ;;  %v1281_v22 = vadd.f32 1.0, %v1840_v16  ;;  %v2427_v38 = vpop.f32.mrb[25].mxu1  ;;  %v2441_v42 = vadd.f32 %v2196_v36, %v2286_v29 }
 0x115   :  { %v1844_v23 = vpop.eup %1843  ;;  %1863 = vrcp.f32 %v1249_v26  ;;  %v1247_v55 = vadd.f32 1.0, %v1842_v53  ;;  %v2430_v6 = vpop.f32.mrb[26].mxu0  ;;  %v1141_v53 = vmul.f32 1.442695, %v1062_v54 }
 0x116   :  { %v1846_v28 = vpop.eup %1845  ;;  %1865 = vrcp.f32 %v1281_v22  ;;  %v1279_v56 = vadd.f32 1.0, %v1844_v23  ;;  %v2432_v39 = vpop.f32.mrb[26].mxu1 }
 0x117   :  { %v1848_v7 = vpop.eup %1847  ;;  %1867 = vrcp.f32 %v1247_v55  ;;  %v1250_v10 = vadd.f32 1.0, %v1846_v28  ;;  %v2435_v24 = vpop.f32.mrb[27].mxu0  ;;  %v1205_v55 = vmul.f32 1.442695, %v1094_v0  ;;  %v2449_v28 = vadd.f32 %v2310_v2, %v2196_v36 }
 0x118   :  { %v2437_v25 = vpop.f32.mrb[27].mxu1  ;;  %v1850_v17 = vpop.eup %1849  ;;  %1869 = vrcp.f32 %v1279_v56  ;;  %v1282_v15 = vadd.f32 1.0, %v1848_v7  ;;  %v1137_v56 = vmul.f32 1.442695, %v1060_v11  ;;  %v2453_v7 = vadd.f32 %v2196_v36, %v2320_v9 }
 0x119   :  { %v1852_v16 = vpop.eup %1851  ;;  %1871 = vrcp.f32 %v1250_v10  ;;  %v1248_v26 = vadd.f32 1.0, %v1850_v17  ;;  %v1092_v10 = vsub.f32 0.0, %v2441_v42  ;;  %v2458_v0 = vadd.f32 %v2196_v36, %v2322_v5  ;;  %v2460_v17 = vpop.f32.mrb[28].mxu0 }
 0x11a   :  { %v1854_v22 = vpop.eup %1853  ;;  %1873 = vrcp.f32 %v1282_v15  ;;  %v1280_v23 = vadd.f32 1.0, %v1852_v16  ;;  %v2462_v2 = vpop.f32.mrb[28].mxu1  ;;  %v1065_v9 = vsub.f32 0.0, %v2445_v45  ;;  %v2468_v16 = vadd.f32 %v2329_v13, %v2196_v36 }
 0x11b   :  { %v1856_v50 = vpop.eup %1855  ;;  %1875 = vrcp.f32 %v1248_v26  ;;  %v1253_v29 = vadd.f32 1.0, %v1854_v22  ;;  %v2470_v26 = vpop.f32.mrb[29].mxu0 }
 0x11c   :  { %v1858_v54 = vpop.eup %1857  ;;  %1877 = vrcp.f32 %v1280_v23  ;;  %v1285_v47 = vadd.f32 1.0, %v1856_v50  ;;  %v2472_v22 = vpop.f32.mrb[29].mxu1  ;;  %v1097_v50 = vsub.f32 0.0, %v2449_v28 }
 0x11d   :  { %v1860_v15 = vpop.eup %1859  ;;  %v1470_v11 = vmul.f32 %v1858_v54, %v2251_v31  ;;  %1879 = vrcp.f32 %v1253_v29  ;;  %2821 = vst [vmem:[#allocation3_spill] sm:$0xff] %v2472_v22  ;;  %v2478_v31 = vadd.f32 %v2331_v19, %v2196_v36  ;;  %v2480_v29 = vpop.f32.mrb[30].mxu0 }
 0x11e   :  { %v1862_v5 = vpop.eup %1861  ;;  %v1436_v23 = vmul.f32 %v1860_v15, %v2254_v37  ;;  %1881 = vrcp.f32 %v1285_v47  ;;  %2822 = vst [vmem:[#allocation4_spill] sm:$0xff] %v2480_v29  ;;  %v2482_v54 = vpop.f32.mrb[30].mxu1  ;;  %v1063_v37 = vsub.f32 0.0, %v2453_v7  ;;  %v2491_v47 = vadd.f32 %v2196_v36, %v2338_v44 }
 0x11f   :  { %2823 = vst [vmem:[#allocation5_spill] sm:$0xff] %v2482_v54  ;;  %v1864_v13 = vpop.eup %1863  ;;  %1534 = vst [vmem:[%s2820_s3 + $0x138] sm:$0xff] %v1470_v11  ;;  %v1468_v22 = vmul.f32 %v1862_v5, %v2257_v46  ;;  %1883 = vpow2.f32 %v1135_v43  ;;  %v2493_v19 = vpop.f32.mrb[31].mxu0  ;;  %v1201_v46 = vmul.f32 1.442695, %v1092_v10  ;;  %v1095_v43 = vsub.f32 0.0, %v2458_v0 }
 0x120   :  { %2824 = vst [vmem:[#allocation6_spill] sm:$0xff] %v2493_v19  ;;  %v2495_v15 = vpop.f32.mrb[31].mxu1  ;;  %v1866_v29 = vpop.eup %1865  ;;  %1500 = vst [vmem:[%s2820_s3 + $0x28] sm:$0xff] %v1436_v23  ;;  %v1441_v11 = vmul.f32 %v1864_v13, %v2261_v58  ;;  %1885 = vpow2.f32 %v1199_v34  ;;  %v1066_v19 = vsub.f32 0.0, %v2468_v16  ;;  %v1211_v34 = vmul.f32 1.442695, %v1097_v50 }
 0x121   :  { %2825 = vst [vmem:[#allocation7_spill] sm:$0xff] %v2495_v15  ;;  %v1868_v5 = vpop.eup %1867  ;;  %1532 = vst [vmem:[%s2820_s3 + $0x128] sm:$0xff] %v1468_v22  ;;  %v1473_v44 = vmul.f32 %v1866_v29, %v2265_v62  ;;  %1887 = vpow2.f32 %v1141_v53  ;;  %v1147_v15 = vmul.f32 1.442695, %v1065_v9  ;;  %v1098_v10 = vsub.f32 0.0, %v2478_v31 }
 0x122   :  { %v1870_v54 = vpop.eup %1869  ;;  %1505 = vst [vmem:[%s2820_s3 + $0x50] sm:$0xff] %v1441_v11  ;;  %v1439_v58 = vmul.f32 %v1868_v5, %v2269_v4  ;;  %1889 = vpow2.f32 %v1205_v55  ;;  %v1143_v53 = vmul.f32 1.442695, %v1063_v37  ;;  %v1064_v9 = vsub.f32 0.0, %v2491_v47 }
 0x123   :  { %v1872_v23 = vpop.eup %1871  ;;  %1537 = vst [vmem:[%s2820_s3 + $0x150] sm:$0xff] %v1473_v44  ;;  %v1471_v62 = vmul.f32 %v1870_v54, %v2282_v27  ;;  %1891 = vpow2.f32 %v1137_v56  ;;  %v1207_v55 = vmul.f32 1.442695, %v1095_v43  ;;  %v1149_v56 = vmul.f32 1.442695, %v1066_v19 }
 0x124   :  { %v1874_v22 = vpop.eup %1873  ;;  %1503 = vst [vmem:[%s2820_s3 + $0x40] sm:$0xff] %v1439_v58  ;;  %v1442_v4 = vmul.f32 %v1872_v23, %v2290_v35  ;;  %1893 = vpow2.f32 %v1201_v46  ;;  %v1213_v35 = vmul.f32 1.442695, %v1098_v10 }
 0x125   :  { %v1876_v50 = vpop.eup %1875  ;;  %1535 = vst [vmem:[%s2820_s3 + $0x140] sm:$0xff] %v1471_v62  ;;  %v1474_v27 = vmul.f32 %v1874_v22, %v2293_v51  ;;  %1895 = vpow2.f32 %v1147_v15  ;;  %v1145_v51 = vmul.f32 1.442695, %v1064_v9  ;;  %v2566_v62 = vadd.f32 %v2196_v36, %v2374_v40 }
 0x126   :  { %v1878_v29 = vpop.eup %1877  ;;  %1506 = vst [vmem:[%s2820_s3 + $0x58] sm:$0xff] %v1442_v4  ;;  %v1440_v54 = vmul.f32 %v1876_v50, %v2296_v57  ;;  %1897 = vpow2.f32 %v1211_v34  ;;  %v2561_v34 = vadd.f32 %v2196_v36, %v2372_v52 }
 0x127   :  { %v1880_v13 = vpop.eup %1879  ;;  %1538 = vst [vmem:[%s2820_s3 + $0x158] sm:$0xff] %v1474_v27  ;;  %v1472_v37 = vmul.f32 %v1878_v29, %v2301_v61  ;;  %1899 = vpow2.f32 %v1143_v53  ;;  %v2543_v61 = vadd.f32 %v2196_v36, %v2340_v20  ;;  %v2557_v20 = vadd.f32 %v2366_v41, %v2196_v36 }
 0x128   :  { %v1882_v15 = vpop.eup %1881  ;;  %1504 = vst [vmem:[%s2820_s3 + $0x48] sm:$0xff] %v1440_v54  ;;  %v1445_v19 = vmul.f32 %v1880_v13, %v2306_v1  ;;  %1901 = vpow2.f32 %v1207_v55  ;;  %v2550_v1 = vadd.f32 %v2364_v63, %v2196_v36  ;;  %v1067_v27 = vsub.f32 0.0, %v2561_v34 }
 0x129   :  { %v1884_v57 = vpop.eup %1883  ;;  %1536 = vst [vmem:[%s2820_s3 + $0x148] sm:$0xff] %v1472_v37  ;;  %v1477_v11 = vmul.f32 %v1882_v15, %v2318_v3  ;;  %1903 = vpow2.f32 %v1149_v56  ;;  %v1096_v23 = vsub.f32 0.0, %v2543_v61  ;;  %v1101_v52 = vsub.f32 0.0, %v2557_v20 }
 0x12a   :  { %v1886_v46 = vpop.eup %1885  ;;  %1509 = vst [vmem:[%s2820_s3 + $0x70] sm:$0xff] %v1445_v19  ;;  %v1251_v43 = vadd.f32 1.0, %v1884_v57  ;;  %1905 = vpow2.f32 %v1213_v35  ;;  %v1069_v9 = vsub.f32 0.0, %v2550_v1  ;;  %v1099_v54 = vsub.f32 0.0, %v2566_v62 }
 0x12b   :  { %v1888_v5 = vpop.eup %1887  ;;  %1541 = vst [vmem:[%s2820_s3 + $0x170] sm:$0xff] %v1477_v11  ;;  %v1283_v3 = vadd.f32 1.0, %v1886_v46  ;;  %1907 = vpow2.f32 %v1145_v51  ;;  %v1209_v40 = vmul.f32 1.442695, %v1096_v23  ;;  %v2574_v51 = vadd.f32 %v2380_v14, %v2196_v36 }
 0x12c   :  { %v1890_v44 = vpop.eup %1889  ;;  %1909 = vrcp.f32 %v1251_v43  ;;  %v1254_v58 = vadd.f32 1.0, %v1888_v5  ;;  %v1155_v37 = vmul.f32 1.442695, %v1069_v9  ;;  %v1219_v57 = vmul.f32 1.442695, %v1101_v52 }
 0x12d   :  { %v1892_v63 = vpop.eup %1891  ;;  %1911 = vrcp.f32 %v1283_v3  ;;  %v1286_v10 = vadd.f32 1.0, %v1890_v44  ;;  %v2578_v11 = vadd.f32 %v2382_v18, %v2196_v36  ;;  %v1151_v5 = vmul.f32 1.442695, %v1067_v27 }
 0x12e   :  { %v1894_v53 = vpop.eup %1893  ;;  %1913 = vrcp.f32 %v1254_v58  ;;  %v1252_v41 = vadd.f32 1.0, %v1892_v63  ;;  %v2582_v3 = vadd.f32 %v2196_v36, %v2392_v21  ;;  %v1215_v58 = vmul.f32 1.442695, %v1099_v54 }
 0x12f   :  { %v1896_v22 = vpop.eup %1895  ;;  %1915 = vrcp.f32 %v1286_v10  ;;  %v1284_v4 = vadd.f32 1.0, %v1894_v53  ;;  %v2586_v63 = vadd.f32 %v2196_v36, %v2394_v12  ;;  %v1070_v23 = vsub.f32 0.0, %v2574_v51 }
 0x130   :  { %v1898_v55 = vpop.eup %1897  ;;  %1917 = vrcp.f32 %v1252_v41  ;;  %v1257_v50 = vadd.f32 1.0, %v1896_v22  ;;  %v2591_v53 = vadd.f32 %v2420_v48, %v2196_v36  ;;  %v1102_v9 = vsub.f32 0.0, %v2578_v11 }
 0x131   :  { %v1900_v56 = vpop.eup %1899  ;;  %1919 = vrcp.f32 %v1284_v4  ;;  %v1289_v29 = vadd.f32 1.0, %v1898_v55  ;;  %v2597_v22 = vadd.f32 %v2422_v59, %v2196_v36  ;;  %v1068_v52 = vsub.f32 0.0, %v2582_v3 }
 0x132   :  { %v1902_v35 = vpop.eup %1901  ;;  %1921 = vrcp.f32 %v1257_v50  ;;  %v1255_v13 = vadd.f32 1.0, %v1900_v56  ;;  %v2603_v48 = vadd.f32 %v2196_v36, %v2425_v60  ;;  %v1100_v59 = vsub.f32 0.0, %v2586_v63 }
 0x133   :  { %v1904_v15 = vpop.eup %1903  ;;  %1923 = vrcp.f32 %v1289_v29  ;;  %v1287_v19 = vadd.f32 1.0, %v1902_v35  ;;  %v1157_v27 = vmul.f32 1.442695, %v1070_v23  ;;  %v1073_v56 = vsub.f32 0.0, %v2591_v53 }
 0x134   :  { %v1906_v46 = vpop.eup %1905  ;;  %1925 = vrcp.f32 %v1255_v13  ;;  %v1258_v43 = vadd.f32 1.0, %v1904_v15  ;;  %v1153_v35 = vmul.f32 1.442695, %v1068_v52  ;;  %v1071_v13 = vsub.f32 0.0, %v2603_v48 }
 0x135   :  { %v1908_v44 = vpop.eup %1907  ;;  %1927 = vrcp.f32 %v1287_v19  ;;  %v1290_v14 = vadd.f32 1.0, %v1906_v46  ;;  %v1217_v15 = vmul.f32 1.442695, %v1100_v59  ;;  %v1163_v46 = vmul.f32 1.442695, %v1073_v56 }
 0x136   :  { %v1910_v10 = vpop.eup %1909  ;;  %1929 = vrcp.f32 %v1258_v43  ;;  %v1256_v18 = vadd.f32 1.0, %v1908_v44 }
 0x137   :  { %v1912_v41 = vpop.eup %1911  ;;  %v1443_v21 = vmul.f32 %v1910_v10, %v2390_v8  ;;  %1931 = vrcp.f32 %v1290_v14 }
 0x138   :  { %v1914_v12 = vpop.eup %1913  ;;  %v1475_v4 = vmul.f32 %v1912_v41, %v2401_v30  ;;  %1933 = vrcp.f32 %v1256_v18  ;;  %v2612_v30 = vadd.f32 %v2196_v36, %v2427_v38  ;;  %v1221_v38 = vmul.f32 1.442695, %v1102_v9 }
 0x139   :  { %v1916_v55 = vpop.eup %1915  ;;  %1507 = vst [vmem:[%s2820_s3 + $0x60] sm:$0xff] %v1443_v21  ;;  %v1446_v8 = vmul.f32 %v1914_v12, %v2408_v32  ;;  %1935 = vpow2.f32 %v1209_v40  ;;  %v1105_v40 = vsub.f32 0.0, %v2597_v22 }
 0x13a   :  { %v1918_v50 = vpop.eup %1917  ;;  %1539 = vst [vmem:[%s2820_s3 + $0x160] sm:$0xff] %v1475_v4  ;;  %v1478_v60 = vmul.f32 %v1916_v55, %v2412_v49  ;;  %1937 = vpow2.f32 %v1155_v37  ;;  %v1103_v19 = vsub.f32 0.0, %v2612_v30 }
 0x13b   :  { %v1920_v29 = vpop.eup %1919  ;;  %1510 = vst [vmem:[%s2820_s3 + $0x78] sm:$0xff] %v1446_v8  ;;  %v1444_v32 = vmul.f32 %v1918_v50, %v2417_v33  ;;  %1939 = vpow2.f32 %v1219_v57 }
 0x13c   :  { %v1922_v54 = vpop.eup %1921  ;;  %1542 = vst [vmem:[%s2820_s3 + $0x178] sm:$0xff] %v1478_v60  ;;  %v1476_v49 = vmul.f32 %v1920_v29, %v2441_v42  ;;  %1941 = vpow2.f32 %v1151_v5  ;;  %v1227_v5 = vmul.f32 1.442695, %v1105_v40 }
 0x13d   :  { %v1924_v37 = vpop.eup %1923  ;;  %1508 = vst [vmem:[%s2820_s3 + $0x68] sm:$0xff] %v1444_v32  ;;  %v1449_v33 = vmul.f32 %v1922_v54, %v2445_v45  ;;  %1943 = vpow2.f32 %v1215_v58 }
 0x13e   :  { %v1926_v57 = vpop.eup %1925  ;;  %1540 = vst [vmem:[%s2820_s3 + $0x168] sm:$0xff] %v1476_v49  ;;  %v1481_v42 = vmul.f32 %v1924_v37, %v2449_v28  ;;  %1945 = vpow2.f32 %v1157_v27  ;;  %v1159_v28 = vmul.f32 1.442695, %v1071_v13 }
 0x13f   :  { %v1928_v43 = vpop.eup %1927  ;;  %1513 = vst [vmem:[%s2820_s3 + $0x90] sm:$0xff] %v1449_v33  ;;  %v1447_v45 = vmul.f32 %v1926_v57, %v2453_v7  ;;  %1947 = vpow2.f32 %v1221_v38  ;;  %v1223_v7 = vmul.f32 1.442695, %v1103_v19 }
 0x140   :  { %v1930_v44 = vpop.eup %1929  ;;  %1545 = vst [vmem:[%s2820_s3 + $0x190] sm:$0xff] %v1481_v42  ;;  %v1479_v14 = vmul.f32 %v1928_v43, %v2458_v0  ;;  %1949 = vpow2.f32 %v1153_v35 }
 0x141   :  { %v1932_v58 = vpop.eup %1931  ;;  %1511 = vst [vmem:[%s2820_s3 + $0x80] sm:$0xff] %v1447_v45  ;;  %v1450_v10 = vmul.f32 %v1930_v44, %v2468_v16  ;;  %1951 = vpow2.f32 %v1217_v15  ;;  %v2660_v16 = vadd.f32 %v2430_v6, %v2196_v36  ;;  %v2035_v6 = vld [vmem:[%s2819_s2] ss:$0 sm:$0xff] }
 0x142   :  { %v1934_v18 = vpop.eup %1933  ;;  %1543 = vst [vmem:[%s2820_s3 + $0x180] sm:$0xff] %v1479_v14  ;;  %v1482_v23 = vmul.f32 %v1932_v58, %v2478_v31  ;;  %1953 = vpow2.f32 %v1163_v46  ;;  %v2667_v31 = vadd.f32 %v2432_v39, %v2196_v36  ;;  %v2676_v4 = vadd.f32 %v2035_v6, %v2435_v24  ;;  %v2827_v58 = vld [vmem:[#allocation4_spill] sm:$0xff] }
 0x143   :  { %v1936_v0 = vpop.eup %1935  ;;  %1514 = vst [vmem:[%s2820_s3 + $0x98] sm:$0xff] %v1450_v10  ;;  %v1448_v41 = vmul.f32 %v1934_v18, %v2491_v47  ;;  %1955 = vpow2.f32 %v1227_v5  ;;  %v2679_v36 = vadd.f32 %v2035_v6, %v2437_v25  ;;  %v1074_v59 = vsub.f32 0.0, %v2660_v16 }
 0x144   :  { %v1938_v21 = vpop.eup %1937  ;;  %1546 = vst [vmem:[%s2820_s3 + $0x198] sm:$0xff] %v1482_v23  ;;  %v1288_v9 = vadd.f32 1.0, %v1936_v0  ;;  %1957 = vpow2.f32 %v1159_v28  ;;  %v1106_v27 = vsub.f32 0.0, %v2667_v31  ;;  %v1072_v29 = vsub.f32 0.0, %v2676_v4  ;;  %v2828_v23 = vld [vmem:[#allocation5_spill] sm:$0xff] }
 0x145   :  { %v1940_v12 = vpop.eup %1939  ;;  %1512 = vst [vmem:[%s2820_s3 + $0x88] sm:$0xff] %v1448_v41  ;;  %v1261_v47 = vadd.f32 1.0, %v1938_v21  ;;  %1959 = vpow2.f32 %v1223_v7  ;;  %v1104_v25 = vsub.f32 0.0, %v2679_v36  ;;  %v1165_v49 = vmul.f32 1.442695, %v1074_v59 }
 0x146   :  { %v1942_v52 = vpop.eup %1941  ;;  %1961 = vrcp.f32 %v1288_v9  ;;  %v1293_v55 = vadd.f32 1.0, %v1940_v12  ;;  %v2686_v35 = vadd.f32 %v2035_v6, %v2460_v17  ;;  %v1229_v33 = vmul.f32 1.442695, %v1106_v27  ;;  %v2826_v17 = vld [vmem:[#allocation3_spill] sm:$0xff]  ;;  %v2829_v12 = vld [vmem:[#allocation6_spill] sm:$0xff] }
 0x147   :  { %v1944_v39 = vpop.eup %1943  ;;  %1963 = vrcp.f32 %v1261_v47  ;;  %v1259_v8 = vadd.f32 1.0, %v1942_v52  ;;  %v2689_v15 = vadd.f32 %v2035_v6, %v2462_v2  ;;  %v1161_v42 = vmul.f32 1.442695, %v1072_v29 }
 0x148   :  { %v1946_v50 = vpop.eup %1945  ;;  %1965 = vrcp.f32 %v1293_v55  ;;  %v1291_v60 = vadd.f32 1.0, %v1944_v39  ;;  %v2692_v46 = vadd.f32 %v2035_v6, %v2470_v26  ;;  %v1225_v5 = vmul.f32 1.442695, %v1104_v25 }
 0x149   :  { %v1948_v56 = vpop.eup %1947  ;;  %1967 = vrcp.f32 %v1259_v8  ;;  %v1262_v24 = vadd.f32 1.0, %v1946_v50  ;;  %v2695_v44 = vadd.f32 %v2035_v6, %v2826_v17  ;;  %v1077_v2 = vsub.f32 0.0, %v2686_v35  ;;  %v2830_v8 = vld [vmem:[#allocation7_spill] sm:$0xff] }
 0x14a   :  { %v1950_v32 = vpop.eup %1949  ;;  %1969 = vrcp.f32 %v1291_v60  ;;  %v1294_v38 = vadd.f32 1.0, %v1948_v56  ;;  %v2699_v10 = vadd.f32 %v2035_v6, %v2827_v58  ;;  %v1109_v26 = vsub.f32 0.0, %v2689_v15 }
 0x14b   :  { %v1952_v40 = vpop.eup %1951  ;;  %1971 = vrcp.f32 %v1262_v24  ;;  %v1260_v54 = vadd.f32 1.0, %v1950_v32  ;;  %v2703_v0 = vadd.f32 %v2035_v6, %v2828_v23  ;;  %v1075_v9 = vsub.f32 0.0, %v2692_v46 }
 0x14c   :  { %v1954_v13 = vpop.eup %1953  ;;  %1973 = vrcp.f32 %v1294_v38  ;;  %v1292_v37 = vadd.f32 1.0, %v1952_v40  ;;  %v2708_v47 = vadd.f32 %v2035_v6, %v2829_v12  ;;  %v1107_v39 = vsub.f32 0.0, %v2695_v44 }
 0x14d   :  { %v1956_v19 = vpop.eup %1955  ;;  %1975 = vrcp.f32 %v1260_v54  ;;  %v1265_v57 = vadd.f32 1.0, %v1954_v13  ;;  %v2713_v59 = vadd.f32 %v2035_v6, %v2830_v8  ;;  %v1171_v60 = vmul.f32 1.442695, %v1077_v2 }
 0x14e   :  { %v1958_v43 = vpop.eup %1957  ;;  %1977 = vrcp.f32 %v1292_v37  ;;  %v1297_v45 = vadd.f32 1.0, %v1956_v19  ;;  %v1078_v27 = vsub.f32 0.0, %v2699_v10  ;;  %v1235_v6 = vmul.f32 1.442695, %v1109_v26 }
 0x14f   :  { %v1960_v14 = vpop.eup %1959  ;;  %1979 = vrcp.f32 %v1265_v57  ;;  %v1263_v28 = vadd.f32 1.0, %v1958_v43  ;;  %v1110_v24 = vsub.f32 0.0, %v2703_v0  ;;  %v1167_v32 = vmul.f32 1.442695, %v1075_v9 }
 0x150   :  { %v1962_v7 = vpop.eup %1961  ;;  %1981 = vrcp.f32 %v1297_v45  ;;  %v1295_v18 = vadd.f32 1.0, %v1960_v14  ;;  %v1076_v38 = vsub.f32 0.0, %v2708_v47  ;;  %v1231_v40 = vmul.f32 1.442695, %v1107_v39 }
 0x151   :  { %v1964_v41 = vpop.eup %1963  ;;  %v1480_v21 = vmul.f32 %v1962_v7, %v2543_v61  ;;  %1983 = vrcp.f32 %v1263_v28  ;;  %v1108_v54 = vsub.f32 0.0, %v2713_v59  ;;  %v1173_v13 = vmul.f32 1.442695, %v1078_v27 }
 0x152   :  { %v1966_v52 = vpop.eup %1965  ;;  %v1453_v55 = vmul.f32 %v1964_v41, %v2550_v1  ;;  %1985 = vrcp.f32 %v1295_v18 }
 0x153   :  { %v1968_v50 = vpop.eup %1967  ;;  %1544 = vst [vmem:[%s2820_s3 + $0x188] sm:$0xff] %v1480_v21  ;;  %v1485_v61 = vmul.f32 %v1966_v52, %v2557_v20  ;;  %1987 = vpow2.f32 %v1165_v49 }
 0x154   :  { %v1970_v56 = vpop.eup %1969  ;;  %1517 = vst [vmem:[%s2820_s3 + $0xb0] sm:$0xff] %v1453_v55  ;;  %v1451_v1 = vmul.f32 %v1968_v50, %v2561_v34  ;;  %1989 = vpow2.f32 %v1229_v33  ;;  %v1237_v33 = vmul.f32 1.442695, %v1110_v24 }
 0x155   :  { %v1972_v29 = vpop.eup %1971  ;;  %1549 = vst [vmem:[%s2820_s3 + $0x1b0] sm:$0xff] %v1485_v61  ;;  %v1483_v20 = vmul.f32 %v1970_v56, %v2566_v62  ;;  %1991 = vpow2.f32 %v1161_v42 }
 0x156   :  { %v1974_v25 = vpop.eup %1973  ;;  %1515 = vst [vmem:[%s2820_s3 + $0xa0] sm:$0xff] %v1451_v1  ;;  %v1454_v34 = vmul.f32 %v1972_v29, %v2574_v51  ;;  %1993 = vpow2.f32 %v1225_v5 }
 0x157   :  { %v1976_v49 = vpop.eup %1975  ;;  %1547 = vst [vmem:[%s2820_s3 + $0x1a0] sm:$0xff] %v1483_v20  ;;  %v1486_v62 = vmul.f32 %v1974_v25, %v2578_v11  ;;  %1995 = vpow2.f32 %v1171_v60  ;;  %v1169_v11 = vmul.f32 1.442695, %v1076_v38 }
 0x158   :  { %v1978_v37 = vpop.eup %1977  ;;  %1518 = vst [vmem:[%s2820_s3 + $0xb8] sm:$0xff] %v1454_v34  ;;  %v1452_v51 = vmul.f32 %v1976_v49, %v2582_v3  ;;  %1997 = vpow2.f32 %v1235_v6  ;;  %v1233_v3 = vmul.f32 1.442695, %v1108_v54 }
 0x159   :  { %v1980_v19 = vpop.eup %1979  ;;  %1550 = vst [vmem:[%s2820_s3 + $0x1b8] sm:$0xff] %v1486_v62  ;;  %v1484_v57 = vmul.f32 %v1978_v37, %v2586_v63  ;;  %1999 = vpow2.f32 %v1167_v32 }
 0x15a   :  { %v1982_v42 = vpop.eup %1981  ;;  %1516 = vst [vmem:[%s2820_s3 + $0xa8] sm:$0xff] %v1452_v51  ;;  %v1457_v43 = vmul.f32 %v1980_v19, %v2591_v53  ;;  %2001 = vpow2.f32 %v1231_v40 }
 0x15b   :  { %v1984_v45 = vpop.eup %1983  ;;  %1548 = vst [vmem:[%s2820_s3 + $0x1a8] sm:$0xff] %v1484_v57  ;;  %v1489_v5 = vmul.f32 %v1982_v42, %v2597_v22  ;;  %2003 = vpow2.f32 %v1173_v13 }
 0x15c   :  { %v1986_v63 = vpop.eup %1985  ;;  %1521 = vst [vmem:[%s2820_s3 + $0xd0] sm:$0xff] %v1457_v43  ;;  %v1455_v17 = vmul.f32 %v1984_v45, %v2603_v48  ;;  %2005 = vpow2.f32 %v1237_v33 }
 0x15d   :  { %v1988_v14 = vpop.eup %1987  ;;  %1553 = vst [vmem:[%s2820_s3 + $0x1d0] sm:$0xff] %v1489_v5  ;;  %v1487_v53 = vmul.f32 %v1986_v63, %v2612_v30  ;;  %2007 = vpow2.f32 %v1169_v11 }
 0x15e   :  { %v1990_v28 = vpop.eup %1989  ;;  %1519 = vst [vmem:[%s2820_s3 + $0xc0] sm:$0xff] %v1455_v17  ;;  %v1266_v22 = vadd.f32 1.0, %v1988_v14  ;;  %2009 = vpow2.f32 %v1233_v3 }
 0x15f   :  { %v1992_v2 = vpop.eup %1991  ;;  %1551 = vst [vmem:[%s2820_s3 + $0x1c0] sm:$0xff] %v1487_v53  ;;  %v1298_v48 = vadd.f32 1.0, %v1990_v28 }
 0x160   :  { %v1994_v58 = vpop.eup %1993  ;;  %2011 = vrcp.f32 %v1266_v22  ;;  %v1264_v7 = vadd.f32 1.0, %v1992_v2 }
 0x161   :  { %v1996_v18 = vpop.eup %1995  ;;  %2013 = vrcp.f32 %v1298_v48  ;;  %v1296_v30 = vadd.f32 1.0, %v1994_v58 }
 0x162   :  { %v1998_v26 = vpop.eup %1997  ;;  %2015 = vrcp.f32 %v1264_v7  ;;  %v1269_v23 = vadd.f32 1.0, %v1996_v18 }
 0x163   :  { %v2000_v41 = vpop.eup %1999  ;;  %2017 = vrcp.f32 %v1296_v30  ;;  %v1301_v21 = vadd.f32 1.0, %v1998_v26 }
 0x164   :  { %v2002_v9 = vpop.eup %2001  ;;  %2019 = vrcp.f32 %v1269_v23  ;;  %v1267_v12 = vadd.f32 1.0, %v2000_v41 }
 0x165   :  { %v2004_v52 = vpop.eup %2003  ;;  %2021 = vrcp.f32 %v1301_v21  ;;  %v1299_v55 = vadd.f32 1.0, %v2002_v9 }
 0x166   :  { %v2006_v39 = vpop.eup %2005  ;;  %2023 = vrcp.f32 %v1267_v12  ;;  %v1270_v8 = vadd.f32 1.0, %v2004_v52 }
 0x167   :  { %v2008_v50 = vpop.eup %2007  ;;  %2025 = vrcp.f32 %v1299_v55  ;;  %v1302_v61 = vadd.f32 1.0, %v2006_v39 }
 0x168   :  { %v2010_v60 = vpop.eup %2009  ;;  %2027 = vrcp.f32 %v1270_v8  ;;  %v1268_v27 = vadd.f32 1.0, %v2008_v50 }
 0x169   :  { %2029 = vrcp.f32 %v1302_v61  ;;  %v1300_v56 = vadd.f32 1.0, %v2010_v60 }
 0x16a   :  { %v2012_v1 = vpop.eup %2011  ;;  %2031 = vrcp.f32 %v1268_v27 }
 0x16b   :  { %v2014_v6 = vpop.eup %2013  ;;  %v1458_v24 = vmul.f32 %v2012_v1, %v2660_v16  ;;  %2033 = vrcp.f32 %v1300_v56 }
 0x16c   :  { %v2016_v29 = vpop.eup %2015  ;;  %v1490_v20 = vmul.f32 %v2014_v6, %v2667_v31 }
 0x16d   :  { %v2018_v32 = vpop.eup %2017  ;;  %1522 = vst [vmem:[%s2820_s3 + $0xd8] sm:$0xff] %v1458_v24  ;;  %v1456_v38 = vmul.f32 %v2016_v29, %v2676_v4 }
 0x16e   :  { %v2020_v25 = vpop.eup %2019  ;;  %1554 = vst [vmem:[%s2820_s3 + $0x1d8] sm:$0xff] %v1490_v20  ;;  %v1488_v34 = vmul.f32 %v2018_v32, %v2679_v36 }
 0x16f   :  { %v2022_v40 = vpop.eup %2021  ;;  %1520 = vst [vmem:[%s2820_s3 + $0xc8] sm:$0xff] %v1456_v38  ;;  %v1461_v16 = vmul.f32 %v2020_v25, %v2686_v35 }
 0x170   :  { %v2024_v31 = vpop.eup %2023  ;;  %1552 = vst [vmem:[%s2820_s3 + $0x1c8] sm:$0xff] %v1488_v34  ;;  %v1493_v4 = vmul.f32 %v2022_v40, %v2689_v15 }
 0x171   :  { %v2026_v54 = vpop.eup %2025  ;;  %1525 = vst [vmem:[%s2820_s3 + $0xf0] sm:$0xff] %v1461_v16  ;;  %v1459_v36 = vmul.f32 %v2024_v31, %v2692_v46 }
 0x172   :  { %v2028_v49 = vpop.eup %2027  ;;  %1557 = vst [vmem:[%s2820_s3 + $0x1f0] sm:$0xff] %v1493_v4  ;;  %v1491_v35 = vmul.f32 %v2026_v54, %v2695_v44 }
 0x173   :  { %v2030_v62 = vpop.eup %2029  ;;  %1523 = vst [vmem:[%s2820_s3 + $0xe0] sm:$0xff] %v1459_v36  ;;  %v1462_v15 = vmul.f32 %v2028_v49, %v2699_v10 }
 0x174   :  { %v2032_v13 = vpop.eup %2031  ;;  %1555 = vst [vmem:[%s2820_s3 + $0x1e0] sm:$0xff] %v1491_v35  ;;  %v1494_v46 = vmul.f32 %v2030_v62, %v2703_v0 }
 0x175   :  { %v2034_v37 = vpop.eup %2033  ;;  %1526 = vst [vmem:[%s2820_s3 + $0xf8] sm:$0xff] %v1462_v15  ;;  %v1460_v44 = vmul.f32 %v2032_v13, %v2708_v47 }
 0x176   :  { %1558 = vst [vmem:[%s2820_s3 + $0x1f8] sm:$0xff] %v1494_v46  ;;  %v1492_v10 = vmul.f32 %v2034_v37, %v2713_v59 }
 0x177   :  { %1524 = vst [vmem:[%s2820_s3 + $0xe8] sm:$0xff] %v1460_v44 }
 0x178   :  { %1556 = vst [vmem:[%s2820_s3 + $0x1e8] sm:$0xff] %v1492_v10 }

// kernel: dcnv2_forward.11
= control target key start
LH: loop header
LB: loop body
LE: loop exit
PB: predicated region body
PF: predicated region fallthrough
CT: control target
= control target key end

     0   :  { %vm347_vm0 = vcmask 1045504   ;;  %vm250_vm1 = vcmask 97280   ;;  %s2688_s1 = inlined_call_operand.vmem [shape: bf16[12,128], index: 1, kind: input, shape index: {}]   ;;  %s2689_s0 = inlined_call_operand.vmem [shape: f32[512,12], index: 0, kind: input, shape index: {}]   ;;  %s2690_s2 = inlined_call_operand.vmem [shape: f32[1,128], index: 2, kind: input, shape index: {}]   ;;  %s2691_s3 = inlined_call_operand.vmem [shape: f32[512,128], index: 3, kind: output, shape index: {}]  }
   0x1   :  { %v1559_v0 = vld [vmem:[%s2688_s1] sm:$0x3f]   ;;  %v148_v2 = vld [vmem:[%s2689_s0 + $0x8] sm:$0xff]  ;;  %v149_v7 = vld [vmem:[%s2689_s0 + $0x10] sm:$0xff] }
   0x2   :  { %v147_v1 = vld [vmem:[%s2689_s0] sm:$0xff]  ;;  %1557 = vmatprep.subr.msk.bf16.mxu0 %vm347_vm0, %v1559_v0  ;;  %1558 = vmatprep.subr.msk.bf16.mxu1 %vm347_vm0, %v1559_v0  ;;  %v349_v4 = vsel %vm347_vm0, %v1559_v0, 0  ;;  %v180_v6 = vld [vmem:[%s2689_s0 + $0x108] sm:$0xff]  ;;  %v150_v8 = vld [vmem:[%s2689_s0 + $0x18] sm:$0xff] }
   0x3   :  { %v179_v3 = vld [vmem:[%s2689_s0 + $0x100] sm:$0xff]  ;;  %v211_v5 = vpack.c.bf16 %v148_v2, %v147_v1  ;;  %1490 = vmatpush3.bf16.msra.mxu0 %v349_v4  ;;  %1556 = vmatpush3.bf16.msra.mxu1 %v349_v4  ;;  %v212_v10 = vpack.c.bf16 %v150_v8, %v149_v7  ;;  %v181_v11 = vld [vmem:[%s2689_s0 + $0x110] sm:$0xff]  ;;  %v182_v12 = vld [vmem:[%s2689_s0 + $0x118] sm:$0xff] }
   0x4   :  { %v227_v9 = vpack.c.bf16 %v180_v6, %v179_v3  ;;  %v151_v13 = vld [vmem:[%s2689_s0 + $0x20] sm:$0xff]  ;;  %v228_v14 = vpack.c.bf16 %v182_v12, %v181_v11  ;;  %v152_v15 = vld [vmem:[%s2689_s0 + $0x28] sm:$0xff]  ;;  %v153_v20 = vld [vmem:[%s2689_s0 + $0x30] sm:$0xff] }
   0x5   :  { %1491 = vmatprep.mubr.msk.bf16.mxu0 %vm250_vm1, %v211_v5  ;;  %v183_v16 = vld [vmem:[%s2689_s0 + $0x120] sm:$0xff]  ;;  %v184_v17 = vld [vmem:[%s2689_s0 + $0x128] sm:$0xff]  ;;  %v213_v18 = vpack.c.bf16 %v152_v15, %v151_v13  ;;  %v154_v21 = vld [vmem:[%s2689_s0 + $0x38] sm:$0xff] }
   0x6   :  { %1523 = vmatprep.mubr.msk.bf16.mxu1 %vm250_vm1, %v227_v9  ;;  %v229_v19 = vpack.c.bf16 %v184_v17, %v183_v16  ;;  %1492 = vmatmul.mubr.msk.bf16.vlgmr.msra.gmra.mrb[0].mxu0 %vm250_vm1, %v212_v10  ;;  %v185_v22 = vld [vmem:[%s2689_s0 + $0x130] sm:$0xff]  ;;  %v186_v23 = vld [vmem:[%s2689_s0 + $0x138] sm:$0xff]  ;;  %v155_v24 = vld [vmem:[%s2689_s0 + $0x40] sm:$0xff]  ;;  %v214_v28 = vpack.c.bf16 %v154_v21, %v153_v20 }
   0x7   :  { %1524 = vmatmul.mubr.msk.bf16.vlgmr.msra.gmra.mrb[0].mxu1 %vm250_vm1, %v228_v14  ;;  %1495 = vmatprep.mubr.msk.bf16.mxu0 %vm250_vm1, %v213_v18  ;;  %v156_v25 = vld [vmem:[%s2689_s0 + $0x48] sm:$0xff]  ;;  %v187_v26 = vld [vmem:[%s2689_s0 + $0x140] sm:$0xff]  ;;  %v230_v29 = vpack.c.bf16 %v186_v23, %v185_v22  ;;  %v157_v32 = vld [vmem:[%s2689_s0 + $0x50] sm:$0xff] }
   0x8   :  { %1527 = vmatprep.mubr.msk.bf16.mxu1 %vm250_vm1, %v229_v19  ;;  %v188_v27 = vld [vmem:[%s2689_s0 + $0x148] sm:$0xff]  ;;  %v215_v30 = vpack.c.bf16 %v156_v25, %v155_v24  ;;  %v158_v33 = vld [vmem:[%s2689_s0 + $0x58] sm:$0xff]  ;;  %v189_v34 = vld [vmem:[%s2689_s0 + $0x150] sm:$0xff] }
   0x9   :  { %v231_v31 = vpack.c.bf16 %v188_v27, %v187_v26  ;;  %v190_v35 = vld [vmem:[%s2689_s0 + $0x158] sm:$0xff]  ;;  %v159_v36 = vld [vmem:[%s2689_s0 + $0x60] sm:$0xff]  ;;  %v160_v37 = vld [vmem:[%s2689_s0 + $0x68] sm:$0xff]  ;;  %v216_v40 = vpack.c.bf16 %v158_v33, %v157_v32 }
   0xa   :  { %v191_v38 = vld [vmem:[%s2689_s0 + $0x160] sm:$0xff]  ;;  %v192_v39 = vld [vmem:[%s2689_s0 + $0x168] sm:$0xff]  ;;  %v232_v41 = vpack.c.bf16 %v190_v35, %v189_v34  ;;  %v217_v42 = vpack.c.bf16 %v160_v37, %v159_v36  ;;  %v161_v44 = vld [vmem:[%s2689_s0 + $0x70] sm:$0xff] }
   0xb   :  { %v233_v43 = vpack.c.bf16 %v192_v39, %v191_v38  ;;  %v162_v45 = vld [vmem:[%s2689_s0 + $0x78] sm:$0xff]  ;;  %v193_v46 = vld [vmem:[%s2689_s0 + $0x170] sm:$0xff]  ;;  %v163_v48 = vld [vmem:[%s2689_s0 + $0x80] sm:$0xff] }
   0xc   :  { %v194_v47 = vld [vmem:[%s2689_s0 + $0x178] sm:$0xff]  ;;  %v164_v49 = vld [vmem:[%s2689_s0 + $0x88] sm:$0xff]  ;;  %v195_v50 = vld [vmem:[%s2689_s0 + $0x180] sm:$0xff]  ;;  %v218_v52 = vpack.c.bf16 %v162_v45, %v161_v44 }
   0xd   :  { %v196_v51 = vld [vmem:[%s2689_s0 + $0x188] sm:$0xff]  ;;  %v234_v53 = vpack.c.bf16 %v194_v47, %v193_v46  ;;  %v219_v54 = vpack.c.bf16 %v164_v49, %v163_v48  ;;  %v165_v56 = vld [vmem:[%s2689_s0 + $0x90] sm:$0xff]  ;;  %v166_v57 = vld [vmem:[%s2689_s0 + $0x98] sm:$0xff] }
   0xe   :  { %1496 = vmatmul.mubr.msk.bf16.gmra.mrb[4].mxu0 %vm250_vm1, %v214_v28  ;;  %v235_v55 = vpack.c.bf16 %v196_v51, %v195_v50  ;;  %v197_v58 = vld [vmem:[%s2689_s0 + $0x190] sm:$0xff]  ;;  %v198_v59 = vld [vmem:[%s2689_s0 + $0x198] sm:$0xff]  ;;  %v167_v60 = vld [vmem:[%s2689_s0 + $0xa0] sm:$0xff]  ;;  %v220_v0 = vpack.c.bf16 %v166_v57, %v165_v56 }
   0xf   :  { %1528 = vmatmul.mubr.msk.bf16.gmra.mrb[4].mxu1 %vm250_vm1, %v230_v29  ;;  %1499 = vmatprep.mubr.msk.bf16.mxu0 %vm250_vm1, %v215_v30  ;;  %v168_v61 = vld [vmem:[%s2689_s0 + $0xa8] sm:$0xff]  ;;  %v199_v62 = vld [vmem:[%s2689_s0 + $0x1a0] sm:$0xff]  ;;  %v236_v1 = vpack.c.bf16 %v198_v59, %v197_v58  ;;  %v169_v4 = vld [vmem:[%s2689_s0 + $0xb0] sm:$0xff] }
  0x10   :  { %1531 = vmatprep.mubr.msk.bf16.mxu1 %vm250_vm1, %v231_v31  ;;  %v200_v63 = vld [vmem:[%s2689_s0 + $0x1a8] sm:$0xff]  ;;  %v221_v2 = vpack.c.bf16 %v168_v61, %v167_v60  ;;  %v170_v5 = vld [vmem:[%s2689_s0 + $0xb8] sm:$0xff]  ;;  %v201_v6 = vld [vmem:[%s2689_s0 + $0x1b0] sm:$0xff] }
  0x11   :  { %v237_v3 = vpack.c.bf16 %v200_v63, %v199_v62  ;;  %v202_v7 = vld [vmem:[%s2689_s0 + $0x1b8] sm:$0xff]  ;;  %v171_v8 = vld [vmem:[%s2689_s0 + $0xc0] sm:$0xff]  ;;  %v172_v9 = vld [vmem:[%s2689_s0 + $0xc8] sm:$0xff]  ;;  %v222_v12 = vpack.c.bf16 %v170_v5, %v169_v4 }
  0x12   :  { %v203_v10 = vld [vmem:[%s2689_s0 + $0x1c0] sm:$0xff]  ;;  %v204_v11 = vld [vmem:[%s2689_s0 + $0x1c8] sm:$0xff]  ;;  %v238_v13 = vpack.c.bf16 %v202_v7, %v201_v6  ;;  %v223_v14 = vpack.c.bf16 %v172_v9, %v171_v8  ;;  %v173_v16 = vld [vmem:[%s2689_s0 + $0xd0] sm:$0xff] }
  0x13   :  { %v239_v15 = vpack.c.bf16 %v204_v11, %v203_v10  ;;  %v174_v17 = vld [vmem:[%s2689_s0 + $0xd8] sm:$0xff]  ;;  %v205_v18 = vld [vmem:[%s2689_s0 + $0x1d0] sm:$0xff]  ;;  %v175_v20 = vld [vmem:[%s2689_s0 + $0xe0] sm:$0xff] }
  0x14   :  { %v206_v19 = vld [vmem:[%s2689_s0 + $0x1d8] sm:$0xff]  ;;  %v176_v21 = vld [vmem:[%s2689_s0 + $0xe8] sm:$0xff]  ;;  %v207_v22 = vld [vmem:[%s2689_s0 + $0x1e0] sm:$0xff]  ;;  %v224_v24 = vpack.c.bf16 %v174_v17, %v173_v16 }
  0x15   :  { %v208_v23 = vld [vmem:[%s2689_s0 + $0x1e8] sm:$0xff]  ;;  %v240_v25 = vpack.c.bf16 %v206_v19, %v205_v18  ;;  %v225_v26 = vpack.c.bf16 %v176_v21, %v175_v20  ;;  %v177_v28 = vld [vmem:[%s2689_s0 + $0xf0] sm:$0xff]  ;;  %v178_v29 = vld [vmem:[%s2689_s0 + $0xf8] sm:$0xff] }
  0x16   :  { %1500 = vmatmul.mubr.msk.bf16.gmra.mrb[8].mxu0 %vm250_vm1, %v216_v40  ;;  %v241_v27 = vpack.c.bf16 %v208_v23, %v207_v22  ;;  %v209_v30 = vld [vmem:[%s2689_s0 + $0x1f0] sm:$0xff]  ;;  %v210_v31 = vld [vmem:[%s2689_s0 + $0x1f8] sm:$0xff]  ;;  %v226_v32 = vpack.c.bf16 %v178_v29, %v177_v28  ;;  %v2067_v34 = vld [vmem:[%s2690_s2] ss:$0 sm:$0xff] }
  0x17   :  { %1532 = vmatmul.mubr.msk.bf16.gmra.mrb[8].mxu1 %vm250_vm1, %v232_v41  ;;  %1503 = vmatprep.mubr.msk.bf16.mxu0 %vm250_vm1, %v217_v42  ;;  %v242_v33 = vpack.c.bf16 %v210_v31, %v209_v30 }
  0x18   :  { %1535 = vmatprep.mubr.msk.bf16.mxu1 %vm250_vm1, %v233_v43 }
  0x1e   :  { %1504 = vmatmul.mubr.msk.bf16.gmra.mrb[12].mxu0 %vm250_vm1, %v218_v52 }
  0x1f   :  { %1536 = vmatmul.mubr.msk.bf16.gmra.mrb[12].mxu1 %vm250_vm1, %v234_v53  ;;  %1507 = vmatprep.mubr.msk.bf16.mxu0 %vm250_vm1, %v219_v54 }
  0x20   :  { %1539 = vmatprep.mubr.msk.bf16.mxu1 %vm250_vm1, %v235_v55 }
  0x26   :  { %1508 = vmatmul.mubr.msk.bf16.gmra.mrb[16].mxu0 %vm250_vm1, %v220_v0 }
  0x27   :  { %1540 = vmatmul.mubr.msk.bf16.gmra.mrb[16].mxu1 %vm250_vm1, %v236_v1  ;;  %1511 = vmatprep.mubr.msk.bf16.mxu0 %vm250_vm1, %v221_v2 }
  0x28   :  { %1543 = vmatprep.mubr.msk.bf16.mxu1 %vm250_vm1, %v237_v3 }
  0x2e   :  { %1512 = vmatmul.mubr.msk.bf16.gmra.mrb[20].mxu0 %vm250_vm1, %v222_v12 }
  0x2f   :  { %1544 = vmatmul.mubr.msk.bf16.gmra.mrb[20].mxu1 %vm250_vm1, %v238_v13  ;;  %1515 = vmatprep.mubr.msk.bf16.mxu0 %vm250_vm1, %v223_v14 }
  0x30   :  { %1547 = vmatprep.mubr.msk.bf16.mxu1 %vm250_vm1, %v239_v15 }
  0x36   :  { %1516 = vmatmul.mubr.msk.bf16.gmra.mrb[24].mxu0 %vm250_vm1, %v224_v24 }
  0x37   :  { %1548 = vmatmul.mubr.msk.bf16.gmra.mrb[24].mxu1 %vm250_vm1, %v240_v25  ;;  %1519 = vmatprep.mubr.msk.bf16.mxu0 %vm250_vm1, %v225_v26 }
  0x38   :  { %1551 = vmatprep.mubr.msk.bf16.mxu1 %vm250_vm1, %v241_v27 }
  0x3e   :  { %1520 = vmatmul.mubr.msk.bf16.gmra.mrb[28].mxu0 %vm250_vm1, %v226_v32 }
  0x3f   :  { %1552 = vmatmul.mubr.msk.bf16.gmra.mrb[28].mxu1 %vm250_vm1, %v242_v33 }
  0xd9   :  { %v1493_v35 = vpop.f32.mrb[0].mxu0 }
  0xda   :  { %v1525_v36 = vpop.f32.mrb[0].mxu1  ;;  %v2070_v37 = vadd.f32 %v1493_v35, %v2067_v34  ;;  %v385_v39 = vpop.f32.mrb[1].mxu0 }
  0xdb   :  { %v2073_v38 = vadd.f32 %v1525_v36, %v2067_v34  ;;  %v513_v40 = vpop.f32.mrb[1].mxu1  ;;  %v2076_v41 = vadd.f32 %v2067_v34, %v385_v39  ;;  %v1494_v43 = vpop.f32.mrb[2].mxu0 }
  0xdc   :  { %v2079_v42 = vadd.f32 %v2067_v34, %v513_v40  ;;  %v1526_v44 = vpop.f32.mrb[2].mxu1  ;;  %v908_v45 = vsub.f32 0.0, %v2070_v37  ;;  %v2084_v47 = vadd.f32 %v1494_v43, %v2067_v34  ;;  %v388_v49 = vpop.f32.mrb[3].mxu0 }
  0xdd   :  { %v940_v46 = vsub.f32 0.0, %v2073_v38  ;;  %v2087_v48 = vadd.f32 %v1526_v44, %v2067_v34  ;;  %v516_v50 = vpop.f32.mrb[3].mxu1  ;;  %v906_v51 = vsub.f32 0.0, %v2076_v41  ;;  %v2092_v53 = vadd.f32 %v2067_v34, %v388_v49 }
  0xde   :  { %v938_v52 = vsub.f32 0.0, %v2079_v42  ;;  %v2095_v54 = vadd.f32 %v2067_v34, %v516_v50  ;;  %v974_v55 = vmul.f32 1.442695, %v908_v45  ;;  %v909_v57 = vsub.f32 0.0, %v2084_v47 }
  0xdf   :  { %v1038_v56 = vmul.f32 1.442695, %v940_v46  ;;  %v941_v58 = vsub.f32 0.0, %v2087_v48  ;;  %v970_v59 = vmul.f32 1.442695, %v906_v51  ;;  %v907_v61 = vsub.f32 0.0, %v2092_v53 }
  0xe0   :  { %v1034_v60 = vmul.f32 1.442695, %v938_v52  ;;  %v939_v62 = vsub.f32 0.0, %v2095_v54  ;;  %1560 = vpow2.f32 %v974_v55  ;;  %v976_v63 = vmul.f32 1.442695, %v909_v57 }
  0xe1   :  { %1562 = vpow2.f32 %v1038_v56  ;;  %v1040_v0 = vmul.f32 1.442695, %v941_v58  ;;  %v1497_v1 = vpop.f32.mrb[4].mxu0  ;;  %v972_v3 = vmul.f32 1.442695, %v907_v61 }
  0xe2   :  { %v1529_v2 = vpop.f32.mrb[4].mxu1  ;;  %1564 = vpow2.f32 %v970_v59  ;;  %v2102_v4 = vadd.f32 %v1497_v1, %v2067_v34  ;;  %v401_v6 = vpop.f32.mrb[5].mxu0  ;;  %v1036_v8 = vmul.f32 1.442695, %v939_v62 }
  0xe3   :  { %v2105_v5 = vadd.f32 %v1529_v2, %v2067_v34  ;;  %v529_v7 = vpop.f32.mrb[5].mxu1  ;;  %1566 = vpow2.f32 %v1034_v60  ;;  %v2108_v9 = vadd.f32 %v2067_v34, %v401_v6  ;;  %v1498_v11 = vpop.f32.mrb[6].mxu0 }
  0xe4   :  { %v2111_v10 = vadd.f32 %v2067_v34, %v529_v7  ;;  %v1530_v12 = vpop.f32.mrb[6].mxu1  ;;  %1568 = vpow2.f32 %v976_v63  ;;  %v912_v13 = vsub.f32 0.0, %v2102_v4  ;;  %v2116_v15 = vadd.f32 %v1498_v11, %v2067_v34  ;;  %v404_v16 = vpop.f32.mrb[7].mxu0 }
  0xe5   :  { %v944_v14 = vsub.f32 0.0, %v2105_v5  ;;  %v532_v17 = vpop.f32.mrb[7].mxu1  ;;  %1570 = vpow2.f32 %v1040_v0  ;;  %v910_v18 = vsub.f32 0.0, %v2108_v9  ;;  %v2122_v29 = vadd.f32 %v1530_v12, %v2067_v34 }
  0xe6   :  { %v942_v19 = vsub.f32 0.0, %v2111_v10  ;;  %1572 = vpow2.f32 %v972_v3  ;;  %v982_v20 = vmul.f32 1.442695, %v912_v13  ;;  %v913_v22 = vsub.f32 0.0, %v2116_v15 }
  0xe7   :  { %v1046_v21 = vmul.f32 1.442695, %v944_v14  ;;  %1574 = vpow2.f32 %v1036_v8  ;;  %v978_v23 = vmul.f32 1.442695, %v910_v18  ;;  %v2125_v35 = vadd.f32 %v2067_v34, %v404_v16 }
  0xe8   :  { %v1042_v24 = vmul.f32 1.442695, %v942_v19  ;;  %1576 = vpow2.f32 %v982_v20  ;;  %v984_v25 = vmul.f32 1.442695, %v913_v22  ;;  %v2128_v44 = vadd.f32 %v2067_v34, %v532_v17 }
  0xe9   :  { %1578 = vpow2.f32 %v1046_v21  ;;  %v1501_v26 = vpop.f32.mrb[8].mxu0  ;;  %v945_v55 = vsub.f32 0.0, %v2122_v29  ;;  %v911_v59 = vsub.f32 0.0, %v2125_v35 }
  0xea   :  { %v1533_v27 = vpop.f32.mrb[8].mxu1  ;;  %v1561_v28 = vpop.eup %1560  ;;  %1580 = vpow2.f32 %v978_v23  ;;  %v2132_v56 = vadd.f32 %v1501_v26, %v2067_v34  ;;  %v943_v63 = vsub.f32 0.0, %v2128_v44 }
  0xeb   :  { %v417_v30 = vpop.f32.mrb[9].mxu0  ;;  %v545_v31 = vpop.f32.mrb[9].mxu1  ;;  %v1100_v33 = vadd.f32 1.0, %v1561_v28  ;;  %1582 = vpow2.f32 %v1042_v24  ;;  %v2136_v60 = vadd.f32 %v1533_v27, %v2067_v34  ;;  %v1048_v11 = vmul.f32 1.442695, %v945_v55 }
  0xec   :  { %v1563_v32 = vpop.eup %1562  ;;  %v1502_v36 = vpop.f32.mrb[10].mxu0  ;;  %1584 = vpow2.f32 %v984_v25  ;;  %v2140_v2 = vadd.f32 %v2067_v34, %v417_v30  ;;  %v916_v12 = vsub.f32 0.0, %v2132_v56  ;;  %v980_v18 = vmul.f32 1.442695, %v911_v59 }
  0xed   :  { %v1534_v39 = vpop.f32.mrb[10].mxu1  ;;  %v1565_v40 = vpop.eup %1564  ;;  %v1132_v43 = vadd.f32 1.0, %v1563_v32  ;;  %1586 = vrcp.f32 %v1100_v33  ;;  %v948_v19 = vsub.f32 0.0, %v2136_v60  ;;  %v1044_v24 = vmul.f32 1.442695, %v943_v63 }
  0xee   :  { %v420_v45 = vpop.f32.mrb[11].mxu0  ;;  %v1567_v46 = vpop.eup %1566  ;;  %v1098_v49 = vadd.f32 1.0, %v1565_v40  ;;  %v2153_v25 = vadd.f32 %v2067_v34, %v545_v31  ;;  %v914_v32 = vsub.f32 0.0, %v2140_v2  ;;  %v2161_v33 = vadd.f32 %v1502_v36, %v2067_v34 }
  0xef   :  { %v548_v50 = vpop.f32.mrb[11].mxu1  ;;  %v1569_v51 = vpop.eup %1568  ;;  %1588 = vrcp.f32 %v1132_v43  ;;  %v1130_v52 = vadd.f32 1.0, %v1567_v46  ;;  %v990_v46 = vmul.f32 1.442695, %v916_v12  ;;  %v2167_v55 = vadd.f32 %v2067_v34, %v420_v45 }
  0xf0   :  { %v1571_v57 = vpop.eup %1570  ;;  %1590 = vrcp.f32 %v1098_v49  ;;  %v1101_v58 = vadd.f32 1.0, %v1569_v51  ;;  %v2164_v49 = vadd.f32 %v1534_v39, %v2067_v34  ;;  %v946_v36 = vsub.f32 0.0, %v2153_v25 }
  0xf1   :  { %v1573_v61 = vpop.eup %1572  ;;  %1592 = vrcp.f32 %v1130_v52  ;;  %v1133_v62 = vadd.f32 1.0, %v1571_v57  ;;  %v1505_v3 = vpop.f32.mrb[12].mxu0  ;;  %v1054_v52 = vmul.f32 1.442695, %v948_v19  ;;  %v2172_v59 = vadd.f32 %v2067_v34, %v548_v50 }
  0xf2   :  { %v1575_v0 = vpop.eup %1574  ;;  %1594 = vrcp.f32 %v1101_v58  ;;  %v1099_v1 = vadd.f32 1.0, %v1573_v61  ;;  %v1537_v6 = vpop.f32.mrb[12].mxu1  ;;  %v2177_v63 = vadd.f32 %v1505_v3, %v2067_v34 }
  0xf3   :  { %v1577_v7 = vpop.eup %1576  ;;  %1596 = vrcp.f32 %v1133_v62  ;;  %v1131_v8 = vadd.f32 1.0, %v1575_v0  ;;  %v2143_v13 = vpop.f32.mrb[13].mxu0  ;;  %v917_v62 = vsub.f32 0.0, %v2161_v33 }
  0xf4   :  { %v2145_v14 = vpop.f32.mrb[13].mxu1  ;;  %v1579_v16 = vpop.eup %1578  ;;  %1598 = vrcp.f32 %v1099_v1  ;;  %v1104_v17 = vadd.f32 1.0, %v1577_v7  ;;  %v2189_v1 = vadd.f32 %v1537_v6, %v2067_v34 }
  0xf5   :  { %v2148_v20 = vpop.f32.mrb[14].mxu0  ;;  %v2150_v21 = vpop.f32.mrb[14].mxu1  ;;  %1600 = vrcp.f32 %v1131_v8  ;;  %v1136_v23 = vadd.f32 1.0, %v1579_v16  ;;  %v986_v16 = vmul.f32 1.442695, %v914_v32 }
  0xf6   :  { %v1581_v22 = vpop.eup %1580  ;;  %v2155_v26 = vpop.f32.mrb[15].mxu0  ;;  %1602 = vrcp.f32 %v1104_v17  ;;  %v992_v32 = vmul.f32 1.442695, %v917_v62 }
  0xf7   :  { %v2157_v27 = vpop.f32.mrb[15].mxu1  ;;  %v1583_v28 = vpop.eup %1582  ;;  %v1102_v30 = vadd.f32 1.0, %v1581_v22  ;;  %1604 = vrcp.f32 %v1136_v23  ;;  %v1050_v22 = vmul.f32 1.442695, %v946_v36  ;;  %v947_v23 = vsub.f32 0.0, %v2172_v59 }
  0xf8   :  { %v1585_v40 = vpop.eup %1584  ;;  %v1134_v43 = vadd.f32 1.0, %v1583_v28 }
  0xf9   :  { %v1587_v31 = vpop.eup %1586  ;;  %1606 = vrcp.f32 %v1102_v30  ;;  %v1105_v51 = vadd.f32 1.0, %v1585_v40  ;;  %v2179_v45 = vpop.f32.mrb[16].mxu0  ;;  %v920_v40 = vsub.f32 0.0, %v2177_v63 }
  0xfa   :  { %v1589_v57 = vpop.eup %1588  ;;  %v1292_v58 = vmul.f32 %v1587_v31, %v2070_v37  ;;  %1608 = vrcp.f32 %v1134_v43  ;;  %v2181_v0 = vpop.f32.mrb[16].mxu1  ;;  %v952_v31 = vsub.f32 0.0, %v2189_v1 }
  0xfb   :  { %v1591_v61 = vpop.eup %1590  ;;  %v1324_v39 = vmul.f32 %v1589_v57, %v2073_v38  ;;  %1610 = vrcp.f32 %v1105_v51  ;;  %v949_v38 = vsub.f32 0.0, %v2164_v49  ;;  %v2191_v7 = vpop.f32.mrb[17].mxu0 }
  0xfc   :  { %v1593_v37 = vpop.eup %1592  ;;  %1356 = vst [vmem:[%s2691_s3 + $0x10] sm:$0xff] %v1292_v58  ;;  %v1290_v50 = vmul.f32 %v1591_v61, %v2076_v41  ;;  %1612 = vpow2.f32 %v1048_v11  ;;  %v2193_v3 = vpop.f32.mrb[17].mxu1  ;;  %v915_v41 = vsub.f32 0.0, %v2167_v55 }
  0xfd   :  { %v1595_v8 = vpop.eup %1594  ;;  %1388 = vst [vmem:[%s2691_s3 + $0x110] sm:$0xff] %v1324_v39  ;;  %v1322_v12 = vmul.f32 %v1593_v37, %v2079_v42  ;;  %1614 = vpow2.f32 %v980_v18  ;;  %v2200_v11 = vpop.f32.mrb[18].mxu0  ;;  %v1056_v43 = vmul.f32 1.442695, %v949_v38  ;;  %v1062_v37 = vmul.f32 1.442695, %v952_v31 }
  0xfe   :  { %v2202_v17 = vpop.f32.mrb[18].mxu1  ;;  %v1597_v6 = vpop.eup %1596  ;;  %1354 = vst [vmem:[%s2691_s3] sm:$0xff] %v1290_v50  ;;  %v1293_v19 = vmul.f32 %v1595_v8, %v2084_v47  ;;  %1616 = vpow2.f32 %v1044_v24  ;;  %v2288_v31 = vadd.f32 %v2067_v34, %v2155_v26 }
  0xff   :  { %v2209_v42 = vpop.f32.mrb[19].mxu0  ;;  %v2211_v18 = vpop.f32.mrb[19].mxu1  ;;  %1386 = vst [vmem:[%s2691_s3 + $0x100] sm:$0xff] %v1322_v12  ;;  %v1325_v30 = vmul.f32 %v1597_v6, %v2087_v48  ;;  %1618 = vpow2.f32 %v990_v46  ;;  %v988_v46 = vmul.f32 1.442695, %v915_v41  ;;  %v2261_v6 = vadd.f32 %v2067_v34, %v2143_v13 }
 0x100   :  { %v1599_v28 = vpop.eup %1598  ;;  %1357 = vst [vmem:[%s2691_s3 + $0x18] sm:$0xff] %v1293_v19  ;;  %1620 = vpow2.f32 %v1054_v52  ;;  %v1052_v52 = vmul.f32 1.442695, %v947_v23 }
 0x101   :  { %v1601_v47 = vpop.eup %1600  ;;  %v1291_v24 = vmul.f32 %v1599_v28, %v2092_v53  ;;  %1389 = vst [vmem:[%s2691_s3 + $0x118] sm:$0xff] %v1325_v30  ;;  %1622 = vpow2.f32 %v986_v16  ;;  %v2235_v61 = vpop.f32.mrb[20].mxu0  ;;  %v2272_v28 = vadd.f32 %v2067_v34, %v2145_v14  ;;  %v2279_v30 = vadd.f32 %v2148_v20, %v2067_v34 }
 0x102   :  { %v1603_v51 = vpop.eup %1602  ;;  %v1323_v48 = vmul.f32 %v1601_v47, %v2095_v54  ;;  %1624 = vpow2.f32 %v1050_v22  ;;  %v998_v54 = vmul.f32 1.442695, %v920_v40  ;;  %v2237_v39 = vpop.f32.mrb[20].mxu1  ;;  %v2283_v47 = vadd.f32 %v2150_v21, %v2067_v34 }
 0x103   :  { %v1605_v57 = vpop.eup %1604  ;;  %1355 = vst [vmem:[%s2691_s3 + $0x8] sm:$0xff] %v1291_v24  ;;  %v1296_v53 = vmul.f32 %v1603_v51, %v2102_v4  ;;  %1626 = vpow2.f32 %v992_v32  ;;  %v2243_v50 = vpop.f32.mrb[21].mxu0 }
 0x104   :  { %v1607_v58 = vpop.eup %1606  ;;  %1387 = vst [vmem:[%s2691_s3 + $0x108] sm:$0xff] %v1323_v48  ;;  %v1328_v36 = vmul.f32 %v1605_v57, %v2105_v5  ;;  %1628 = vpow2.f32 %v1056_v43  ;;  %v2245_v38 = vpop.f32.mrb[21].mxu1  ;;  %v918_v43 = vsub.f32 0.0, %v2261_v6  ;;  %v950_v48 = vsub.f32 0.0, %v2272_v28 }
 0x105   :  { %v1609_v62 = vpop.eup %1608  ;;  %1360 = vst [vmem:[%s2691_s3 + $0x30] sm:$0xff] %v1296_v53  ;;  %v1294_v4 = vmul.f32 %v1607_v58, %v2108_v9  ;;  %1630 = vpow2.f32 %v988_v46  ;;  %v2251_v12 = vpop.f32.mrb[22].mxu0 }
 0x106   :  { %v1611_v5 = vpop.eup %1610  ;;  %1392 = vst [vmem:[%s2691_s3 + $0x130] sm:$0xff] %v1328_v36  ;;  %v1326_v8 = vmul.f32 %v1609_v62, %v2111_v10  ;;  %v2253_v16 = vpop.f32.mrb[22].mxu1  ;;  %1632 = vpow2.f32 %v1052_v52  ;;  %v921_v52 = vsub.f32 0.0, %v2279_v30  ;;  %v953_v62 = vsub.f32 0.0, %v2283_v47 }
 0x107   :  { %v1613_v41 = vpop.eup %1612  ;;  %1358 = vst [vmem:[%s2691_s3 + $0x20] sm:$0xff] %v1294_v4  ;;  %v1297_v9 = vmul.f32 %v1611_v5, %v2116_v15  ;;  %v2263_v19 = vpop.f32.mrb[23].mxu0  ;;  %1634 = vpow2.f32 %v998_v54 }
 0x108   :  { %v2265_v10 = vpop.f32.mrb[23].mxu1  ;;  %v1615_v22 = vpop.eup %1614  ;;  %1390 = vst [vmem:[%s2691_s3 + $0x120] sm:$0xff] %v1326_v8  ;;  %v1137_v23 = vadd.f32 1.0, %v1613_v41  ;;  %1636 = vpow2.f32 %v1062_v37  ;;  %v994_v41 = vmul.f32 1.442695, %v918_v43  ;;  %v2316_v43 = vadd.f32 %v2179_v45, %v2067_v34 }
 0x109   :  { %v1617_v15 = vpop.eup %1616  ;;  %1361 = vst [vmem:[%s2691_s3 + $0x38] sm:$0xff] %v1297_v9  ;;  %v1103_v13 = vadd.f32 1.0, %v1615_v22  ;;  %v2291_v46 = vpop.f32.mrb[24].mxu0  ;;  %v919_v9 = vsub.f32 0.0, %v2288_v31 }
 0x10a   :  { %v1619_v32 = vpop.eup %1618  ;;  %1638 = vrcp.f32 %v1137_v23  ;;  %v1135_v40 = vadd.f32 1.0, %v1617_v15  ;;  %v2293_v57 = vpop.f32.mrb[24].mxu1 }
 0x10b   :  { %v1621_v14 = vpop.eup %1620  ;;  %1640 = vrcp.f32 %v1103_v13  ;;  %v1108_v24 = vadd.f32 1.0, %v1619_v32  ;;  %v2296_v58 = vpop.f32.mrb[25].mxu0  ;;  %v1058_v32 = vmul.f32 1.442695, %v950_v48 }
 0x10c   :  { %v1623_v51 = vpop.eup %1622  ;;  %1642 = vrcp.f32 %v1135_v40  ;;  %v1140_v20 = vadd.f32 1.0, %v1621_v14  ;;  %v2298_v36 = vpop.f32.mrb[25].mxu1  ;;  %v2312_v40 = vadd.f32 %v2067_v34, %v2157_v27 }
 0x10d   :  { %v1625_v21 = vpop.eup %1624  ;;  %1644 = vrcp.f32 %v1108_v24  ;;  %v1106_v53 = vadd.f32 1.0, %v1623_v51  ;;  %v2301_v4 = vpop.f32.mrb[26].mxu0  ;;  %v1000_v51 = vmul.f32 1.442695, %v921_v52 }
 0x10e   :  { %v1627_v26 = vpop.eup %1626  ;;  %1646 = vrcp.f32 %v1140_v20  ;;  %v1138_v54 = vadd.f32 1.0, %v1625_v21  ;;  %v2303_v37 = vpop.f32.mrb[26].mxu1 }
 0x10f   :  { %v1629_v5 = vpop.eup %1628  ;;  %1648 = vrcp.f32 %v1106_v53  ;;  %v1109_v8 = vadd.f32 1.0, %v1627_v26  ;;  %v2306_v22 = vpop.f32.mrb[27].mxu0  ;;  %v1064_v53 = vmul.f32 1.442695, %v953_v62  ;;  %v2320_v26 = vadd.f32 %v2181_v0, %v2067_v34 }
 0x110   :  { %v2308_v23 = vpop.f32.mrb[27].mxu1  ;;  %v1631_v15 = vpop.eup %1630  ;;  %1650 = vrcp.f32 %v1138_v54  ;;  %v1141_v13 = vadd.f32 1.0, %v1629_v5  ;;  %v996_v54 = vmul.f32 1.442695, %v919_v9  ;;  %v2324_v5 = vadd.f32 %v2067_v34, %v2191_v7 }
 0x111   :  { %v1633_v14 = vpop.eup %1632  ;;  %1652 = vrcp.f32 %v1109_v8  ;;  %v1107_v24 = vadd.f32 1.0, %v1631_v15  ;;  %v951_v8 = vsub.f32 0.0, %v2312_v40  ;;  %v2329_v62 = vadd.f32 %v2067_v34, %v2193_v3  ;;  %v2331_v15 = vpop.f32.mrb[28].mxu0 }
 0x112   :  { %v1635_v20 = vpop.eup %1634  ;;  %1654 = vrcp.f32 %v1141_v13  ;;  %v1139_v21 = vadd.f32 1.0, %v1633_v14  ;;  %v2333_v0 = vpop.f32.mrb[28].mxu1  ;;  %v924_v7 = vsub.f32 0.0, %v2316_v43  ;;  %v2339_v14 = vadd.f32 %v2200_v11, %v2067_v34 }
 0x113   :  { %v1637_v48 = vpop.eup %1636  ;;  %1656 = vrcp.f32 %v1107_v24  ;;  %v1112_v27 = vadd.f32 1.0, %v1635_v20  ;;  %v2341_v24 = vpop.f32.mrb[29].mxu0 }
 0x114   :  { %v1639_v52 = vpop.eup %1638  ;;  %1658 = vrcp.f32 %v1139_v21  ;;  %v1144_v45 = vadd.f32 1.0, %v1637_v48  ;;  %v2343_v20 = vpop.f32.mrb[29].mxu1  ;;  %v956_v48 = vsub.f32 0.0, %v2320_v26 }
 0x115   :  { %v1641_v13 = vpop.eup %1640  ;;  %v1329_v9 = vmul.f32 %v1639_v52, %v2122_v29  ;;  %1660 = vrcp.f32 %v1112_v27  ;;  %2692 = vst [vmem:[#allocation3_spill] sm:$0xff] %v2343_v20  ;;  %v2349_v29 = vadd.f32 %v2202_v17, %v2067_v34  ;;  %v2351_v27 = vpop.f32.mrb[30].mxu0 }
 0x116   :  { %v1643_v3 = vpop.eup %1642  ;;  %v1295_v21 = vmul.f32 %v1641_v13, %v2125_v35  ;;  %1662 = vrcp.f32 %v1144_v45  ;;  %2693 = vst [vmem:[#allocation4_spill] sm:$0xff] %v2351_v27  ;;  %v2353_v52 = vpop.f32.mrb[30].mxu1  ;;  %v922_v35 = vsub.f32 0.0, %v2324_v5  ;;  %v2362_v45 = vadd.f32 %v2067_v34, %v2209_v42 }
 0x117   :  { %2694 = vst [vmem:[#allocation5_spill] sm:$0xff] %v2353_v52  ;;  %v1645_v11 = vpop.eup %1644  ;;  %1393 = vst [vmem:[%s2691_s3 + $0x138] sm:$0xff] %v1329_v9  ;;  %v1327_v20 = vmul.f32 %v1643_v3, %v2128_v44  ;;  %1664 = vpow2.f32 %v994_v41  ;;  %v2364_v17 = vpop.f32.mrb[31].mxu0  ;;  %v1060_v44 = vmul.f32 1.442695, %v951_v8  ;;  %v954_v41 = vsub.f32 0.0, %v2329_v62 }
 0x118   :  { %2695 = vst [vmem:[#allocation6_spill] sm:$0xff] %v2364_v17  ;;  %v2366_v13 = vpop.f32.mrb[31].mxu1  ;;  %v1647_v27 = vpop.eup %1646  ;;  %1359 = vst [vmem:[%s2691_s3 + $0x28] sm:$0xff] %v1295_v21  ;;  %v1300_v9 = vmul.f32 %v1645_v11, %v2132_v56  ;;  %1666 = vpow2.f32 %v1058_v32  ;;  %v925_v17 = vsub.f32 0.0, %v2339_v14  ;;  %v1070_v32 = vmul.f32 1.442695, %v956_v48 }
 0x119   :  { %2696 = vst [vmem:[#allocation7_spill] sm:$0xff] %v2366_v13  ;;  %v1649_v3 = vpop.eup %1648  ;;  %1391 = vst [vmem:[%s2691_s3 + $0x128] sm:$0xff] %v1327_v20  ;;  %v1332_v42 = vmul.f32 %v1647_v27, %v2136_v60  ;;  %1668 = vpow2.f32 %v1000_v51  ;;  %v1006_v13 = vmul.f32 1.442695, %v924_v7  ;;  %v957_v8 = vsub.f32 0.0, %v2349_v29 }
 0x11a   :  { %v1651_v52 = vpop.eup %1650  ;;  %1364 = vst [vmem:[%s2691_s3 + $0x50] sm:$0xff] %v1300_v9  ;;  %v1298_v56 = vmul.f32 %v1649_v3, %v2140_v2  ;;  %1670 = vpow2.f32 %v1064_v53  ;;  %v1002_v51 = vmul.f32 1.442695, %v922_v35  ;;  %v923_v7 = vsub.f32 0.0, %v2362_v45 }
 0x11b   :  { %v1653_v21 = vpop.eup %1652  ;;  %1396 = vst [vmem:[%s2691_s3 + $0x150] sm:$0xff] %v1332_v42  ;;  %v1330_v60 = vmul.f32 %v1651_v52, %v2153_v25  ;;  %1672 = vpow2.f32 %v996_v54  ;;  %v1066_v53 = vmul.f32 1.442695, %v954_v41  ;;  %v1008_v54 = vmul.f32 1.442695, %v925_v17 }
 0x11c   :  { %v1655_v20 = vpop.eup %1654  ;;  %1362 = vst [vmem:[%s2691_s3 + $0x40] sm:$0xff] %v1298_v56  ;;  %v1301_v2 = vmul.f32 %v1653_v21, %v2161_v33  ;;  %1674 = vpow2.f32 %v1060_v44  ;;  %v1072_v33 = vmul.f32 1.442695, %v957_v8 }
 0x11d   :  { %v1657_v48 = vpop.eup %1656  ;;  %1394 = vst [vmem:[%s2691_s3 + $0x140] sm:$0xff] %v1330_v60  ;;  %v1333_v25 = vmul.f32 %v1655_v20, %v2164_v49  ;;  %1676 = vpow2.f32 %v1006_v13  ;;  %v1004_v49 = vmul.f32 1.442695, %v923_v7  ;;  %v2437_v60 = vadd.f32 %v2067_v34, %v2245_v38 }
 0x11e   :  { %v1659_v27 = vpop.eup %1658  ;;  %1365 = vst [vmem:[%s2691_s3 + $0x58] sm:$0xff] %v1301_v2  ;;  %v1299_v52 = vmul.f32 %v1657_v48, %v2167_v55  ;;  %1678 = vpow2.f32 %v1070_v32  ;;  %v2432_v32 = vadd.f32 %v2067_v34, %v2243_v50 }
 0x11f   :  { %v1661_v11 = vpop.eup %1660  ;;  %1397 = vst [vmem:[%s2691_s3 + $0x158] sm:$0xff] %v1333_v25  ;;  %v1331_v35 = vmul.f32 %v1659_v27, %v2172_v59  ;;  %1680 = vpow2.f32 %v1002_v51  ;;  %v2414_v59 = vadd.f32 %v2067_v34, %v2211_v18  ;;  %v2428_v18 = vadd.f32 %v2237_v39, %v2067_v34 }
 0x120   :  { %v1663_v13 = vpop.eup %1662  ;;  %1363 = vst [vmem:[%s2691_s3 + $0x48] sm:$0xff] %v1299_v52  ;;  %v1304_v17 = vmul.f32 %v1661_v11, %v2177_v63  ;;  %1682 = vpow2.f32 %v1066_v53  ;;  %v2421_v63 = vadd.f32 %v2235_v61, %v2067_v34  ;;  %v926_v25 = vsub.f32 0.0, %v2432_v32 }
 0x121   :  { %v1665_v55 = vpop.eup %1664  ;;  %1395 = vst [vmem:[%s2691_s3 + $0x148] sm:$0xff] %v1331_v35  ;;  %v1336_v9 = vmul.f32 %v1663_v13, %v2189_v1  ;;  %1684 = vpow2.f32 %v1008_v54  ;;  %v955_v21 = vsub.f32 0.0, %v2414_v59  ;;  %v960_v50 = vsub.f32 0.0, %v2428_v18 }
 0x122   :  { %v1667_v44 = vpop.eup %1666  ;;  %1368 = vst [vmem:[%s2691_s3 + $0x70] sm:$0xff] %v1304_v17  ;;  %v1110_v41 = vadd.f32 1.0, %v1665_v55  ;;  %1686 = vpow2.f32 %v1072_v33  ;;  %v928_v7 = vsub.f32 0.0, %v2421_v63  ;;  %v958_v52 = vsub.f32 0.0, %v2437_v60 }
 0x123   :  { %v1669_v3 = vpop.eup %1668  ;;  %1400 = vst [vmem:[%s2691_s3 + $0x170] sm:$0xff] %v1336_v9  ;;  %v1142_v1 = vadd.f32 1.0, %v1667_v44  ;;  %1688 = vpow2.f32 %v1004_v49  ;;  %v1068_v38 = vmul.f32 1.442695, %v955_v21  ;;  %v2445_v49 = vadd.f32 %v2251_v12, %v2067_v34 }
 0x124   :  { %v1671_v42 = vpop.eup %1670  ;;  %1690 = vrcp.f32 %v1110_v41  ;;  %v1113_v56 = vadd.f32 1.0, %v1669_v3  ;;  %v1014_v35 = vmul.f32 1.442695, %v928_v7  ;;  %v1078_v55 = vmul.f32 1.442695, %v960_v50 }
 0x125   :  { %v1673_v61 = vpop.eup %1672  ;;  %1692 = vrcp.f32 %v1142_v1  ;;  %v1145_v8 = vadd.f32 1.0, %v1671_v42  ;;  %v2449_v9 = vadd.f32 %v2253_v16, %v2067_v34  ;;  %v1010_v3 = vmul.f32 1.442695, %v926_v25 }
 0x126   :  { %v1675_v51 = vpop.eup %1674  ;;  %1694 = vrcp.f32 %v1113_v56  ;;  %v1111_v39 = vadd.f32 1.0, %v1673_v61  ;;  %v2453_v1 = vadd.f32 %v2067_v34, %v2263_v19  ;;  %v1074_v56 = vmul.f32 1.442695, %v958_v52 }
 0x127   :  { %v1677_v20 = vpop.eup %1676  ;;  %1696 = vrcp.f32 %v1145_v8  ;;  %v1143_v2 = vadd.f32 1.0, %v1675_v51  ;;  %v2457_v61 = vadd.f32 %v2067_v34, %v2265_v10  ;;  %v929_v21 = vsub.f32 0.0, %v2445_v49 }
 0x128   :  { %v1679_v53 = vpop.eup %1678  ;;  %1698 = vrcp.f32 %v1111_v39  ;;  %v1116_v48 = vadd.f32 1.0, %v1677_v20  ;;  %v2462_v51 = vadd.f32 %v2291_v46, %v2067_v34  ;;  %v961_v7 = vsub.f32 0.0, %v2449_v9 }
 0x129   :  { %v1681_v54 = vpop.eup %1680  ;;  %1700 = vrcp.f32 %v1143_v2  ;;  %v1148_v27 = vadd.f32 1.0, %v1679_v53  ;;  %v2468_v20 = vadd.f32 %v2293_v57, %v2067_v34  ;;  %v927_v50 = vsub.f32 0.0, %v2453_v1 }
 0x12a   :  { %v1683_v33 = vpop.eup %1682  ;;  %1702 = vrcp.f32 %v1116_v48  ;;  %v1114_v11 = vadd.f32 1.0, %v1681_v54  ;;  %v2474_v46 = vadd.f32 %v2067_v34, %v2296_v58  ;;  %v959_v57 = vsub.f32 0.0, %v2457_v61 }
 0x12b   :  { %v1685_v13 = vpop.eup %1684  ;;  %1704 = vrcp.f32 %v1148_v27  ;;  %v1146_v17 = vadd.f32 1.0, %v1683_v33  ;;  %v1016_v25 = vmul.f32 1.442695, %v929_v21  ;;  %v932_v54 = vsub.f32 0.0, %v2462_v51 }
 0x12c   :  { %v1687_v44 = vpop.eup %1686  ;;  %1706 = vrcp.f32 %v1114_v11  ;;  %v1117_v41 = vadd.f32 1.0, %v1685_v13  ;;  %v1012_v33 = vmul.f32 1.442695, %v927_v50  ;;  %v930_v11 = vsub.f32 0.0, %v2474_v46 }
 0x12d   :  { %v1689_v42 = vpop.eup %1688  ;;  %1708 = vrcp.f32 %v1146_v17  ;;  %v1149_v12 = vadd.f32 1.0, %v1687_v44  ;;  %v1076_v13 = vmul.f32 1.442695, %v959_v57  ;;  %v1022_v44 = vmul.f32 1.442695, %v932_v54 }
 0x12e   :  { %v1691_v8 = vpop.eup %1690  ;;  %1710 = vrcp.f32 %v1117_v41  ;;  %v1115_v16 = vadd.f32 1.0, %v1689_v42 }
 0x12f   :  { %v1693_v39 = vpop.eup %1692  ;;  %v1302_v19 = vmul.f32 %v1691_v8, %v2261_v6  ;;  %1712 = vrcp.f32 %v1149_v12 }
 0x130   :  { %v1695_v10 = vpop.eup %1694  ;;  %v1334_v2 = vmul.f32 %v1693_v39, %v2272_v28  ;;  %1714 = vrcp.f32 %v1115_v16  ;;  %v2483_v28 = vadd.f32 %v2067_v34, %v2298_v36  ;;  %v1080_v36 = vmul.f32 1.442695, %v961_v7 }
 0x131   :  { %v1697_v53 = vpop.eup %1696  ;;  %1366 = vst [vmem:[%s2691_s3 + $0x60] sm:$0xff] %v1302_v19  ;;  %v1305_v6 = vmul.f32 %v1695_v10, %v2279_v30  ;;  %1716 = vpow2.f32 %v1068_v38  ;;  %v964_v38 = vsub.f32 0.0, %v2468_v20 }
 0x132   :  { %v1699_v48 = vpop.eup %1698  ;;  %1398 = vst [vmem:[%s2691_s3 + $0x160] sm:$0xff] %v1334_v2  ;;  %v1337_v58 = vmul.f32 %v1697_v53, %v2283_v47  ;;  %1718 = vpow2.f32 %v1014_v35  ;;  %v962_v17 = vsub.f32 0.0, %v2483_v28 }
 0x133   :  { %v1701_v27 = vpop.eup %1700  ;;  %1369 = vst [vmem:[%s2691_s3 + $0x78] sm:$0xff] %v1305_v6  ;;  %v1303_v30 = vmul.f32 %v1699_v48, %v2288_v31  ;;  %1720 = vpow2.f32 %v1078_v55 }
 0x134   :  { %v1703_v52 = vpop.eup %1702  ;;  %1401 = vst [vmem:[%s2691_s3 + $0x178] sm:$0xff] %v1337_v58  ;;  %v1335_v47 = vmul.f32 %v1701_v27, %v2312_v40  ;;  %1722 = vpow2.f32 %v1010_v3  ;;  %v1086_v3 = vmul.f32 1.442695, %v964_v38 }
 0x135   :  { %v1705_v35 = vpop.eup %1704  ;;  %1367 = vst [vmem:[%s2691_s3 + $0x68] sm:$0xff] %v1303_v30  ;;  %v1308_v31 = vmul.f32 %v1703_v52, %v2316_v43  ;;  %1724 = vpow2.f32 %v1074_v56 }
 0x136   :  { %v1707_v55 = vpop.eup %1706  ;;  %1399 = vst [vmem:[%s2691_s3 + $0x168] sm:$0xff] %v1335_v47  ;;  %v1340_v40 = vmul.f32 %v1705_v35, %v2320_v26  ;;  %1726 = vpow2.f32 %v1016_v25  ;;  %v1018_v26 = vmul.f32 1.442695, %v930_v11 }
 0x137   :  { %v1709_v41 = vpop.eup %1708  ;;  %1372 = vst [vmem:[%s2691_s3 + $0x90] sm:$0xff] %v1308_v31  ;;  %v1306_v43 = vmul.f32 %v1707_v55, %v2324_v5  ;;  %1728 = vpow2.f32 %v1080_v36  ;;  %v1082_v5 = vmul.f32 1.442695, %v962_v17 }
 0x138   :  { %v1711_v42 = vpop.eup %1710  ;;  %1404 = vst [vmem:[%s2691_s3 + $0x190] sm:$0xff] %v1340_v40  ;;  %v1338_v12 = vmul.f32 %v1709_v41, %v2329_v62  ;;  %1730 = vpow2.f32 %v1012_v33 }
 0x139   :  { %v1713_v56 = vpop.eup %1712  ;;  %1370 = vst [vmem:[%s2691_s3 + $0x80] sm:$0xff] %v1306_v43  ;;  %v1309_v8 = vmul.f32 %v1711_v42, %v2339_v14  ;;  %1732 = vpow2.f32 %v1076_v13  ;;  %v2531_v14 = vadd.f32 %v2301_v4, %v2067_v34  ;;  %v1816_v4 = vld [vmem:[%s2690_s2] ss:$0 sm:$0xff] }
 0x13a   :  { %v1715_v16 = vpop.eup %1714  ;;  %1402 = vst [vmem:[%s2691_s3 + $0x180] sm:$0xff] %v1338_v12  ;;  %v1341_v21 = vmul.f32 %v1713_v56, %v2349_v29  ;;  %1734 = vpow2.f32 %v1022_v44  ;;  %v2538_v29 = vadd.f32 %v2303_v37, %v2067_v34  ;;  %v2547_v2 = vadd.f32 %v1816_v4, %v2306_v22  ;;  %v2698_v56 = vld [vmem:[#allocation4_spill] sm:$0xff] }
 0x13b   :  { %v1717_v62 = vpop.eup %1716  ;;  %1373 = vst [vmem:[%s2691_s3 + $0x98] sm:$0xff] %v1309_v8  ;;  %v1307_v39 = vmul.f32 %v1715_v16, %v2362_v45  ;;  %1736 = vpow2.f32 %v1086_v3  ;;  %v2550_v34 = vadd.f32 %v1816_v4, %v2308_v23  ;;  %v933_v57 = vsub.f32 0.0, %v2531_v14 }
 0x13c   :  { %v1719_v19 = vpop.eup %1718  ;;  %1405 = vst [vmem:[%s2691_s3 + $0x198] sm:$0xff] %v1341_v21  ;;  %v1147_v7 = vadd.f32 1.0, %v1717_v62  ;;  %1738 = vpow2.f32 %v1018_v26  ;;  %v965_v25 = vsub.f32 0.0, %v2538_v29  ;;  %v931_v27 = vsub.f32 0.0, %v2547_v2  ;;  %v2699_v21 = vld [vmem:[#allocation5_spill] sm:$0xff] }
 0x13d   :  { %v1721_v10 = vpop.eup %1720  ;;  %1371 = vst [vmem:[%s2691_s3 + $0x88] sm:$0xff] %v1307_v39  ;;  %v1120_v45 = vadd.f32 1.0, %v1719_v19  ;;  %1740 = vpow2.f32 %v1082_v5  ;;  %v963_v23 = vsub.f32 0.0, %v2550_v34  ;;  %v1024_v47 = vmul.f32 1.442695, %v933_v57 }
 0x13e   :  { %v1723_v50 = vpop.eup %1722  ;;  %1742 = vrcp.f32 %v1147_v7  ;;  %v1152_v53 = vadd.f32 1.0, %v1721_v10  ;;  %v2557_v33 = vadd.f32 %v1816_v4, %v2331_v15  ;;  %v1088_v31 = vmul.f32 1.442695, %v965_v25  ;;  %v2697_v15 = vld [vmem:[#allocation3_spill] sm:$0xff]  ;;  %v2700_v10 = vld [vmem:[#allocation6_spill] sm:$0xff] }
 0x13f   :  { %v1725_v37 = vpop.eup %1724  ;;  %1744 = vrcp.f32 %v1120_v45  ;;  %v1118_v6 = vadd.f32 1.0, %v1723_v50  ;;  %v2560_v13 = vadd.f32 %v1816_v4, %v2333_v0  ;;  %v1020_v40 = vmul.f32 1.442695, %v931_v27 }
 0x140   :  { %v1727_v48 = vpop.eup %1726  ;;  %1746 = vrcp.f32 %v1152_v53  ;;  %v1150_v58 = vadd.f32 1.0, %v1725_v37  ;;  %v2563_v44 = vadd.f32 %v1816_v4, %v2341_v24  ;;  %v1084_v3 = vmul.f32 1.442695, %v963_v23 }
 0x141   :  { %v1729_v54 = vpop.eup %1728  ;;  %1748 = vrcp.f32 %v1118_v6  ;;  %v1121_v22 = vadd.f32 1.0, %v1727_v48  ;;  %v2566_v42 = vadd.f32 %v1816_v4, %v2697_v15  ;;  %v936_v0 = vsub.f32 0.0, %v2557_v33  ;;  %v2701_v6 = vld [vmem:[#allocation7_spill] sm:$0xff] }
 0x142   :  { %v1731_v30 = vpop.eup %1730  ;;  %1750 = vrcp.f32 %v1150_v58  ;;  %v1153_v36 = vadd.f32 1.0, %v1729_v54  ;;  %v2570_v8 = vadd.f32 %v1816_v4, %v2698_v56  ;;  %v968_v24 = vsub.f32 0.0, %v2560_v13 }
 0x143   :  { %v1733_v38 = vpop.eup %1732  ;;  %1752 = vrcp.f32 %v1121_v22  ;;  %v1119_v52 = vadd.f32 1.0, %v1731_v30  ;;  %v2574_v62 = vadd.f32 %v1816_v4, %v2699_v21  ;;  %v934_v7 = vsub.f32 0.0, %v2563_v44 }
 0x144   :  { %v1735_v11 = vpop.eup %1734  ;;  %1754 = vrcp.f32 %v1153_v36  ;;  %v1151_v35 = vadd.f32 1.0, %v1733_v38  ;;  %v2579_v45 = vadd.f32 %v1816_v4, %v2700_v10  ;;  %v966_v37 = vsub.f32 0.0, %v2566_v42 }
 0x145   :  { %v1737_v17 = vpop.eup %1736  ;;  %1756 = vrcp.f32 %v1119_v52  ;;  %v1124_v55 = vadd.f32 1.0, %v1735_v11  ;;  %v2584_v57 = vadd.f32 %v1816_v4, %v2701_v6  ;;  %v1030_v58 = vmul.f32 1.442695, %v936_v0 }
 0x146   :  { %v1739_v41 = vpop.eup %1738  ;;  %1758 = vrcp.f32 %v1151_v35  ;;  %v1156_v43 = vadd.f32 1.0, %v1737_v17  ;;  %v937_v25 = vsub.f32 0.0, %v2570_v8  ;;  %v1094_v4 = vmul.f32 1.442695, %v968_v24 }
 0x147   :  { %v1741_v12 = vpop.eup %1740  ;;  %1760 = vrcp.f32 %v1124_v55  ;;  %v1122_v26 = vadd.f32 1.0, %v1739_v41  ;;  %v969_v22 = vsub.f32 0.0, %v2574_v62  ;;  %v1026_v30 = vmul.f32 1.442695, %v934_v7 }
 0x148   :  { %v1743_v5 = vpop.eup %1742  ;;  %1762 = vrcp.f32 %v1156_v43  ;;  %v1154_v16 = vadd.f32 1.0, %v1741_v12  ;;  %v935_v36 = vsub.f32 0.0, %v2579_v45  ;;  %v1090_v38 = vmul.f32 1.442695, %v966_v37 }
 0x149   :  { %v1745_v39 = vpop.eup %1744  ;;  %v1339_v19 = vmul.f32 %v1743_v5, %v2414_v59  ;;  %1764 = vrcp.f32 %v1122_v26  ;;  %v967_v52 = vsub.f32 0.0, %v2584_v57  ;;  %v1032_v11 = vmul.f32 1.442695, %v937_v25 }
 0x14a   :  { %v1747_v50 = vpop.eup %1746  ;;  %v1312_v53 = vmul.f32 %v1745_v39, %v2421_v63  ;;  %1766 = vrcp.f32 %v1154_v16 }
 0x14b   :  { %v1749_v48 = vpop.eup %1748  ;;  %1403 = vst [vmem:[%s2691_s3 + $0x188] sm:$0xff] %v1339_v19  ;;  %v1344_v59 = vmul.f32 %v1747_v50, %v2428_v18  ;;  %1768 = vpow2.f32 %v1024_v47 }
 0x14c   :  { %v1751_v54 = vpop.eup %1750  ;;  %1376 = vst [vmem:[%s2691_s3 + $0xb0] sm:$0xff] %v1312_v53  ;;  %v1310_v63 = vmul.f32 %v1749_v48, %v2432_v32  ;;  %1770 = vpow2.f32 %v1088_v31  ;;  %v1096_v31 = vmul.f32 1.442695, %v969_v22 }
 0x14d   :  { %v1753_v27 = vpop.eup %1752  ;;  %1408 = vst [vmem:[%s2691_s3 + $0x1b0] sm:$0xff] %v1344_v59  ;;  %v1342_v18 = vmul.f32 %v1751_v54, %v2437_v60  ;;  %1772 = vpow2.f32 %v1020_v40 }
 0x14e   :  { %v1755_v23 = vpop.eup %1754  ;;  %1374 = vst [vmem:[%s2691_s3 + $0xa0] sm:$0xff] %v1310_v63  ;;  %v1313_v32 = vmul.f32 %v1753_v27, %v2445_v49  ;;  %1774 = vpow2.f32 %v1084_v3 }
 0x14f   :  { %v1757_v47 = vpop.eup %1756  ;;  %1406 = vst [vmem:[%s2691_s3 + $0x1a0] sm:$0xff] %v1342_v18  ;;  %v1345_v60 = vmul.f32 %v1755_v23, %v2449_v9  ;;  %1776 = vpow2.f32 %v1030_v58  ;;  %v1028_v9 = vmul.f32 1.442695, %v935_v36 }
 0x150   :  { %v1759_v35 = vpop.eup %1758  ;;  %1377 = vst [vmem:[%s2691_s3 + $0xb8] sm:$0xff] %v1313_v32  ;;  %v1311_v49 = vmul.f32 %v1757_v47, %v2453_v1  ;;  %1778 = vpow2.f32 %v1094_v4  ;;  %v1092_v1 = vmul.f32 1.442695, %v967_v52 }
 0x151   :  { %v1761_v17 = vpop.eup %1760  ;;  %1409 = vst [vmem:[%s2691_s3 + $0x1b8] sm:$0xff] %v1345_v60  ;;  %v1343_v55 = vmul.f32 %v1759_v35, %v2457_v61  ;;  %1780 = vpow2.f32 %v1026_v30 }
 0x152   :  { %v1763_v40 = vpop.eup %1762  ;;  %1375 = vst [vmem:[%s2691_s3 + $0xa8] sm:$0xff] %v1311_v49  ;;  %v1316_v41 = vmul.f32 %v1761_v17, %v2462_v51  ;;  %1782 = vpow2.f32 %v1090_v38 }
 0x153   :  { %v1765_v43 = vpop.eup %1764  ;;  %1407 = vst [vmem:[%s2691_s3 + $0x1a8] sm:$0xff] %v1343_v55  ;;  %v1348_v3 = vmul.f32 %v1763_v40, %v2468_v20  ;;  %1784 = vpow2.f32 %v1032_v11 }
 0x154   :  { %v1767_v61 = vpop.eup %1766  ;;  %1380 = vst [vmem:[%s2691_s3 + $0xd0] sm:$0xff] %v1316_v41  ;;  %v1314_v15 = vmul.f32 %v1765_v43, %v2474_v46  ;;  %1786 = vpow2.f32 %v1096_v31 }
 0x155   :  { %v1769_v12 = vpop.eup %1768  ;;  %1412 = vst [vmem:[%s2691_s3 + $0x1d0] sm:$0xff] %v1348_v3  ;;  %v1346_v51 = vmul.f32 %v1767_v61, %v2483_v28  ;;  %1788 = vpow2.f32 %v1028_v9 }
 0x156   :  { %v1771_v26 = vpop.eup %1770  ;;  %1378 = vst [vmem:[%s2691_s3 + $0xc0] sm:$0xff] %v1314_v15  ;;  %v1125_v20 = vadd.f32 1.0, %v1769_v12  ;;  %1790 = vpow2.f32 %v1092_v1 }
 0x157   :  { %v1773_v0 = vpop.eup %1772  ;;  %1410 = vst [vmem:[%s2691_s3 + $0x1c0] sm:$0xff] %v1346_v51  ;;  %v1157_v46 = vadd.f32 1.0, %v1771_v26 }
 0x158   :  { %v1775_v56 = vpop.eup %1774  ;;  %1792 = vrcp.f32 %v1125_v20  ;;  %v1123_v5 = vadd.f32 1.0, %v1773_v0 }
 0x159   :  { %v1777_v16 = vpop.eup %1776  ;;  %1794 = vrcp.f32 %v1157_v46  ;;  %v1155_v28 = vadd.f32 1.0, %v1775_v56 }
 0x15a   :  { %v1779_v24 = vpop.eup %1778  ;;  %1796 = vrcp.f32 %v1123_v5  ;;  %v1128_v21 = vadd.f32 1.0, %v1777_v16 }
 0x15b   :  { %v1781_v39 = vpop.eup %1780  ;;  %1798 = vrcp.f32 %v1155_v28  ;;  %v1160_v19 = vadd.f32 1.0, %v1779_v24 }
 0x15c   :  { %v1783_v7 = vpop.eup %1782  ;;  %1800 = vrcp.f32 %v1128_v21  ;;  %v1126_v10 = vadd.f32 1.0, %v1781_v39 }
 0x15d   :  { %v1785_v50 = vpop.eup %1784  ;;  %1802 = vrcp.f32 %v1160_v19  ;;  %v1158_v53 = vadd.f32 1.0, %v1783_v7 }
 0x15e   :  { %v1787_v37 = vpop.eup %1786  ;;  %1804 = vrcp.f32 %v1126_v10  ;;  %v1129_v6 = vadd.f32 1.0, %v1785_v50 }
 0x15f   :  { %v1789_v48 = vpop.eup %1788  ;;  %1806 = vrcp.f32 %v1158_v53  ;;  %v1161_v59 = vadd.f32 1.0, %v1787_v37 }
 0x160   :  { %v1791_v58 = vpop.eup %1790  ;;  %1808 = vrcp.f32 %v1129_v6  ;;  %v1127_v25 = vadd.f32 1.0, %v1789_v48 }
 0x161   :  { %1810 = vrcp.f32 %v1161_v59  ;;  %v1159_v54 = vadd.f32 1.0, %v1791_v58 }
 0x162   :  { %v1793_v63 = vpop.eup %1792  ;;  %1812 = vrcp.f32 %v1127_v25 }
 0x163   :  { %v1795_v4 = vpop.eup %1794  ;;  %v1317_v22 = vmul.f32 %v1793_v63, %v2531_v14  ;;  %1814 = vrcp.f32 %v1159_v54 }
 0x164   :  { %v1797_v27 = vpop.eup %1796  ;;  %v1349_v18 = vmul.f32 %v1795_v4, %v2538_v29 }
 0x165   :  { %v1799_v30 = vpop.eup %1798  ;;  %1381 = vst [vmem:[%s2691_s3 + $0xd8] sm:$0xff] %v1317_v22  ;;  %v1315_v36 = vmul.f32 %v1797_v27, %v2547_v2 }
 0x166   :  { %v1801_v23 = vpop.eup %1800  ;;  %1413 = vst [vmem:[%s2691_s3 + $0x1d8] sm:$0xff] %v1349_v18  ;;  %v1347_v32 = vmul.f32 %v1799_v30, %v2550_v34 }
 0x167   :  { %v1803_v38 = vpop.eup %1802  ;;  %1379 = vst [vmem:[%s2691_s3 + $0xc8] sm:$0xff] %v1315_v36  ;;  %v1320_v14 = vmul.f32 %v1801_v23, %v2557_v33 }
 0x168   :  { %v1805_v29 = vpop.eup %1804  ;;  %1411 = vst [vmem:[%s2691_s3 + $0x1c8] sm:$0xff] %v1347_v32  ;;  %v1352_v2 = vmul.f32 %v1803_v38, %v2560_v13 }
 0x169   :  { %v1807_v52 = vpop.eup %1806  ;;  %1384 = vst [vmem:[%s2691_s3 + $0xf0] sm:$0xff] %v1320_v14  ;;  %v1318_v34 = vmul.f32 %v1805_v29, %v2563_v44 }
 0x16a   :  { %v1809_v47 = vpop.eup %1808  ;;  %1416 = vst [vmem:[%s2691_s3 + $0x1f0] sm:$0xff] %v1352_v2  ;;  %v1350_v33 = vmul.f32 %v1807_v52, %v2566_v42 }
 0x16b   :  { %v1811_v60 = vpop.eup %1810  ;;  %1382 = vst [vmem:[%s2691_s3 + $0xe0] sm:$0xff] %v1318_v34  ;;  %v1321_v13 = vmul.f32 %v1809_v47, %v2570_v8 }
 0x16c   :  { %v1813_v11 = vpop.eup %1812  ;;  %1414 = vst [vmem:[%s2691_s3 + $0x1e0] sm:$0xff] %v1350_v33  ;;  %v1353_v44 = vmul.f32 %v1811_v60, %v2574_v62 }
 0x16d   :  { %v1815_v35 = vpop.eup %1814  ;;  %1385 = vst [vmem:[%s2691_s3 + $0xf8] sm:$0xff] %v1321_v13  ;;  %v1319_v42 = vmul.f32 %v1813_v11, %v2579_v45 }
 0x16e   :  { %1417 = vst [vmem:[%s2691_s3 + $0x1f8] sm:$0xff] %v1353_v44  ;;  %v1351_v8 = vmul.f32 %v1815_v35, %v2584_v57 }
 0x16f   :  { %1383 = vst [vmem:[%s2691_s3 + $0xe8] sm:$0xff] %v1319_v42 }
 0x170   :  { %1415 = vst [vmem:[%s2691_s3 + $0x1e8] sm:$0xff] %v1351_v8 }

</bundles_post_ra>
